<compile_context>
chip_gen: v5e
topology: v5e:2x2
jax: 0.10.0
libtpu: 0.0.40
codegen_flags: <defaults>
</compile_context>

<pallas_src>
import jax
import jax.numpy as jnp
import numpy as np
from jax.experimental import pallas as pl
from jax.experimental.pallas import tpu as pltpu

POOL = 4  # two max_pool3d(kernel=2) back-to-back == one max pool with window/stride 4


def _make_kernel(S, n_pool):
    def kernel(x_ref, w_ref, o_ref):
        # ---- conv (+ bias via ones-row / bias-column) as a single MXU matmul ----
        y = jnp.dot(w_ref[...], x_ref[...], preferred_element_type=jnp.float32)  # (Cout, S)

        # ---- softmax over channels (sublane axis); per-lane independent ----
        m = jnp.max(y, axis=0, keepdims=True)            # (1, S)
        e = jnp.exp(y - m)                               # (Cout, S)
        s = jnp.sum(e, axis=0, keepdims=True)            # (1, S)
        inv = pl.reciprocal(s, approx=True)              # EUP vrcp
        inv = inv * (2.0 - s * inv)                      # one Newton step -> f32-accurate
        v = e * inv                                      # (Cout, S)

        # ---- maxpool(4,4,4): pool-window index is lane-MAJOR, so each level is a
        # max over 4 CONTIGUOUS lane chunks, all on values (vregs), no scratch ----
        cw = S // POOL
        for _ in range(3):
            v = jnp.maximum(jnp.maximum(v[:, 0:cw], v[:, cw:2 * cw]),
                            jnp.maximum(v[:, 2 * cw:3 * cw], v[:, 3 * cw:4 * cw]))
            cw //= POOL
        # v: (Cout, n_pool) already in (dp, hp, wp) raster order -> one store
        o_ref[:, :n_pool] = v.astype(o_ref.dtype)

    return kernel


@jax.jit
def conv3d_softmax_pool(x, conv_weight, conv_bias):
    """x: (B, Cin, D, H, W); conv_weight: (Cout, Cin, K, K, K); conv_bias: (Cout,)"""
    B, Cin, D, H, W = x.shape
    Cout, _, K, _, _ = conv_weight.shape
    Do, Ho, Wo = D - K + 1, H - K + 1, W - K + 1
    Dp, Hp, Wp = Do // POOL, Ho // POOL, Wo // POOL
    Du, Hu, Wu = Dp * POOL, Hp * POOL, Wp * POOL       # conv sites that survive pooling
    n_pool = Dp * Hp * Wp
    S = Du * Hu * Wu                                   # == n_pool * POOL**3
    Kc = Cin * K * K * K

    # ---- im2col, lane order = pool-window-index major / pool-block minor ----
    xf = x.astype(jnp.float32)
    cols = []
    for ci in range(Cin):
        for kd in range(K):
            for kh in range(K):
                for kw in range(K):
                    p = xf[:, ci, kd:kd + Du, kh:kh + Hu, kw:kw + Wu]   # (B, Du, Hu, Wu)
                    p = p.reshape(B, Dp, POOL, Hp, POOL, Wp, POOL)      # (B,dp,pd,hp,ph,wp,pw)
                    p = p.transpose(0, 2, 4, 6, 1, 3, 5)                # (B,pd,ph,pw,dp,hp,wp)
                    cols.append(p.reshape(B, 1, S))
    cols.append(jnp.ones((B, 1, S), jnp.float32))                       # bias row (exactly 1.0)
    xcol = jnp.concatenate(cols, axis=1)                                # (B, Kc+1, S)

    w2 = jnp.concatenate(
        [conv_weight.reshape(Cout, Kc).astype(jnp.float32),
         conv_bias.reshape(Cout, 1).astype(jnp.float32)], axis=1)       # (Cout, Kc+1)

    n_pad = ((n_pool + 127) // 128) * 128               # lane-dense output block

    out = pl.pallas_call(
        _make_kernel(S, n_pool),
        out_shape=jax.ShapeDtypeStruct((B, Cout, n_pad), jnp.float32),
        grid=(B,),
        in_specs=[
            pl.BlockSpec((None, Kc + 1, S), lambda b: (b, 0, 0)),
            pl.BlockSpec((Cout, Kc + 1), lambda b: (0, 0)),
        ],
        out_specs=pl.BlockSpec((None, Cout, n_pad), lambda b: (b, 0, 0)),
        compiler_params=pltpu.CompilerParams(dimension_semantics=("parallel",)),
        cost_estimate=pl.CostEstimate(
            flops=2 * B * Cout * (Kc + 1) * S,
            transcendentals=B * Cout * S,
            bytes_accessed=xcol.size * 4 + w2.size * 4 + B * Cout * n_pad * 4),
    )(xcol, w2)

    # back to PyTorch NC D'H'W' convention (drop lane padding)
    return out[:, :, :n_pool].reshape(B, Cout, Dp, Hp, Wp).astype(x.dtype)


def _reference(x, w, b):
    y = jax.lax.conv_general_dilated(
        x, w, window_strides=(1, 1, 1), padding="VALID",
        dimension_numbers=("NCDHW", "OIDHW", "NCDHW"),
        precision=jax.lax.Precision.HIGHEST)
    y = y + b[None, :, None, None, None]
    y = jax.nn.softmax(y, axis=1)
    for _ in range(2):
        y = jax.lax.reduce_window(y, -jnp.inf, jax.lax.max,
                                  (1, 1, 2, 2, 2), (1, 1, 2, 2, 2), "VALID")
    return y


if __name__ == "__main__":
    B, Cin, Cout, K = 2, 3, 16, 3
    D = H = W = 16

    key = jax.random.PRNGKey(0)
    kx, kw, kb = jax.random.split(key, 3)
    x = jax.random.normal(kx, (B, Cin, D, H, W), dtype=jnp.float32)
    conv_weight = jax.random.normal(kw, (Cout, Cin, K, K, K), dtype=jnp.float32) * 0.1
    conv_bias = jax.random.normal(kb, (Cout,), dtype=jnp.float32) * 0.1

    out = jax.block_until_ready(conv3d_softmax_pool(x, conv_weight, conv_bias))

    ref = jax.block_until_ready(_reference(x, conv_weight, conv_bias))
    assert out.shape == (B, Cout, (D - K + 1) // 4, (H - K + 1) // 4, (W - K + 1) // 4), out.shape
    np.testing.assert_allclose(np.asarray(out), np.asarray(ref), rtol=1e-4, atol=1e-5)

    print("KERNEL_OK")
</pallas_src>

<mosaic_0001>
module attributes {stable_mosaic.version = 11 : i64} {
  func.func @kernel(%arg0: i32, %arg1: memref<1x82x1728xf32, #tpu.memory_space<vmem>>, %arg2: memref<16x82xf32, #tpu.memory_space<vmem>>, %arg3: memref<1x16x128xf32, #tpu.memory_space<vmem>>) attributes {dimension_semantics = [#tpu.dimension_semantics<parallel>], iteration_bounds = array<i64: 2>, scalar_prefetch = 0 : i64, scratch_operands = 0 : i64, tpu.core_type = #tpu.core_type<tc>, window_params = [{transform_indices = @transform_0, window_bounds = array<i64: 1, 82, 1728>}, {pipeline_mode = #tpu.pipeline_mode<synchronous>, transform_indices = @transform_1, window_bounds = array<i64: 16, 82>}, {transform_indices = @transform_2, window_bounds = array<i64: 1, 16, 128>}]} {
    %c0 = arith.constant 0 : index
    %c0_0 = arith.constant 0 : index
    %0 = vector.load %arg2[%c0, %c0_0] : memref<16x82xf32, #tpu.memory_space<vmem>>, vector<16x82xf32>
    %c0_1 = arith.constant 0 : index
    %c0_2 = arith.constant 0 : index
    %c0_3 = arith.constant 0 : index
    %1 = vector.load %arg1[%c0_1, %c0_2, %c0_3] : memref<1x82x1728xf32, #tpu.memory_space<vmem>>, vector<1x82x1728xf32>
    %2 = vector.shape_cast %1 : vector<1x82x1728xf32> to vector<82x1728xf32>
    %cst = arith.constant dense<0.000000e+00> : vector<16x1728xf32>
    %3 = tpu.matmul %0, %2, %cst {dimension_numbers = #tpu.dot_dimension_numbers<[1], [0], [0], [1], [0, 0, 1, 1], [], []>} : vector<16x82xf32>, vector<82x1728xf32>, vector<16x1728xf32> -> vector<16x1728xf32>
    %cst_4 = arith.constant dense<0xFF800000> : vector<1728xf32>
    %4 = vector.multi_reduction <maximumf>, %3, %cst_4 [0] : vector<16x1728xf32> to vector<1728xf32>
    %5 = vector.shape_cast %4 : vector<1728xf32> to vector<1x1728xf32>
    %6 = vector.broadcast %5 : vector<1x1728xf32> to vector<16x1728xf32>
    %7 = arith.subf %3, %6 : vector<16x1728xf32>
    %8 = math.exp %7 : vector<16x1728xf32>
    %cst_5 = arith.constant dense<0.000000e+00> : vector<1728xf32>
    %9 = vector.multi_reduction <add>, %8, %cst_5 [0] : vector<16x1728xf32> to vector<1728xf32>
    %10 = vector.shape_cast %9 : vector<1728xf32> to vector<1x1728xf32>
    %11 = tpu.reciprocal %10 {approx = true} : vector<1x1728xf32> -> vector<1x1728xf32>
    %12 = arith.mulf %10, %11 : vector<1x1728xf32>
    %cst_6 = arith.constant 2.000000e+00 : f32
    %13 = vector.broadcast %cst_6 : f32 to vector<1x1728xf32>
    %14 = arith.subf %13, %12 : vector<1x1728xf32>
    %15 = arith.mulf %11, %14 : vector<1x1728xf32>
    %16 = vector.broadcast %15 : vector<1x1728xf32> to vector<16x1728xf32>
    %17 = arith.mulf %8, %16 : vector<16x1728xf32>
    %18 = vector.extract_strided_slice %17 {offsets = [0, 0], sizes = [16, 432], strides = [1, 1]} : vector<16x1728xf32> to vector<16x432xf32>
    %19 = vector.extract_strided_slice %17 {offsets = [0, 432], sizes = [16, 432], strides = [1, 1]} : vector<16x1728xf32> to vector<16x432xf32>
    %20 = arith.maximumf %18, %19 : vector<16x432xf32>
    %21 = vector.extract_strided_slice %17 {offsets = [0, 864], sizes = [16, 432], strides = [1, 1]} : vector<16x1728xf32> to vector<16x432xf32>
    %22 = vector.extract_strided_slice %17 {offsets = [0, 1296], sizes = [16, 432], strides = [1, 1]} : vector<16x1728xf32> to vector<16x432xf32>
    %23 = arith.maximumf %21, %22 : vector<16x432xf32>
    %24 = arith.maximumf %20, %23 : vector<16x432xf32>
    %25 = vector.extract_strided_slice %24 {offsets = [0, 0], sizes = [16, 108], strides = [1, 1]} : vector<16x432xf32> to vector<16x108xf32>
    %26 = vector.extract_strided_slice %24 {offsets = [0, 108], sizes = [16, 108], strides = [1, 1]} : vector<16x432xf32> to vector<16x108xf32>
    %27 = arith.maximumf %25, %26 : vector<16x108xf32>
    %28 = vector.extract_strided_slice %24 {offsets = [0, 216], sizes = [16, 108], strides = [1, 1]} : vector<16x432xf32> to vector<16x108xf32>
    %29 = vector.extract_strided_slice %24 {offsets = [0, 324], sizes = [16, 108], strides = [1, 1]} : vector<16x432xf32> to vector<16x108xf32>
    %30 = arith.maximumf %28, %29 : vector<16x108xf32>
    %31 = arith.maximumf %27, %30 : vector<16x108xf32>
    %32 = vector.extract_strided_slice %31 {offsets = [0, 0], sizes = [16, 27], strides = [1, 1]} : vector<16x108xf32> to vector<16x27xf32>
    %33 = vector.extract_strided_slice %31 {offsets = [0, 27], sizes = [16, 27], strides = [1, 1]} : vector<16x108xf32> to vector<16x27xf32>
    %34 = arith.maximumf %32, %33 : vector<16x27xf32>
    %35 = vector.extract_strided_slice %31 {offsets = [0, 54], sizes = [16, 27], strides = [1, 1]} : vector<16x108xf32> to vector<16x27xf32>
    %36 = vector.extract_strided_slice %31 {offsets = [0, 81], sizes = [16, 27], strides = [1, 1]} : vector<16x108xf32> to vector<16x27xf32>
    %37 = arith.maximumf %35, %36 : vector<16x27xf32>
    %38 = arith.maximumf %34, %37 : vector<16x27xf32>
    %c0_7 = arith.constant 0 : index
    %c0_8 = arith.constant 0 : index
    %c0_9 = arith.constant 0 : index
    %39 = vector.load %arg3[%c0_7, %c0_8, %c0_9] : memref<1x16x128xf32, #tpu.memory_space<vmem>>, vector<1x16x27xf32>
    %40 = vector.shape_cast %39 : vector<1x16x27xf32> to vector<16x27xf32>
    %41 = vector.shape_cast %38 : vector<16x27xf32> to vector<1x16x27xf32>
    tpu.vector_store %arg3[%c0_7, %c0_8, %c0_9], %41 {strides = array<i32>} : memref<1x16x128xf32, #tpu.memory_space<vmem>>, vector<1x16x27xf32>,
    return
  }
  func.func @transform_0(%arg0: i32) -> (i32, i32, i32) {
    %c0_i32 = arith.constant 0 : i32
    %c0_i32_0 = arith.constant 0 : i32
    %c0_i32_1 = arith.constant 0 : i32
    return %arg0, %c0_i32, %c0_i32_0 : i32, i32, i32
  }
  func.func @transform_1(%arg0: i32) -> (i32, i32) {
    %c0_i32 = arith.constant 0 : i32
    %c0_i32_0 = arith.constant 0 : i32
    %c0_i32_1 = arith.constant 0 : i32
    return %c0_i32, %c0_i32_0 : i32, i32
  }
  func.func @transform_2(%arg0: i32) -> (i32, i32, i32) {
    %c0_i32 = arith.constant 0 : i32
    %c0_i32_0 = arith.constant 0 : i32
    %c0_i32_1 = arith.constant 0 : i32
    return %arg0, %c0_i32, %c0_i32_0 : i32, i32, i32
  }
}

</mosaic_0001>

<bundles_post_ra>
// kernel: squeeze.81
= control target key start
LH: loop header
LB: loop body
LE: loop exit
PB: predicated region body
PF: predicated region fallthrough
CT: control target
= control target key end

     0   :  { %vm579_vm0 = vcmask 31744   ;;  %vm1299_vm1 = vcmask 1047556   ;;  %s4390_s22 = smov 124   ;;  %s6361_s0 = inlined_call_operand.vmem [shape: f32[2,1,12,12,12], index: 0, kind: input, shape index: {}]   ;;  %s6362_s1 = inlined_call_operand.vmem [shape: f32[2,3,4,3,4,3,4], index: 1, kind: output, shape index: {}]  }
   0x1   :  { %v4098_v0 = vld [vmem:[%s6361_s0 + $0x6] sm:$0x3]  ;;  %v4099_v1 = vld [vmem:[%s6361_s0 + $0x4] sm:$0x3]  ;;  %v4100_v2 = vld [vmem:[%s6361_s0 + $0x2] sm:$0x3] }
   0x2   :  { %567 = vst [vmem:[#allocation1 + $0x18] sm:$0x3] %v4098_v0  ;;  %v576_v3 = vld [vmem:[%s6361_s0] sm:$0x3]  ;;  %v4090_v4 = vld [vmem:[%s6361_s0 + $0x16] sm:$0x3] }
   0x3   :  { %571 = vst [vmem:[#allocation1 + $0x10] sm:$0x3] %v4099_v1  ;;  %v4091_v5 = vld [vmem:[%s6361_s0 + $0x14] sm:$0x3]  ;;  %v4092_v6 = vld [vmem:[%s6361_s0 + $0x12] sm:$0x3] }
   0x4   :  { %575 = vst [vmem:[#allocation1 + $0x8] sm:$0x3] %v4100_v2  ;;  %v4093_v7 = vld [vmem:[%s6361_s0 + $0x10] sm:$0x3]  ;;  %v4082_v17 = vld [vmem:[%s6361_s0 + $0x26] sm:$0x3] }
   0x5   :  { %577 = vst [vmem:[#allocation1] sm:$0x3] %v576_v3  ;;  %v4083_v19 = vld [vmem:[%s6361_s0 + $0x24] sm:$0x3]  ;;  %v4084_v24 = vld [vmem:[%s6361_s0 + $0x22] sm:$0x3] }
   0x6   :  { %535 = vst [vmem:[#allocation1 + $0x58] sm:$0x3] %v4090_v4  ;;  %v4085_v25 = vld [vmem:[%s6361_s0 + $0x20] sm:$0x3]  ;;  %v4094_v26 = vld [vmem:[%s6361_s0 + $0xe] sm:$0x3] }
   0x7   :  { %539 = vst [vmem:[#allocation1 + $0x50] sm:$0x3] %v4091_v5  ;;  %v4095_v27 = vld [vmem:[%s6361_s0 + $0xc] sm:$0x3]  ;;  %v4096_v28 = vld [vmem:[%s6361_s0 + $0xa] sm:$0x3] }
   0x8   :  { %543 = vst [vmem:[#allocation1 + $0x48] sm:$0x3] %v4092_v6  ;;  %v4097_v29 = vld [vmem:[%s6361_s0 + $0x8] sm:$0x3]  ;;  %v4086_v33 = vld [vmem:[%s6361_s0 + $0x1e] sm:$0x3] }
   0x9   :  { %v592_v8 = vld [vmem:[#allocation1 + $0x18] sm:$0x3]   ;;  %547 = vst [vmem:[#allocation1 + $0x40] sm:$0x3] %v4093_v7  ;;  %v4087_v37 = vld [vmem:[%s6361_s0 + $0x1c] sm:$0x3] }
   0xa   :  { %v587_v9 = vld [vmem:[#allocation1 + $0x10] sm:$0x3]   ;;  %595 = vst.msk [vmem:[#allocation0 + $0x30] ss:$8 sm:$0x3] %vm579_vm0, %v592_v8  }
   0xb   :  { %v1298_v10 = vld.sshfl [vmem:[#allocation1 + $0x10] sm:$0xff pattern:$0x98100000]   ;;  %v582_v11 = vld [vmem:[#allocation1 + $0x8] sm:$0x3]  }
   0xc   :  { %590 = vst.msk [vmem:[#allocation0 + $0x20] ss:$8 sm:$0x3] %vm579_vm0, %v587_v9   ;;  %v578_v12 = vld [vmem:[#allocation1] sm:$0x3]  }
   0xd   :  { %585 = vst.msk [vmem:[#allocation0 + $0x10] ss:$8 sm:$0x3] %vm579_vm0, %v582_v11   ;;  %v1296_v13 = vld.sshfl [vmem:[#allocation1] sm:$0xff pattern:$0x99999810]  }
   0xe   :  { %580 = vst.msk [vmem:[#allocation0] ss:$8 sm:$0x3] %vm579_vm0, %v578_v12   ;;  %v1300_v14 = vsel %vm1299_vm1, %v1298_v10, %v1296_v13  ;;  %v627_v15 = vld [vmem:[#allocation1 + $0x50] sm:$0x3]  }
   0xf   :  { %1301 = vrot.lane.b32.xlu0 %v1300_v14, %s4390_s22  ;;  %v622_v16 = vld [vmem:[#allocation1 + $0x48] sm:$0x3]   ;;  %630 = vst.msk [vmem:[#allocation0 + $0xa0] ss:$8 sm:$0x3] %vm579_vm0, %v627_v15  }
  0x10   :  { %v617_v18 = vld [vmem:[#allocation1 + $0x40] sm:$0x3]   ;;  %625 = vst.msk [vmem:[#allocation0 + $0x90] ss:$8 sm:$0x3] %vm579_vm0, %v622_v16  }
  0x11   :  { %620 = vst.msk [vmem:[#allocation0 + $0x80] ss:$8 sm:$0x3] %vm579_vm0, %v617_v18   ;;  %v1322_v20 = vld.sshfl [vmem:[#allocation1 + $0x40] sm:$0xff pattern:$0x99999810]  }
  0x12   :  { %v1324_v21 = vld.sshfl [vmem:[#allocation1 + $0x50] sm:$0xff pattern:$0x98100000]   ;;  %503 = vst [vmem:[#allocation1 + $0x98] sm:$0x3] %v4082_v17 }
  0x13   :  { %v632_v22 = vld [vmem:[#allocation1 + $0x58] sm:$0x3]   ;;  %v1326_v23 = vsel %vm1299_vm1, %v1324_v21, %v1322_v20  ;;  %507 = vst [vmem:[#allocation1 + $0x90] sm:$0x3] %v4083_v19  ;;  %v4088_v40 = vld [vmem:[%s6361_s0 + $0x1a] sm:$0x3] }
  0x14   :  { %635 = vst.msk [vmem:[#allocation0 + $0xb0] ss:$8 sm:$0x3] %vm579_vm0, %v632_v22   ;;  %1327 = vrot.lane.b32.xlu1 %v1326_v23, %s4390_s22  ;;  %v4089_v42 = vld [vmem:[%s6361_s0 + $0x18] sm:$0x3] }
  0x15   :  { %511 = vst [vmem:[#allocation1 + $0x88] sm:$0x3] %v4084_v24  ;;  %v4078_v46 = vld [vmem:[%s6361_s0 + $0x2e] sm:$0x3]  ;;  %v4079_v47 = vld [vmem:[%s6361_s0 + $0x2c] sm:$0x3] }
  0x16   :  { %515 = vst [vmem:[#allocation1 + $0x80] sm:$0x3] %v4085_v25  ;;  %v4080_v48 = vld [vmem:[%s6361_s0 + $0x2a] sm:$0x3]  ;;  %v4081_v49 = vld [vmem:[%s6361_s0 + $0x28] sm:$0x3] }
  0x17   :  { %551 = vst [vmem:[#allocation1 + $0x38] sm:$0x3] %v4094_v26  ;;  %v4074_v50 = vld [vmem:[%s6361_s0 + $0x36] sm:$0x3]  ;;  %v4075_v51 = vld [vmem:[%s6361_s0 + $0x34] sm:$0x3] }
  0x18   :  { %555 = vst [vmem:[#allocation1 + $0x30] sm:$0x3] %v4095_v27  ;;  %v4076_v52 = vld [vmem:[%s6361_s0 + $0x32] sm:$0x3]  ;;  %v4077_v54 = vld [vmem:[%s6361_s0 + $0x30] sm:$0x3] }
  0x19   :  { %559 = vst [vmem:[#allocation1 + $0x28] sm:$0x3] %v4096_v28  ;;  %v672_v30 = vld [vmem:[#allocation1 + $0x98] sm:$0x3]   ;;  %v4070_v56 = vld [vmem:[%s6361_s0 + $0x3e] sm:$0x3] }
  0x1a   :  { %563 = vst [vmem:[#allocation1 + $0x20] sm:$0x3] %v4097_v29  ;;  %v667_v31 = vld [vmem:[#allocation1 + $0x90] sm:$0x3]   ;;  %v4071_v58 = vld [vmem:[%s6361_s0 + $0x3c] sm:$0x3] }
  0x1b   :  { %v1350_v32 = vld.sshfl [vmem:[#allocation1 + $0x90] sm:$0xff pattern:$0x98100000]   ;;  %670 = vst.msk [vmem:[#allocation0 + $0x120] ss:$8 sm:$0x3] %vm579_vm0, %v667_v31  }
  0x1c   :  { %v662_v34 = vld [vmem:[#allocation1 + $0x88] sm:$0x3]   ;;  %675 = vst.msk [vmem:[#allocation0 + $0x130] ss:$8 sm:$0x3] %vm579_vm0, %v672_v30  }
  0x1d   :  { %v657_v35 = vld [vmem:[#allocation1 + $0x80] sm:$0x3]   ;;  %665 = vst.msk [vmem:[#allocation0 + $0x110] ss:$8 sm:$0x3] %vm579_vm0, %v662_v34  }
  0x1e   :  { %660 = vst.msk [vmem:[#allocation0 + $0x100] ss:$8 sm:$0x3] %vm579_vm0, %v657_v35   ;;  %v1348_v36 = vld.sshfl [vmem:[#allocation1 + $0x80] sm:$0xff pattern:$0x99999810]  }
  0x1f   :  { %v1352_v38 = vsel %vm1299_vm1, %v1350_v32, %v1348_v36  ;;  %v1311_v39 = vld.sshfl [vmem:[#allocation1 + $0x30] sm:$0xff pattern:$0x98100000]   ;;  %519 = vst [vmem:[#allocation1 + $0x78] sm:$0x3] %v4086_v33 }
  0x20   :  { %1353 = vrot.lane.b32.xlu2 %v1352_v38, %s4390_s22  ;;  %v602_v41 = vld [vmem:[#allocation1 + $0x28] sm:$0x3]   ;;  %523 = vst [vmem:[#allocation1 + $0x70] sm:$0x3] %v4087_v37  ;;  %v4072_v62 = vld [vmem:[%s6361_s0 + $0x3a] sm:$0x3] }
  0x21   :  { %v597_v43 = vld [vmem:[#allocation1 + $0x20] sm:$0x3]   ;;  %605 = vst.msk [vmem:[#allocation0 + $0x50] ss:$8 sm:$0x3] %vm579_vm0, %v602_v41  }
  0x22   :  { %600 = vst.msk [vmem:[#allocation0 + $0x40] ss:$8 sm:$0x3] %vm579_vm0, %v597_v43   ;;  %v1309_v44 = vld.sshfl [vmem:[#allocation1 + $0x20] sm:$0xff pattern:$0x99999810]  }
  0x23   :  { %v4483_v45 = vsel %vm1299_vm1, %v1311_v39, %v1309_v44  ;;  %527 = vst [vmem:[#allocation1 + $0x68] sm:$0x3] %v4088_v40  ;;  %v4073_v63 = vld [vmem:[%s6361_s0 + $0x38] sm:$0x3]  ;;  %v4066_v2 = vld [vmem:[%s6361_s0 + $0x46] sm:$0x3] }
  0x24   :  { %1314 = vrot.lane.b32.xlu0 %v4483_v45, %s4390_s22  ;;  %531 = vst [vmem:[#allocation1 + $0x60] sm:$0x3] %v4089_v42  ;;  %v4067_v3 = vld [vmem:[%s6361_s0 + $0x44] sm:$0x3]  ;;  %v4068_v4 = vld [vmem:[%s6361_s0 + $0x42] sm:$0x3] }
  0x25   :  { %487 = vst [vmem:[#allocation1 + $0xb8] sm:$0x3] %v4078_v46  ;;  %v4069_v5 = vld [vmem:[%s6361_s0 + $0x40] sm:$0x3]  ;;  %v4062_v7 = vld [vmem:[%s6361_s0 + $0x4e] sm:$0x3] }
  0x26   :  { %491 = vst [vmem:[#allocation1 + $0xb0] sm:$0x3] %v4079_v47  ;;  %v4063_v8 = vld [vmem:[%s6361_s0 + $0x4c] sm:$0x3]  ;;  %v4064_v15 = vld [vmem:[%s6361_s0 + $0x4a] sm:$0x3] }
  0x27   :  { %495 = vst [vmem:[#allocation1 + $0xa8] sm:$0x3] %v4080_v48  ;;  %v1337_v53 = vld.sshfl [vmem:[#allocation1 + $0x70] sm:$0xff pattern:$0x98100000]  }
  0x28   :  { %499 = vst [vmem:[#allocation1 + $0xa0] sm:$0x3] %v4081_v49  ;;  %v4065_v20 = vld [vmem:[%s6361_s0 + $0x48] sm:$0x3]  ;;  %v4058_v27 = vld [vmem:[%s6361_s0 + $0x56] sm:$0x3] }
  0x29   :  { %471 = vst [vmem:[#allocation1 + $0xd8] sm:$0x3] %v4074_v50  ;;  %v4059_v28 = vld [vmem:[%s6361_s0 + $0x54] sm:$0x3]  ;;  %v4060_v29 = vld [vmem:[%s6361_s0 + $0x52] sm:$0x3] }
  0x2a   :  { %v642_v55 = vld [vmem:[#allocation1 + $0x68] sm:$0x3]   ;;  %475 = vst [vmem:[#allocation1 + $0xd0] sm:$0x3] %v4075_v51  ;;  %v4061_v32 = vld [vmem:[%s6361_s0 + $0x50] sm:$0x3] }
  0x2b   :  { %v637_v57 = vld [vmem:[#allocation1 + $0x60] sm:$0x3]   ;;  %645 = vst.msk [vmem:[#allocation0 + $0xd0] ss:$8 sm:$0x3] %vm579_vm0, %v642_v55  }
  0x2c   :  { %640 = vst.msk [vmem:[#allocation0 + $0xc0] ss:$8 sm:$0x3] %vm579_vm0, %v637_v57   ;;  %v1335_v59 = vld.sshfl [vmem:[#allocation1 + $0x60] sm:$0xff pattern:$0x99999810]  }
  0x2d   :  { %v4520_v60 = vsel %vm1299_vm1, %v1337_v53, %v1335_v59  ;;  %v1363_v61 = vld.sshfl [vmem:[#allocation1 + $0xb0] sm:$0xff pattern:$0x98100000]   ;;  %479 = vst [vmem:[#allocation1 + $0xc8] sm:$0x3] %v4076_v52 }
  0x2e   :  { %1340 = vrot.lane.b32.xlu1 %v4520_v60, %s4390_s22  ;;  %483 = vst [vmem:[#allocation1 + $0xc0] sm:$0x3] %v4077_v54  ;;  %v4054_v33 = vld [vmem:[%s6361_s0 + $0x5e] sm:$0x3]  ;;  %v4055_v39 = vld [vmem:[%s6361_s0 + $0x5c] sm:$0x3] }
  0x2f   :  { %v1361_v0 = vld.sshfl [vmem:[#allocation1 + $0xa0] sm:$0xff pattern:$0x99999810]   ;;  %455 = vst [vmem:[#allocation1 + $0xf8] sm:$0x3] %v4070_v56 }
  0x30   :  { %v4531_v1 = vsel %vm1299_vm1, %v1363_v61, %v1361_v0  ;;  %459 = vst [vmem:[#allocation1 + $0xf0] sm:$0x3] %v4071_v58  ;;  %v4056_v42 = vld [vmem:[%s6361_s0 + $0x5a] sm:$0x3]  ;;  %v4057_v43 = vld [vmem:[%s6361_s0 + $0x58] sm:$0x3] }
  0x31   :  { %1366 = vrot.lane.b32.xlu2 %v4531_v1, %s4390_s22  ;;  %463 = vst [vmem:[#allocation1 + $0xe8] sm:$0x3] %v4072_v62  ;;  %v1376_v6 = vld.sshfl [vmem:[#allocation1 + $0xd0] sm:$0xff pattern:$0x98100000]  }
  0x32   :  { %467 = vst [vmem:[#allocation1 + $0xe0] sm:$0x3] %v4073_v63  ;;  %v4050_v48 = vld [vmem:[%s6361_s0 + $0x66] sm:$0x3]  ;;  %v4051_v49 = vld [vmem:[%s6361_s0 + $0x64] sm:$0x3] }
  0x33   :  { %439 = vst [vmem:[#allocation1 + $0x118] sm:$0x3] %v4066_v2  ;;  %v4052_v50 = vld [vmem:[%s6361_s0 + $0x62] sm:$0x3]  ;;  %v4053_v51 = vld [vmem:[%s6361_s0 + $0x60] sm:$0x3] }
  0x34   :  { %443 = vst [vmem:[#allocation1 + $0x110] sm:$0x3] %v4067_v3  ;;  %v4046_v52 = vld [vmem:[%s6361_s0 + $0x6e] sm:$0x3]  ;;  %v4047_v53 = vld [vmem:[%s6361_s0 + $0x6c] sm:$0x3] }
  0x35   :  { %v1374_v9 = vld.sshfl [vmem:[#allocation1 + $0xc0] sm:$0xff pattern:$0x99999810]   ;;  %447 = vst [vmem:[#allocation1 + $0x108] sm:$0x3] %v4068_v4 }
  0x36   :  { %v4554_v10 = vsel %vm1299_vm1, %v1376_v6, %v1374_v9  ;;  %451 = vst [vmem:[#allocation1 + $0x100] sm:$0x3] %v4069_v5  ;;  %v4048_v58 = vld [vmem:[%s6361_s0 + $0x6a] sm:$0x3]  ;;  %v4049_v0 = vld [vmem:[%s6361_s0 + $0x68] sm:$0x3] }
  0x37   :  { %1379 = vrot.lane.b32.xlu0 %v4554_v10, %s4390_s22  ;;  %v1389_v11 = vld.sshfl [vmem:[#allocation1 + $0xf0] sm:$0xff pattern:$0x98100000]   ;;  %423 = vst [vmem:[#allocation1 + $0x138] sm:$0x3] %v4062_v7 }
  0x38   :  { %v722_v12 = vld [vmem:[#allocation1 + $0xe8] sm:$0x3]   ;;  %427 = vst [vmem:[#allocation1 + $0x130] sm:$0x3] %v4063_v8  ;;  %v4042_v8 = vld [vmem:[%s6361_s0 + $0x76] sm:$0x3] }
  0x39   :  { %v717_v13 = vld [vmem:[#allocation1 + $0xe0] sm:$0x3]   ;;  %725 = vst.msk [vmem:[#allocation0 + $0x1d0] ss:$8 sm:$0x3] %vm579_vm0, %v722_v12  }
  0x3a   :  { %720 = vst.msk [vmem:[#allocation0 + $0x1c0] ss:$8 sm:$0x3] %vm579_vm0, %v717_v13   ;;  %v1387_v14 = vld.sshfl [vmem:[#allocation1 + $0xe0] sm:$0xff pattern:$0x99999810]  }
  0x3b   :  { %v4564_v16 = vsel %vm1299_vm1, %v1389_v11, %v1387_v14  ;;  %v747_v17 = vld [vmem:[#allocation1 + $0x110] sm:$0x3]   ;;  %v752_v24 = vld [vmem:[#allocation1 + $0x118] sm:$0x3]   ;;  %431 = vst [vmem:[#allocation1 + $0x128] sm:$0x3] %v4064_v15 }
  0x3c   :  { %v1402_v18 = vld.sshfl [vmem:[#allocation1 + $0x110] sm:$0xff pattern:$0x98100000]   ;;  %1392 = vrot.lane.b32.xlu1 %v4564_v16, %s4390_s22  ;;  %v742_v19 = vld [vmem:[#allocation1 + $0x108] sm:$0x3]  }
  0x3d   :  { %750 = vst.msk [vmem:[#allocation0 + $0x220] ss:$8 sm:$0x3] %vm579_vm0, %v747_v17   ;;  %v737_v21 = vld [vmem:[#allocation1 + $0x100] sm:$0x3]  }
  0x3e   :  { %745 = vst.msk [vmem:[#allocation0 + $0x210] ss:$8 sm:$0x3] %vm579_vm0, %v742_v19   ;;  %v1400_v22 = vld.sshfl [vmem:[#allocation1 + $0x100] sm:$0xff pattern:$0x99999810]  }
  0x3f   :  { %740 = vst.msk [vmem:[#allocation0 + $0x200] ss:$8 sm:$0x3] %vm579_vm0, %v737_v21   ;;  %v4575_v23 = vsel %vm1299_vm1, %v1402_v18, %v1400_v22  ;;  %v767_v25 = vld [vmem:[#allocation1 + $0x130] sm:$0x3]  }
  0x40   :  { %1405 = vrot.lane.b32.xlu2 %v4575_v23, %s4390_s22  ;;  %755 = vst.msk [vmem:[#allocation0 + $0x230] ss:$8 sm:$0x3] %vm579_vm0, %v752_v24   ;;  %v772_v26 = vld [vmem:[#allocation1 + $0x138] sm:$0x3]  }
  0x41   :  { %435 = vst [vmem:[#allocation1 + $0x120] sm:$0x3] %v4065_v20  ;;  %v1415_v30 = vld.sshfl [vmem:[#allocation1 + $0x130] sm:$0xff pattern:$0x98100000]  }
  0x42   :  { %770 = vst.msk [vmem:[#allocation0 + $0x260] ss:$8 sm:$0x3] %vm579_vm0, %v767_v25   ;;  %v762_v31 = vld [vmem:[#allocation1 + $0x128] sm:$0x3]  }
  0x43   :  { %775 = vst.msk [vmem:[#allocation0 + $0x270] ss:$8 sm:$0x3] %vm579_vm0, %v772_v26   ;;  %v4043_v9 = vld [vmem:[%s6361_s0 + $0x74] sm:$0x3] }
  0x44   :  { %407 = vst [vmem:[#allocation1 + $0x158] sm:$0x3] %v4058_v27  ;;  %v4044_v11 = vld [vmem:[%s6361_s0 + $0x72] sm:$0x3]  ;;  %v4045_v14 = vld [vmem:[%s6361_s0 + $0x70] sm:$0x3] }
  0x45   :  { %411 = vst [vmem:[#allocation1 + $0x150] sm:$0x3] %v4059_v28  ;;  %v4038_v15 = vld [vmem:[%s6361_s0 + $0x7e] sm:$0x3]  ;;  %v4039_v22 = vld [vmem:[%s6361_s0 + $0x7c] sm:$0x3] }
  0x46   :  { %415 = vst [vmem:[#allocation1 + $0x148] sm:$0x3] %v4060_v29  ;;  %v4040_v24 = vld [vmem:[%s6361_s0 + $0x7a] sm:$0x3]  ;;  %v4041_v25 = vld [vmem:[%s6361_s0 + $0x78] sm:$0x3] }
  0x47   :  { %765 = vst.msk [vmem:[#allocation0 + $0x250] ss:$8 sm:$0x3] %vm579_vm0, %v762_v31   ;;  %v4034_v26 = vld [vmem:[%s6361_s0 + $0x86] sm:$0x3] }
  0x48   :  { %v757_v34 = vld [vmem:[#allocation1 + $0x120] sm:$0x3]   ;;  %419 = vst [vmem:[#allocation1 + $0x140] sm:$0x3] %v4061_v32  ;;  %v4035_v28 = vld [vmem:[%s6361_s0 + $0x84] sm:$0x3] }
  0x49   :  { %v1413_v35 = vld.sshfl [vmem:[#allocation1 + $0x120] sm:$0xff pattern:$0x99999810]   ;;  %760 = vst.msk [vmem:[#allocation0 + $0x240] ss:$8 sm:$0x3] %vm579_vm0, %v757_v34  }
  0x4a   :  { %v4600_v36 = vsel %vm1299_vm1, %v1415_v30, %v1413_v35  ;;  %391 = vst [vmem:[#allocation1 + $0x178] sm:$0x3] %v4054_v33  ;;  %v4036_v29 = vld [vmem:[%s6361_s0 + $0x82] sm:$0x3]  ;;  %v4037_v32 = vld [vmem:[%s6361_s0 + $0x80] sm:$0x3] }
  0x4b   :  { %1418 = vrot.lane.b32.xlu0 %v4600_v36, %s4390_s22  ;;  %v792_v38 = vld [vmem:[#allocation1 + $0x158] sm:$0x3]   ;;  %395 = vst [vmem:[#allocation1 + $0x170] sm:$0x3] %v4055_v39  ;;  %v4030_v33 = vld [vmem:[%s6361_s0 + $0x8e] sm:$0x3] }
  0x4c   :  { %v787_v37 = vld [vmem:[#allocation1 + $0x150] sm:$0x3]   ;;  %795 = vst.msk [vmem:[#allocation0 + $0x2b0] ss:$8 sm:$0x3] %vm579_vm0, %v792_v38  }
  0x4d   :  { %v782_v40 = vld [vmem:[#allocation1 + $0x148] sm:$0x3]   ;;  %790 = vst.msk [vmem:[#allocation0 + $0x2a0] ss:$8 sm:$0x3] %vm579_vm0, %v787_v37  }
  0x4e   :  { %785 = vst.msk [vmem:[#allocation0 + $0x290] ss:$8 sm:$0x3] %vm579_vm0, %v782_v40   ;;  %v1428_v41 = vld.sshfl [vmem:[#allocation1 + $0x150] sm:$0xff pattern:$0x98100000]  }
  0x4f   :  { %v777_v44 = vld [vmem:[#allocation1 + $0x140] sm:$0x3]   ;;  %399 = vst [vmem:[#allocation1 + $0x168] sm:$0x3] %v4056_v42  ;;  %v4031_v34 = vld [vmem:[%s6361_s0 + $0x8c] sm:$0x3] }
  0x50   :  { %v1426_v46 = vld.sshfl [vmem:[#allocation1 + $0x140] sm:$0xff pattern:$0x99999810]   ;;  %780 = vst.msk [vmem:[#allocation0 + $0x280] ss:$8 sm:$0x3] %vm579_vm0, %v777_v44  }
  0x51   :  { %v4618_v47 = vsel %vm1299_vm1, %v1428_v41, %v1426_v46  ;;  %403 = vst [vmem:[#allocation1 + $0x160] sm:$0x3] %v4057_v43  ;;  %v4032_v35 = vld [vmem:[%s6361_s0 + $0x8a] sm:$0x3]  ;;  %v4033_v37 = vld [vmem:[%s6361_s0 + $0x88] sm:$0x3] }
  0x52   :  { %1431 = vrot.lane.b32.xlu1 %v4618_v47, %s4390_s22  ;;  %375 = vst [vmem:[#allocation1 + $0x198] sm:$0x3] %v4050_v48  ;;  %v1441_v54 = vld.sshfl [vmem:[#allocation1 + $0x170] sm:$0xff pattern:$0x98100000]  }
  0x53   :  { %379 = vst [vmem:[#allocation1 + $0x190] sm:$0x3] %v4051_v49  ;;  %v4026_v39 = vld [vmem:[%s6361_s0 + $0x96] sm:$0x3]  ;;  %v4027_v40 = vld [vmem:[%s6361_s0 + $0x94] sm:$0x3] }
  0x54   :  { %383 = vst [vmem:[#allocation1 + $0x188] sm:$0x3] %v4052_v50  ;;  %v4028_v43 = vld [vmem:[%s6361_s0 + $0x92] sm:$0x3]  ;;  %v4029_v44 = vld [vmem:[%s6361_s0 + $0x90] sm:$0x3] }
  0x55   :  { %387 = vst [vmem:[#allocation1 + $0x180] sm:$0x3] %v4053_v51  ;;  %v4022_v49 = vld [vmem:[%s6361_s0 + $0x9e] sm:$0x3] }
  0x56   :  { %359 = vst [vmem:[#allocation1 + $0x1b8] sm:$0x3] %v4046_v52  ;;  %v802_v55 = vld [vmem:[#allocation1 + $0x168] sm:$0x3]   ;;  %v4023_v52 = vld [vmem:[%s6361_s0 + $0x9c] sm:$0x3] }
  0x57   :  { %363 = vst [vmem:[#allocation1 + $0x1b0] sm:$0x3] %v4047_v53 }
  0x58   :  { %v797_v56 = vld [vmem:[#allocation1 + $0x160] sm:$0x3]   ;;  %805 = vst.msk [vmem:[#allocation0 + $0x2d0] ss:$8 sm:$0x3] %vm579_vm0, %v802_v55  }
  0x59   :  { %800 = vst.msk [vmem:[#allocation0 + $0x2c0] ss:$8 sm:$0x3] %vm579_vm0, %v797_v56   ;;  %v1439_v57 = vld.sshfl [vmem:[#allocation1 + $0x160] sm:$0xff pattern:$0x99999810]  }
  0x5a   :  { %v4646_v59 = vsel %vm1299_vm1, %v1441_v54, %v1439_v57  ;;  %v827_v61 = vld [vmem:[#allocation1 + $0x190] sm:$0x3]   ;;  %v832_v5 = vld [vmem:[#allocation1 + $0x198] sm:$0x3]   ;;  %367 = vst [vmem:[#allocation1 + $0x1a8] sm:$0x3] %v4048_v58 }
  0x5b   :  { %v1454_v62 = vld.sshfl [vmem:[#allocation1 + $0x190] sm:$0xff pattern:$0x98100000]   ;;  %1444 = vrot.lane.b32.xlu2 %v4646_v59, %s4390_s22  ;;  %v822_v63 = vld [vmem:[#allocation1 + $0x188] sm:$0x3]  }
  0x5c   :  { %830 = vst.msk [vmem:[#allocation0 + $0x320] ss:$8 sm:$0x3] %vm579_vm0, %v827_v61   ;;  %v817_v2 = vld [vmem:[#allocation1 + $0x180] sm:$0x3]  }
  0x5d   :  { %825 = vst.msk [vmem:[#allocation0 + $0x310] ss:$8 sm:$0x3] %vm579_vm0, %v822_v63   ;;  %v1452_v3 = vld.sshfl [vmem:[#allocation1 + $0x180] sm:$0xff pattern:$0x99999810]  }
  0x5e   :  { %820 = vst.msk [vmem:[#allocation0 + $0x300] ss:$8 sm:$0x3] %vm579_vm0, %v817_v2   ;;  %v4657_v4 = vsel %vm1299_vm1, %v1454_v62, %v1452_v3  ;;  %v847_v6 = vld [vmem:[#allocation1 + $0x1b0] sm:$0x3]  }
  0x5f   :  { %1457 = vrot.lane.b32.xlu0 %v4657_v4, %s4390_s22  ;;  %835 = vst.msk [vmem:[#allocation0 + $0x330] ss:$8 sm:$0x3] %vm579_vm0, %v832_v5   ;;  %v852_v7 = vld [vmem:[#allocation1 + $0x1b8] sm:$0x3]  }
  0x60   :  { %371 = vst [vmem:[#allocation1 + $0x1a0] sm:$0x3] %v4049_v0  ;;  %v1467_v12 = vld.sshfl [vmem:[#allocation1 + $0x1b0] sm:$0xff pattern:$0x98100000]  }
  0x61   :  { %850 = vst.msk [vmem:[#allocation0 + $0x360] ss:$8 sm:$0x3] %vm579_vm0, %v847_v6   ;;  %v842_v13 = vld [vmem:[#allocation1 + $0x1a8] sm:$0x3]  }
  0x62   :  { %855 = vst.msk [vmem:[#allocation0 + $0x370] ss:$8 sm:$0x3] %vm579_vm0, %v852_v7   ;;  %v4024_v55 = vld [vmem:[%s6361_s0 + $0x9a] sm:$0x3] }
  0x63   :  { %343 = vst [vmem:[#allocation1 + $0x1d8] sm:$0x3] %v4042_v8  ;;  %v4025_v58 = vld [vmem:[%s6361_s0 + $0x98] sm:$0x3]  ;;  %v4018_v61 = vld [vmem:[%s6361_s0 + $0xa6] sm:$0x3] }
  0x64   :  { %347 = vst [vmem:[#allocation1 + $0x1d0] sm:$0x3] %v4043_v9  ;;  %v4019_v63 = vld [vmem:[%s6361_s0 + $0xa4] sm:$0x3]  ;;  %v4020_v0 = vld [vmem:[%s6361_s0 + $0xa2] sm:$0x3] }
  0x65   :  { %351 = vst [vmem:[#allocation1 + $0x1c8] sm:$0x3] %v4044_v11  ;;  %v4021_v5 = vld [vmem:[%s6361_s0 + $0xa0] sm:$0x3]  ;;  %v4014_v6 = vld [vmem:[%s6361_s0 + $0xae] sm:$0x3] }
  0x66   :  { %845 = vst.msk [vmem:[#allocation0 + $0x350] ss:$8 sm:$0x3] %vm579_vm0, %v842_v13   ;;  %v4015_v7 = vld [vmem:[%s6361_s0 + $0xac] sm:$0x3] }
  0x67   :  { %v837_v17 = vld [vmem:[#allocation1 + $0x1a0] sm:$0x3]   ;;  %355 = vst [vmem:[#allocation1 + $0x1c0] sm:$0x3] %v4045_v14  ;;  %v4016_v8 = vld [vmem:[%s6361_s0 + $0xaa] sm:$0x3] }
  0x68   :  { %v1465_v18 = vld.sshfl [vmem:[#allocation1 + $0x1a0] sm:$0xff pattern:$0x99999810]   ;;  %840 = vst.msk [vmem:[#allocation0 + $0x340] ss:$8 sm:$0x3] %vm579_vm0, %v837_v17  }
  0x69   :  { %v4682_v19 = vsel %vm1299_vm1, %v1467_v12, %v1465_v18  ;;  %327 = vst [vmem:[#allocation1 + $0x1f8] sm:$0x3] %v4038_v15  ;;  %v4017_v9 = vld [vmem:[%s6361_s0 + $0xa8] sm:$0x3]  ;;  %v4010_v12 = vld [vmem:[%s6361_s0 + $0xb6] sm:$0x3] }
  0x6a   :  { %1470 = vrot.lane.b32.xlu1 %v4682_v19, %s4390_s22  ;;  %v872_v20 = vld [vmem:[#allocation1 + $0x1d8] sm:$0x3]   ;;  %331 = vst [vmem:[#allocation1 + $0x1f0] sm:$0x3] %v4039_v22  ;;  %v4011_v13 = vld [vmem:[%s6361_s0 + $0xb4] sm:$0x3] }
  0x6b   :  { %v867_v21 = vld [vmem:[#allocation1 + $0x1d0] sm:$0x3]   ;;  %875 = vst.msk [vmem:[#allocation0 + $0x3b0] ss:$8 sm:$0x3] %vm579_vm0, %v872_v20  }
  0x6c   :  { %870 = vst.msk [vmem:[#allocation0 + $0x3a0] ss:$8 sm:$0x3] %vm579_vm0, %v867_v21   ;;  %v1480_v27 = vld.sshfl [vmem:[#allocation1 + $0x1d0] sm:$0xff pattern:$0x98100000]  }
  0x6d   :  { %335 = vst [vmem:[#allocation1 + $0x1e8] sm:$0x3] %v4040_v24  ;;  %v4012_v17 = vld [vmem:[%s6361_s0 + $0xb2] sm:$0x3]  ;;  %v4013_v18 = vld [vmem:[%s6361_s0 + $0xb0] sm:$0x3] }
  0x6e   :  { %v1478_v30 = vld.sshfl [vmem:[#allocation1 + $0x1c0] sm:$0xff pattern:$0x99999810]   ;;  %339 = vst [vmem:[#allocation1 + $0x1e0] sm:$0x3] %v4041_v25 }
  0x6f   :  { %v4707_v31 = vsel %vm1299_vm1, %v1480_v27, %v1478_v30  ;;  %311 = vst [vmem:[#allocation1 + $0x218] sm:$0x3] %v4034_v26  ;;  %v4006_v21 = vld [vmem:[%s6361_s0 + $0xbe] sm:$0x3]  ;;  %v4007_v22 = vld [vmem:[%s6361_s0 + $0xbc] sm:$0x3] }
  0x70   :  { %1483 = vrot.lane.b32.xlu2 %v4707_v31, %s4390_s22  ;;  %315 = vst [vmem:[#allocation1 + $0x210] sm:$0x3] %v4035_v28  ;;  %v4008_v26 = vld [vmem:[%s6361_s0 + $0xba] sm:$0x3]  ;;  %v4009_v27 = vld [vmem:[%s6361_s0 + $0xb8] sm:$0x3] }
  0x71   :  { %319 = vst [vmem:[#allocation1 + $0x208] sm:$0x3] %v4036_v29  ;;  %v1493_v38 = vld.sshfl [vmem:[#allocation1 + $0x1f0] sm:$0xff pattern:$0x98100000]  }
  0x72   :  { %323 = vst [vmem:[#allocation1 + $0x200] sm:$0x3] %v4037_v32  ;;  %v4002_v30 = vld [vmem:[%s6361_s0 + $0xc6] sm:$0x3] }
  0x73   :  { %295 = vst [vmem:[#allocation1 + $0x238] sm:$0x3] %v4030_v33 }
  0x74   :  { %299 = vst [vmem:[#allocation1 + $0x230] sm:$0x3] %v4031_v34  ;;  %v4003_v34 = vld [vmem:[%s6361_s0 + $0xc4] sm:$0x3] }
  0x75   :  { %v1491_v41 = vld.sshfl [vmem:[#allocation1 + $0x1e0] sm:$0xff pattern:$0x99999810]   ;;  %303 = vst [vmem:[#allocation1 + $0x228] sm:$0x3] %v4032_v35 }
  0x76   :  { %v4733_v42 = vsel %vm1299_vm1, %v1493_v38, %v1491_v41  ;;  %307 = vst [vmem:[#allocation1 + $0x220] sm:$0x3] %v4033_v37  ;;  %v4004_v38 = vld [vmem:[%s6361_s0 + $0xc2] sm:$0x3]  ;;  %v4005_v41 = vld [vmem:[%s6361_s0 + $0xc0] sm:$0x3] }
  0x77   :  { %1496 = vrot.lane.b32.xlu0 %v4733_v42, %s4390_s22  ;;  %v1506_v46 = vld.sshfl [vmem:[#allocation1 + $0x210] sm:$0xff pattern:$0x98100000]   ;;  %279 = vst [vmem:[#allocation1 + $0x258] sm:$0x3] %v4026_v39 }
  0x78   :  { %283 = vst [vmem:[#allocation1 + $0x250] sm:$0x3] %v4027_v40 }
  0x79   :  { %v1504_v48 = vld.sshfl [vmem:[#allocation1 + $0x200] sm:$0xff pattern:$0x99999810]   ;;  %287 = vst [vmem:[#allocation1 + $0x248] sm:$0x3] %v4028_v43 }
  0x7a   :  { %v4747_v50 = vsel %vm1299_vm1, %v1506_v46, %v1504_v48  ;;  %v932_v51 = vld [vmem:[#allocation1 + $0x238] sm:$0x3]   ;;  %291 = vst [vmem:[#allocation1 + $0x240] sm:$0x3] %v4029_v44  ;;  %v3998_v43 = vld [vmem:[%s6361_s0 + $0xce] sm:$0x3] }
  0x7b   :  { %1509 = vrot.lane.b32.xlu1 %v4747_v50, %s4390_s22  ;;  %v927_v53 = vld [vmem:[#allocation1 + $0x230] sm:$0x3]   ;;  %935 = vst.msk [vmem:[#allocation0 + $0x470] ss:$8 sm:$0x3] %vm579_vm0, %v932_v51  }
  0x7c   :  { %v1519_v54 = vld.sshfl [vmem:[#allocation1 + $0x230] sm:$0xff pattern:$0x98100000]   ;;  %930 = vst.msk [vmem:[#allocation0 + $0x460] ss:$8 sm:$0x3] %vm579_vm0, %v927_v53  }
  0x7d   :  { %v1517_v56 = vld.sshfl [vmem:[#allocation1 + $0x220] sm:$0xff pattern:$0x99999810]   ;;  %263 = vst [vmem:[#allocation1 + $0x278] sm:$0x3] %v4022_v49 }
  0x7e   :  { %v4760_v57 = vsel %vm1299_vm1, %v1519_v54, %v1517_v56  ;;  %267 = vst [vmem:[#allocation1 + $0x270] sm:$0x3] %v4023_v52  ;;  %v3999_v46 = vld [vmem:[%s6361_s0 + $0xcc] sm:$0x3]  ;;  %v4000_v48 = vld [vmem:[%s6361_s0 + $0xca] sm:$0x3] }
  0x7f   :  { %1522 = vrot.lane.b32.xlu2 %v4760_v57, %s4390_s22  ;;  %v1532_v62 = vld.sshfl [vmem:[#allocation1 + $0x250] sm:$0xff pattern:$0x98100000]   ;;  %271 = vst [vmem:[#allocation1 + $0x268] sm:$0x3] %v4024_v55 }
  0x80   :  { %275 = vst [vmem:[#allocation1 + $0x260] sm:$0x3] %v4025_v58  ;;  %v4001_v52 = vld [vmem:[%s6361_s0 + $0xc8] sm:$0x3]  ;;  %v3994_v53 = vld [vmem:[%s6361_s0 + $0xd6] sm:$0x3] }
  0x81   :  { %v1530_v2 = vld.sshfl [vmem:[#allocation1 + $0x240] sm:$0xff pattern:$0x99999810]   ;;  %247 = vst [vmem:[#allocation1 + $0x298] sm:$0x3] %v4018_v61 }
  0x82   :  { %v4777_v3 = vsel %vm1299_vm1, %v1532_v62, %v1530_v2  ;;  %251 = vst [vmem:[#allocation1 + $0x290] sm:$0x3] %v4019_v63  ;;  %v3995_v54 = vld [vmem:[%s6361_s0 + $0xd4] sm:$0x3]  ;;  %v3996_v55 = vld [vmem:[%s6361_s0 + $0xd2] sm:$0x3] }
  0x83   :  { %1535 = vrot.lane.b32.xlu0 %v4777_v3, %s4390_s22  ;;  %255 = vst [vmem:[#allocation1 + $0x288] sm:$0x3] %v4020_v0  ;;  %v3997_v56 = vld [vmem:[%s6361_s0 + $0xd0] sm:$0x3]  ;;  %v3990_v61 = vld [vmem:[%s6361_s0 + $0xde] sm:$0x3] }
  0x84   :  { %259 = vst [vmem:[#allocation1 + $0x280] sm:$0x3] %v4021_v5  ;;  %v3991_v62 = vld [vmem:[%s6361_s0 + $0xdc] sm:$0x3]  ;;  %v3992_v2 = vld [vmem:[%s6361_s0 + $0xda] sm:$0x3] }
  0x85   :  { %v1545_v11 = vld.sshfl [vmem:[#allocation1 + $0x270] sm:$0xff pattern:$0x98100000]   ;;  %231 = vst [vmem:[#allocation1 + $0x2b8] sm:$0x3] %v4014_v6 }
  0x86   :  { %235 = vst [vmem:[#allocation1 + $0x2b0] sm:$0x3] %v4015_v7  ;;  %v3993_v5 = vld [vmem:[%s6361_s0 + $0xd8] sm:$0x3]  ;;  %v3986_v7 = vld [vmem:[%s6361_s0 + $0xe6] sm:$0x3] }
  0x87   :  { %v1543_v14 = vld.sshfl [vmem:[#allocation1 + $0x260] sm:$0xff pattern:$0x99999810]   ;;  %239 = vst [vmem:[#allocation1 + $0x2a8] sm:$0x3] %v4016_v8 }
  0x88   :  { %v4803_v15 = vsel %vm1299_vm1, %v1545_v11, %v1543_v14  ;;  %243 = vst [vmem:[#allocation1 + $0x2a0] sm:$0x3] %v4017_v9  ;;  %v3987_v8 = vld [vmem:[%s6361_s0 + $0xe4] sm:$0x3] }
  0x89   :  { %1548 = vrot.lane.b32.xlu1 %v4803_v15, %s4390_s22  ;;  %v1558_v20 = vld.sshfl [vmem:[#allocation1 + $0x290] sm:$0xff pattern:$0x98100000]   ;;  %215 = vst [vmem:[#allocation1 + $0x2d8] sm:$0x3] %v4010_v12 }
  0x8a   :  { %219 = vst [vmem:[#allocation1 + $0x2d0] sm:$0x3] %v4011_v13  ;;  %v3988_v12 = vld [vmem:[%s6361_s0 + $0xe2] sm:$0x3]  ;;  %v3989_v13 = vld [vmem:[%s6361_s0 + $0xe0] sm:$0x3] }
  0x8b   :  { %v1556_v24 = vld.sshfl [vmem:[#allocation1 + $0x280] sm:$0xff pattern:$0x99999810]   ;;  %223 = vst [vmem:[#allocation1 + $0x2c8] sm:$0x3] %v4012_v17 }
  0x8c   :  { %v4820_v25 = vsel %vm1299_vm1, %v1558_v20, %v1556_v24  ;;  %227 = vst [vmem:[#allocation1 + $0x2c0] sm:$0x3] %v4013_v18  ;;  %v3982_v17 = vld [vmem:[%s6361_s0 + $0xee] sm:$0x3]  ;;  %v3983_v18 = vld [vmem:[%s6361_s0 + $0xec] sm:$0x3] }
  0x8d   :  { %1561 = vrot.lane.b32.xlu2 %v4820_v25, %s4390_s22  ;;  %v1571_v28 = vld.sshfl [vmem:[#allocation1 + $0x2b0] sm:$0xff pattern:$0x98100000]   ;;  %199 = vst [vmem:[#allocation1 + $0x2f8] sm:$0x3] %v4006_v21 }
  0x8e   :  { %203 = vst [vmem:[#allocation1 + $0x2f0] sm:$0x3] %v4007_v22  ;;  %v3984_v22 = vld [vmem:[%s6361_s0 + $0xea] sm:$0x3]  ;;  %v3985_v24 = vld [vmem:[%s6361_s0 + $0xe8] sm:$0x3] }
  0x8f   :  { %v1569_v29 = vld.sshfl [vmem:[#allocation1 + $0x2a0] sm:$0xff pattern:$0x99999810]   ;;  %207 = vst [vmem:[#allocation1 + $0x2e8] sm:$0x3] %v4008_v26 }
  0x90   :  { %v4834_v32 = vsel %vm1299_vm1, %v1571_v28, %v1569_v29  ;;  %v1032_v33 = vld [vmem:[#allocation1 + $0x2d8] sm:$0x3]   ;;  %211 = vst [vmem:[#allocation1 + $0x2e0] sm:$0x3] %v4009_v27  ;;  %v3978_v27 = vld [vmem:[%s6361_s0 + $0xf6] sm:$0x3] }
  0x91   :  { %1574 = vrot.lane.b32.xlu0 %v4834_v32, %s4390_s22  ;;  %v1027_v35 = vld [vmem:[#allocation1 + $0x2d0] sm:$0x3]   ;;  %1035 = vst.msk [vmem:[#allocation0 + $0x5b0] ss:$8 sm:$0x3] %vm579_vm0, %v1032_v33  }
  0x92   :  { %v1584_v37 = vld.sshfl [vmem:[#allocation1 + $0x2d0] sm:$0xff pattern:$0x98100000]   ;;  %1030 = vst.msk [vmem:[#allocation0 + $0x5a0] ss:$8 sm:$0x3] %vm579_vm0, %v1027_v35  }
  0x93   :  { %v1582_v39 = vld.sshfl [vmem:[#allocation1 + $0x2c0] sm:$0xff pattern:$0x99999810]   ;;  %183 = vst [vmem:[#allocation1 + $0x318] sm:$0x3] %v4002_v30 }
  0x94   :  { %v4847_v40 = vsel %vm1299_vm1, %v1584_v37, %v1582_v39  ;;  %187 = vst [vmem:[#allocation1 + $0x310] sm:$0x3] %v4003_v34  ;;  %v3979_v28 = vld [vmem:[%s6361_s0 + $0xf4] sm:$0x3]  ;;  %v3980_v33 = vld [vmem:[%s6361_s0 + $0xf2] sm:$0x3] }
  0x95   :  { %1587 = vrot.lane.b32.xlu1 %v4847_v40, %s4390_s22  ;;  %v1597_v44 = vld.sshfl [vmem:[#allocation1 + $0x2f0] sm:$0xff pattern:$0x98100000]   ;;  %191 = vst [vmem:[#allocation1 + $0x308] sm:$0x3] %v4004_v38 }
  0x96   :  { %195 = vst [vmem:[#allocation1 + $0x300] sm:$0x3] %v4005_v41  ;;  %v3981_v34 = vld [vmem:[%s6361_s0 + $0xf0] sm:$0x3]  ;;  %v3974_v37 = vld [vmem:[%s6361_s0 + $0xfe] sm:$0x3] }
  0x97   :  { %v1595_v49 = vld.sshfl [vmem:[#allocation1 + $0x2e0] sm:$0xff pattern:$0x99999810]   ;;  %167 = vst [vmem:[#allocation1 + $0x338] sm:$0x3] %v3998_v43 }
  0x98   :  { %v4864_v51 = vsel %vm1299_vm1, %v1597_v44, %v1595_v49  ;;  %171 = vst [vmem:[#allocation1 + $0x330] sm:$0x3] %v3999_v46  ;;  %v3975_v38 = vld [vmem:[%s6361_s0 + $0xfc] sm:$0x3]  ;;  %v3976_v43 = vld [vmem:[%s6361_s0 + $0xfa] sm:$0x3] }
  0x99   :  { %1600 = vrot.lane.b32.xlu2 %v4864_v51, %s4390_s22  ;;  %175 = vst [vmem:[#allocation1 + $0x328] sm:$0x3] %v4000_v48  ;;  %v3977_v44 = vld [vmem:[%s6361_s0 + $0xf8] sm:$0x3]  ;;  %v3970_v48 = vld [vmem:[%s6361_s0 + $0x106] sm:$0x3] }
  0x9a   :  { %179 = vst [vmem:[#allocation1 + $0x320] sm:$0x3] %v4001_v52  ;;  %v3971_v49 = vld [vmem:[%s6361_s0 + $0x104] sm:$0x3] }
  0x9b   :  { %v1610_v58 = vld.sshfl [vmem:[#allocation1 + $0x310] sm:$0xff pattern:$0x98100000]   ;;  %151 = vst [vmem:[#allocation1 + $0x358] sm:$0x3] %v3994_v53 }
  0x9c   :  { %155 = vst [vmem:[#allocation1 + $0x350] sm:$0x3] %v3995_v54  ;;  %v3972_v54 = vld [vmem:[%s6361_s0 + $0x102] sm:$0x3] }
  0x9d   :  { %v1608_v63 = vld.sshfl [vmem:[#allocation1 + $0x300] sm:$0xff pattern:$0x99999810]   ;;  %159 = vst [vmem:[#allocation1 + $0x348] sm:$0x3] %v3996_v55 }
  0x9e   :  { %v4890_v0 = vsel %vm1299_vm1, %v1610_v58, %v1608_v63  ;;  %163 = vst [vmem:[#allocation1 + $0x340] sm:$0x3] %v3997_v56  ;;  %v3973_v55 = vld [vmem:[%s6361_s0 + $0x100] sm:$0x3]  ;;  %v3966_v58 = vld [vmem:[%s6361_s0 + $0x10e] sm:$0x3] }
  0x9f   :  { %1613 = vrot.lane.b32.xlu0 %v4890_v0, %s4390_s22  ;;  %v1623_v6 = vld.sshfl [vmem:[#allocation1 + $0x330] sm:$0xff pattern:$0x98100000]   ;;  %135 = vst [vmem:[#allocation1 + $0x378] sm:$0x3] %v3990_v61 }
  0xa0   :  { %139 = vst [vmem:[#allocation1 + $0x370] sm:$0x3] %v3991_v62  ;;  %v3967_v61 = vld [vmem:[%s6361_s0 + $0x10c] sm:$0x3] }
  0xa1   :  { %v1621_v9 = vld.sshfl [vmem:[#allocation1 + $0x320] sm:$0xff pattern:$0x99999810]   ;;  %143 = vst [vmem:[#allocation1 + $0x368] sm:$0x3] %v3992_v2 }
  0xa2   :  { %v4907_v11 = vsel %vm1299_vm1, %v1623_v6, %v1621_v9  ;;  %147 = vst [vmem:[#allocation1 + $0x360] sm:$0x3] %v3993_v5 }
  0xa3   :  { %1626 = vrot.lane.b32.xlu1 %v4907_v11, %s4390_s22  ;;  %v1636_v14 = vld.sshfl [vmem:[#allocation1 + $0x350] sm:$0xff pattern:$0x98100000]   ;;  %119 = vst [vmem:[#allocation1 + $0x398] sm:$0x3] %v3986_v7 }
  0xa4   :  { %123 = vst [vmem:[#allocation1 + $0x390] sm:$0x3] %v3987_v8  ;;  %v3968_v8 = vld [vmem:[%s6361_s0 + $0x10a] sm:$0x3] }
  0xa5   :  { %v1634_v20 = vld.sshfl [vmem:[#allocation1 + $0x340] sm:$0xff pattern:$0x99999810]   ;;  %127 = vst [vmem:[#allocation1 + $0x388] sm:$0x3] %v3988_v12 }
  0xa6   :  { %v4924_v21 = vsel %vm1299_vm1, %v1636_v14, %v1634_v20  ;;  %131 = vst [vmem:[#allocation1 + $0x380] sm:$0x3] %v3989_v13 }
  0xa7   :  { %1639 = vrot.lane.b32.xlu2 %v4924_v21, %s4390_s22  ;;  %v1649_v26 = vld.sshfl [vmem:[#allocation1 + $0x370] sm:$0xff pattern:$0x98100000]   ;;  %103 = vst [vmem:[#allocation1 + $0x3b8] sm:$0x3] %v3982_v17 }
  0xa8   :  { %107 = vst [vmem:[#allocation1 + $0x3b0] sm:$0x3] %v3983_v18  ;;  %v3969_v17 = vld [vmem:[%s6361_s0 + $0x108] sm:$0x3] }
  0xa9   :  { %v1647_v29 = vld.sshfl [vmem:[#allocation1 + $0x360] sm:$0xff pattern:$0x99999810]   ;;  %111 = vst [vmem:[#allocation1 + $0x3a8] sm:$0x3] %v3984_v22  ;;  %v5012_v22 = vpop.permute.xlu2 %1353  }
  0xaa   :  { %v4941_v30 = vsel %vm1299_vm1, %v1649_v26, %v1647_v29  ;;  %115 = vst [vmem:[#allocation1 + $0x3a0] sm:$0x3] %v3985_v24  ;;  %v3962_v29 = vld [vmem:[%s6361_s0 + $0x116] sm:$0x3] }
  0xab   :  { %1652 = vrot.lane.b32.xlu0 %v4941_v30, %s4390_s22  ;;  %v1662_v35 = vld.sshfl [vmem:[#allocation1 + $0x390] sm:$0xff pattern:$0x98100000]   ;;  %87 = vst [vmem:[#allocation1 + $0x3d8] sm:$0x3] %v3978_v27 }
  0xac   :  { %91 = vst [vmem:[#allocation1 + $0x3d0] sm:$0x3] %v3979_v28 }
  0xad   :  { %v1660_v39 = vld.sshfl [vmem:[#allocation1 + $0x380] sm:$0xff pattern:$0x99999810]   ;;  %95 = vst [vmem:[#allocation1 + $0x3c8] sm:$0x3] %v3980_v33 }
  0xae   :  { %v4958_v41 = vsel %vm1299_vm1, %v1662_v35, %v1660_v39  ;;  %99 = vst [vmem:[#allocation1 + $0x3c0] sm:$0x3] %v3981_v34  ;;  %v3963_v33 = vld [vmem:[%s6361_s0 + $0x114] sm:$0x3]  ;;  %v3964_v34 = vld [vmem:[%s6361_s0 + $0x112] sm:$0x3] }
  0xaf   :  { %1665 = vrot.lane.b32.xlu1 %v4958_v41, %s4390_s22  ;;  %v1675_v46 = vld.sshfl [vmem:[#allocation1 + $0x3b0] sm:$0xff pattern:$0x98100000]   ;;  %71 = vst [vmem:[#allocation1 + $0x3f8] sm:$0x3] %v3974_v37 }
  0xb0   :  { %75 = vst [vmem:[#allocation1 + $0x3f0] sm:$0x3] %v3975_v38  ;;  %v3965_v38 = vld [vmem:[%s6361_s0 + $0x110] sm:$0x3] }
  0xb1   :  { %v1673_v52 = vld.sshfl [vmem:[#allocation1 + $0x3a0] sm:$0xff pattern:$0x99999810]   ;;  %79 = vst [vmem:[#allocation1 + $0x3e8] sm:$0x3] %v3976_v43  ;;  %v5034_v39 = vpop.permute.xlu2 %1366  }
  0xb2   :  { %v4975_v53 = vsel %vm1299_vm1, %v1675_v46, %v1673_v52  ;;  %83 = vst [vmem:[#allocation1 + $0x3e0] sm:$0x3] %v3977_v44  ;;  %v3958_v43 = vld [vmem:[%s6361_s0 + $0x11e] sm:$0x3] }
  0xb3   :  { %1678 = vrot.lane.b32.xlu2 %v4975_v53, %s4390_s22  ;;  %v1688_v56 = vld.sshfl [vmem:[#allocation1 + $0x3d0] sm:$0xff pattern:$0x98100000]   ;;  %55 = vst [vmem:[#allocation1 + $0x418] sm:$0x3] %v3970_v48 }
  0xb4   :  { %59 = vst [vmem:[#allocation1 + $0x410] sm:$0x3] %v3971_v49  ;;  %v1763_v49 = vld.sshfl [vmem:[#allocation1] sm:$0xff pattern:$0x99999810]  }
  0xb5   :  { %v1686_v62 = vld.sshfl [vmem:[#allocation1 + $0x3c0] sm:$0xff pattern:$0x99999810]   ;;  %63 = vst [vmem:[#allocation1 + $0x408] sm:$0x3] %v3972_v54 }
  0xb6   :  { %v4992_v63 = vsel %vm1299_vm1, %v1688_v56, %v1686_v62  ;;  %67 = vst [vmem:[#allocation1 + $0x400] sm:$0x3] %v3973_v55  ;;  %v1765_v52 = vld.sshfl [vmem:[#allocation1 + $0x10] sm:$0xff pattern:$0x98100000]  }
  0xb7   :  { %1691 = vrot.lane.b32.xlu0 %v4992_v63, %s4390_s22  ;;  %v1701_v2 = vld.sshfl [vmem:[#allocation1 + $0x3f0] sm:$0xff pattern:$0x98100000]   ;;  %39 = vst [vmem:[#allocation1 + $0x438] sm:$0x3] %v3966_v58 }
  0xb8   :  { %v1202_v5 = vld [vmem:[#allocation1 + $0x3e8] sm:$0x3]   ;;  %43 = vst [vmem:[#allocation1 + $0x430] sm:$0x3] %v3967_v61  ;;  %v3959_v56 = vld [vmem:[%s6361_s0 + $0x11c] sm:$0x3] }
  0xb9   :  { %v1197_v6 = vld [vmem:[#allocation1 + $0x3e0] sm:$0x3]   ;;  %1205 = vst.msk [vmem:[#allocation0 + $0x7d0] ss:$8 sm:$0x3] %vm579_vm0, %v1202_v5   ;;  %v5051_v61 = vpop.permute.xlu2 %1405  }
  0xba   :  { %1200 = vst.msk [vmem:[#allocation0 + $0x7c0] ss:$8 sm:$0x3] %vm579_vm0, %v1197_v6   ;;  %v1699_v7 = vld.sshfl [vmem:[#allocation1 + $0x3e0] sm:$0xff pattern:$0x99999810]  }
  0xbb   :  { %v5002_v9 = vsel %vm1299_vm1, %v1701_v2, %v1699_v7  ;;  %v1227_v12 = vld [vmem:[#allocation1 + $0x410] sm:$0x3]   ;;  %v1232_v26 = vld [vmem:[#allocation1 + $0x418] sm:$0x3]   ;;  %47 = vst [vmem:[#allocation1 + $0x428] sm:$0x3] %v3968_v8  ;;  %v1767_v2 = vsel %vm1299_vm1, %v1765_v52, %v1763_v49 }
  0xbc   :  { %v1714_v13 = vld.sshfl [vmem:[#allocation1 + $0x410] sm:$0xff pattern:$0x98100000]   ;;  %1704 = vrot.lane.b32.xlu1 %v5002_v9, %s4390_s22  ;;  %v1222_v14 = vld [vmem:[#allocation1 + $0x408] sm:$0x3]  }
  0xbd   :  { %1230 = vst.msk [vmem:[#allocation0 + $0x820] ss:$8 sm:$0x3] %vm579_vm0, %v1227_v12   ;;  %v1217_v18 = vld [vmem:[#allocation1 + $0x400] sm:$0x3]  }
  0xbe   :  { %1225 = vst.msk [vmem:[#allocation0 + $0x810] ss:$8 sm:$0x3] %vm579_vm0, %v1222_v14   ;;  %v1712_v20 = vld.sshfl [vmem:[#allocation1 + $0x400] sm:$0xff pattern:$0x99999810]   ;;  %v5071_v14 = vpop.permute.xlu0 %1301  }
  0xbf   :  { %1220 = vst.msk [vmem:[#allocation0 + $0x800] ss:$8 sm:$0x3] %vm579_vm0, %v1217_v18   ;;  %v5015_v24 = vsel %vm1299_vm1, %v1714_v13, %v1712_v20  ;;  %v1247_v27 = vld [vmem:[#allocation1 + $0x430] sm:$0x3]  }
  0xc0   :  { %1717 = vrot.lane.b32.xlu2 %v5015_v24, %s4390_s22  ;;  %1235 = vst.msk [vmem:[#allocation0 + $0x830] ss:$8 sm:$0x3] %vm579_vm0, %v1232_v26   ;;  %v1252_v28 = vld [vmem:[#allocation1 + $0x438] sm:$0x3]  }
  0xc1   :  { %51 = vst [vmem:[#allocation1 + $0x420] sm:$0x3] %v3969_v17  ;;  %v1727_v35 = vld.sshfl [vmem:[#allocation1 + $0x430] sm:$0xff pattern:$0x98100000]   ;;  %v5073_v17 = vpop.permute.xlu1 %1327   ;;  %v5075_v26 = vpop.permute.xlu2 %1444  }
  0xc2   :  { %1250 = vst.msk [vmem:[#allocation0 + $0x860] ss:$8 sm:$0x3] %vm579_vm0, %v1247_v27   ;;  %v1242_v37 = vld [vmem:[#allocation1 + $0x428] sm:$0x3]  }
  0xc3   :  { %1255 = vst.msk [vmem:[#allocation0 + $0x870] ss:$8 sm:$0x3] %vm579_vm0, %v1252_v28   ;;  %v3960_v5 = vld [vmem:[%s6361_s0 + $0x11a] sm:$0x3] }
  0xc4   :  { %23 = vst [vmem:[#allocation1 + $0x458] sm:$0x3] %v3962_v29  ;;  %v3961_v6 = vld [vmem:[%s6361_s0 + $0x118] sm:$0x3]  ;;  %s4391_s0 = smov 120  }
  0xc5   :  { %27 = vst [vmem:[#allocation1 + $0x450] sm:$0x3] %v3963_v33  ;;  %v607_v20 = vld [vmem:[#allocation1 + $0x30] sm:$0x3]   ;;  %v612_v27 = vld [vmem:[#allocation1 + $0x38] sm:$0x3]  }
  0xc6   :  { %31 = vst [vmem:[#allocation1 + $0x448] sm:$0x3] %v3964_v34  ;;  %v1815_v29 = vld.sshfl [vmem:[#allocation1 + $0x80] sm:$0xff pattern:$0x99999810]  }
  0xc7   :  { %1245 = vst.msk [vmem:[#allocation0 + $0x850] ss:$8 sm:$0x3] %vm579_vm0, %v1242_v37   ;;  %v1789_v37 = vld.sshfl [vmem:[#allocation1 + $0x40] sm:$0xff pattern:$0x99999810]  }
  0xc8   :  { %v1237_v44 = vld [vmem:[#allocation1 + $0x420] sm:$0x3]   ;;  %35 = vst [vmem:[#allocation1 + $0x440] sm:$0x3] %v3965_v38 }
  0xc9   :  { %v1725_v46 = vld.sshfl [vmem:[#allocation1 + $0x420] sm:$0xff pattern:$0x99999810]   ;;  %1240 = vst.msk [vmem:[#allocation0 + $0x840] ss:$8 sm:$0x3] %vm579_vm0, %v1237_v44   ;;  %v1315_v44 = vpop.permute.xlu0 %1314  }
  0xca   :  { %v5042_v48 = vsel %vm1299_vm1, %v1727_v35, %v1725_v46  ;;  %7 = vst [vmem:[#allocation1 + $0x478] sm:$0x3] %v3958_v43  ;;  %v1817_v35 = vld.sshfl [vmem:[#allocation1 + $0x90] sm:$0xff pattern:$0x98100000]   ;;  %v1341_v46 = vpop.permute.xlu1 %1340   ;;  %v1484_v49 = vpop.permute.xlu2 %1483  }
  0xcb   :  { %1730 = vrot.lane.b32.xlu0 %v5042_v48, %s4390_s22  ;;  %v1272_v55 = vld [vmem:[#allocation1 + $0x458] sm:$0x3]   ;;  %11 = vst [vmem:[#allocation1 + $0x470] sm:$0x3] %v3959_v56  ;;  %v1819_v52 = vsel %vm1299_vm1, %v1817_v35, %v1815_v29  ;;  %v957_v29 = vld [vmem:[#allocation1 + $0x260] sm:$0x3]  }
  0xcc   :  { %v1267_v54 = vld [vmem:[#allocation1 + $0x450] sm:$0x3]   ;;  %1275 = vst.msk [vmem:[#allocation0 + $0x8b0] ss:$8 sm:$0x3] %vm579_vm0, %v1272_v55  }
  0xcd   :  { %v1262_v58 = vld [vmem:[#allocation1 + $0x448] sm:$0x3]   ;;  %1270 = vst.msk [vmem:[#allocation0 + $0x8a0] ss:$8 sm:$0x3] %vm579_vm0, %v1267_v54  }
  0xce   :  { %1265 = vst.msk [vmem:[#allocation0 + $0x890] ss:$8 sm:$0x3] %vm579_vm0, %v1262_v58   ;;  %v1740_v62 = vld.sshfl [vmem:[#allocation1 + $0x450] sm:$0xff pattern:$0x98100000]  }
  0xcf   :  { %v1257_v7 = vld [vmem:[#allocation1 + $0x440] sm:$0x3]   ;;  %15 = vst [vmem:[#allocation1 + $0x468] sm:$0x3] %v3960_v5  ;;  %v652_v43 = vld [vmem:[#allocation1 + $0x78] sm:$0x3]  }
  0xd0   :  { %v1738_v8 = vld.sshfl [vmem:[#allocation1 + $0x440] sm:$0xff pattern:$0x99999810]   ;;  %1260 = vst.msk [vmem:[#allocation0 + $0x880] ss:$8 sm:$0x3] %vm579_vm0, %v1257_v7  }
  0xd1   :  { %v5063_v12 = vsel %vm1299_vm1, %v1740_v62, %v1738_v8  ;;  %v1292_v13 = vld [vmem:[#allocation1 + $0x478] sm:$0x3]   ;;  %19 = vst [vmem:[#allocation1 + $0x460] sm:$0x3] %v3961_v6  ;;  %v682_v54 = vld [vmem:[#allocation1 + $0xa8] sm:$0x3]  }
  0xd2   :  { %1743 = vrot.lane.b32.xlu1 %v5063_v12, %s4390_s22  ;;  %1295 = vst.msk [vmem:[#allocation0 + $0x8f0] ss:$8 sm:$0x3] %vm579_vm0, %v1292_v13   ;;  %v1287_v18 = vld [vmem:[#allocation1 + $0x470] sm:$0x3]   ;;  %v1393_v5 = vpop.permute.xlu1 %1392  }
  0xd3   :  { %1768 = vrot.lane.b32.xlu0 %v1767_v2, %s4391_s0  ;;  %1357 = vst.msk [vmem:[#allocation0 + $0x101] ss:$8 sm:$0xf] %vm579_vm0, %v5012_v22   ;;  %v1753_v28 = vld.sshfl [vmem:[#allocation1 + $0x470] sm:$0xff pattern:$0x98100000]   ;;  %v1380_v2 = vpop.permute.xlu0 %1379  }
  0xd4   :  { %1290 = vst.msk [vmem:[#allocation0 + $0x8e0] ss:$8 sm:$0x3] %vm579_vm0, %v1287_v18   ;;  %v1791_v38 = vld.sshfl [vmem:[#allocation1 + $0x50] sm:$0xff pattern:$0x98100000]  }
  0xd5   :  { %1359 = vst.msk [vmem:[#allocation0 + $0x101] ss:$8 sm:$0xf0] %vm579_vm0, %v5012_v22   ;;  %v687_v55 = vld [vmem:[#allocation1 + $0xb0] sm:$0x3]  }
  0xd6   :  { %v1282_v22 = vld [vmem:[#allocation1 + $0x468] sm:$0x3]   ;;  %610 = vst.msk [vmem:[#allocation0 + $0x60] ss:$8 sm:$0x3] %vm579_vm0, %v607_v20  }
  0xd7   :  { %1285 = vst.msk [vmem:[#allocation0 + $0x8d0] ss:$8 sm:$0x3] %vm579_vm0, %v1282_v22   ;;  %v692_v56 = vld [vmem:[#allocation1 + $0xb8] sm:$0x3]  }
  0xd8   :  { %v1751_v33 = vld.sshfl [vmem:[#allocation1 + $0x460] sm:$0xff pattern:$0x99999810]   ;;  %615 = vst.msk [vmem:[#allocation0 + $0x70] ss:$8 sm:$0x3] %vm579_vm0, %v612_v27  }
  0xd9   :  { %v5088_v34 = vsel %vm1299_vm1, %v1753_v28, %v1751_v33  ;;  %1370 = vst.msk [vmem:[#allocation0 + $0x141] ss:$8 sm:$0xf] %vm579_vm0, %v5034_v39   ;;  %v697_v58 = vld [vmem:[#allocation1 + $0xc0] sm:$0x3]   ;;  %v1523_v6 = vpop.permute.xlu2 %1522  }
  0xda   :  { %1781 = vrot.lane.b32.xlu1 %v4483_v45, %s4391_s0  ;;  %v647_v45 = vld [vmem:[#allocation1 + $0x70] sm:$0x3]   ;;  %1756 = vrot.lane.b32.xlu2 %v5088_v34, %s4390_s22  ;;  %1372 = vst.msk [vmem:[#allocation0 + $0x141] ss:$8 sm:$0xf0] %vm579_vm0, %v5034_v39  }
  0xdb   :  { %1807 = vrot.lane.b32.xlu0 %v4520_v60, %s4391_s0  ;;  %v1277_v60 = vld [vmem:[#allocation1 + $0x460] sm:$0x3]   ;;  %650 = vst.msk [vmem:[#allocation0 + $0xe0] ss:$8 sm:$0x3] %vm579_vm0, %v647_v45  }
  0xdc   :  { %1280 = vst.msk [vmem:[#allocation0 + $0x8c0] ss:$8 sm:$0x3] %vm579_vm0, %v1277_v60   ;;  %v677_v39 = vld [vmem:[#allocation1 + $0xa0] sm:$0x3]  }
  0xdd   :  { %655 = vst.msk [vmem:[#allocation0 + $0xf0] ss:$8 sm:$0x3] %vm579_vm0, %v652_v43   ;;  %v702_v62 = vld [vmem:[#allocation1 + $0xc8] sm:$0x3]  }
  0xde   :  { %680 = vst.msk [vmem:[#allocation0 + $0x140] ss:$8 sm:$0x3] %vm579_vm0, %v677_v39   ;;  %v712_v7 = vld [vmem:[#allocation1 + $0xd8] sm:$0x3]  }
  0xdf   :  { %685 = vst.msk [vmem:[#allocation0 + $0x150] ss:$8 sm:$0x3] %vm579_vm0, %v682_v54   ;;  %v727_v8 = vld [vmem:[#allocation1 + $0xf0] sm:$0x3]  }
  0xe0   :  { %690 = vst.msk [vmem:[#allocation0 + $0x160] ss:$8 sm:$0x3] %vm579_vm0, %v687_v55   ;;  %v732_v13 = vld [vmem:[#allocation1 + $0xf8] sm:$0x3]  }
  0xe1   :  { %695 = vst.msk [vmem:[#allocation0 + $0x170] ss:$8 sm:$0x3] %vm579_vm0, %v692_v56   ;;  %v887_v18 = vld [vmem:[#allocation1 + $0x1f0] sm:$0x3]  }
  0xe2   :  { %1820 = vrot.lane.b32.xlu1 %v1819_v52, %s4391_s0  ;;  %1409 = vst.msk [vmem:[#allocation0 + $0x201] ss:$8 sm:$0xf] %vm579_vm0, %v5051_v61   ;;  %v897_v20 = vld [vmem:[#allocation1 + $0x200] sm:$0x3]  }
  0xe3   :  { %1846 = vrot.lane.b32.xlu0 %v4554_v10, %s4391_s0  ;;  %v1793_v10 = vsel %vm1299_vm1, %v1791_v38, %v1789_v37  ;;  %1411 = vst.msk [vmem:[#allocation0 + $0x201] ss:$8 sm:$0xf0] %vm579_vm0, %v5051_v61   ;;  %v707_v61 = vld [vmem:[#allocation1 + $0xd0] sm:$0x3]  }
  0xe4   :  { %1794 = vrot.lane.b32.xlu2 %v1793_v10, %s4391_s0  ;;  %700 = vst.msk [vmem:[#allocation0 + $0x180] ss:$8 sm:$0x3] %vm579_vm0, %v697_v58   ;;  %v912_v27 = vld [vmem:[#allocation1 + $0x218] sm:$0x3]  }
  0xe5   :  { %705 = vst.msk [vmem:[#allocation0 + $0x190] ss:$8 sm:$0x3] %vm579_vm0, %v702_v62   ;;  %v917_v28 = vld [vmem:[#allocation1 + $0x220] sm:$0x3]  }
  0xe6   :  { %710 = vst.msk [vmem:[#allocation0 + $0x1a0] ss:$8 sm:$0x3] %vm579_vm0, %v707_v61   ;;  %v922_v22 = vld [vmem:[#allocation1 + $0x228] sm:$0x3]  }
  0xe7   :  { %715 = vst.msk [vmem:[#allocation0 + $0x1b0] ss:$8 sm:$0x3] %vm579_vm0, %v712_v7   ;;  %v942_v60 = vld [vmem:[#allocation1 + $0x248] sm:$0x3]  }
  0xe8   :  { %730 = vst.msk [vmem:[#allocation0 + $0x1e0] ss:$8 sm:$0x3] %vm579_vm0, %v727_v8   ;;  %v962_v33 = vld [vmem:[#allocation1 + $0x268] sm:$0x3]  }
  0xe9   :  { %735 = vst.msk [vmem:[#allocation0 + $0x1f0] ss:$8 sm:$0x3] %vm579_vm0, %v732_v13   ;;  %v972_v35 = vld [vmem:[#allocation1 + $0x278] sm:$0x3]  }
  0xea   :  { %1859 = vrot.lane.b32.xlu1 %v4564_v16, %s4391_s0  ;;  %1305 = vst.msk [vmem:[#allocation0 + $0x1] ss:$8 sm:$0xf] %vm579_vm0, %v5071_v14   ;;  %v5131_v16 = vpop.permute.xlu1 %1431   ;;  %v977_v37 = vld [vmem:[#allocation1 + $0x280] sm:$0x3]  }
  0xeb   :  { %1885 = vrot.lane.b32.xlu0 %v4600_v36, %s4391_s0  ;;  %1307 = vst.msk [vmem:[#allocation0 + $0x1] ss:$8 sm:$0xf0] %vm579_vm0, %v5071_v14   ;;  %v5135_v36 = vpop.permute.xlu2 %1561   ;;  %v807_v14 = vld [vmem:[#allocation1 + $0x170] sm:$0x3]  }
  0xec   :  { %1833 = vrot.lane.b32.xlu2 %v4531_v1, %s4391_s0  ;;  %v5127_v1 = vpop.permute.xlu0 %1418   ;;  %1331 = vst.msk [vmem:[#allocation0 + $0x81] ss:$8 sm:$0xf] %vm579_vm0, %v5073_v17   ;;  %v982_v38 = vld [vmem:[#allocation1 + $0x288] sm:$0x3]  }
  0xed   :  { %1333 = vst.msk [vmem:[#allocation0 + $0x81] ss:$8 sm:$0xf0] %vm579_vm0, %v5073_v17   ;;  %v812_v17 = vld [vmem:[#allocation1 + $0x178] sm:$0x3]  }
  0xee   :  { %1448 = vst.msk [vmem:[#allocation0 + $0x2c1] ss:$8 sm:$0xf] %vm579_vm0, %v5075_v26   ;;  %v1012_v39 = vld [vmem:[#allocation1 + $0x2b8] sm:$0x3]  }
  0xef   :  { %1450 = vst.msk [vmem:[#allocation0 + $0x2c1] ss:$8 sm:$0xf0] %vm579_vm0, %v5075_v26   ;;  %v907_v26 = vld [vmem:[#allocation1 + $0x210] sm:$0x3]  }
  0xf0   :  { %810 = vst.msk [vmem:[#allocation0 + $0x2e0] ss:$8 sm:$0x3] %vm579_vm0, %v807_v14   ;;  %v1037_v52 = vld [vmem:[#allocation1 + $0x2e0] sm:$0x3]  }
  0xf1   :  { %815 = vst.msk [vmem:[#allocation0 + $0x2f0] ss:$8 sm:$0x3] %vm579_vm0, %v812_v17   ;;  %v1042_v54 = vld [vmem:[#allocation1 + $0x2e8] sm:$0x3]  }
  0xf2   :  { %1898 = vrot.lane.b32.xlu1 %v4618_v47, %s4391_s0  ;;  %1318 = vst.msk [vmem:[#allocation0 + $0x41] ss:$8 sm:$0xf] %vm579_vm0, %v1315_v44   ;;  %v857_v47 = vld [vmem:[#allocation1 + $0x1c0] sm:$0x3]  }
  0xf3   :  { %1924 = vrot.lane.b32.xlu0 %v4657_v4, %s4391_s0  ;;  %1320 = vst.msk [vmem:[#allocation0 + $0x41] ss:$8 sm:$0xf0] %vm579_vm0, %v1315_v44   ;;  %v862_v4 = vld [vmem:[#allocation1 + $0x1c8] sm:$0x3]  }
  0xf4   :  { %1872 = vrot.lane.b32.xlu2 %v4575_v23, %s4391_s0  ;;  %1344 = vst.msk [vmem:[#allocation0 + $0xc1] ss:$8 sm:$0xf] %vm579_vm0, %v1341_v46   ;;  %v5154_v23 = vpop.permute.xlu0 %1457   ;;  %v1067_v10 = vld [vmem:[#allocation1 + $0x310] sm:$0x3]  }
  0xf5   :  { %1346 = vst.msk [vmem:[#allocation0 + $0xc1] ss:$8 sm:$0xf0] %vm579_vm0, %v1341_v46   ;;  %v1007_v46 = vld [vmem:[#allocation1 + $0x2b0] sm:$0x3]  }
  0xf6   :  { %1487 = vst.msk [vmem:[#allocation0 + $0x381] ss:$8 sm:$0xf] %vm579_vm0, %v1484_v49   ;;  %v1072_v58 = vld [vmem:[#allocation1 + $0x318] sm:$0x3]  }
  0xf7   :  { %1489 = vst.msk [vmem:[#allocation0 + $0x381] ss:$8 sm:$0xf0] %vm579_vm0, %v1484_v49   ;;  %v1022_v49 = vld [vmem:[#allocation1 + $0x2c8] sm:$0x3]  }
  0xf8   :  { %860 = vst.msk [vmem:[#allocation0 + $0x380] ss:$8 sm:$0x3] %vm579_vm0, %v857_v47   ;;  %v1092_v61 = vld [vmem:[#allocation1 + $0x338] sm:$0x3]  }
  0xf9   :  { %865 = vst.msk [vmem:[#allocation0 + $0x390] ss:$8 sm:$0x3] %vm579_vm0, %v862_v4   ;;  %v1102_v7 = vld [vmem:[#allocation1 + $0x348] sm:$0x3]  }
  0xfa   :  { %1937 = vrot.lane.b32.xlu1 %v4682_v19, %s4391_s0  ;;  %1383 = vst.msk [vmem:[#allocation0 + $0x181] ss:$8 sm:$0xf] %vm579_vm0, %v1380_v2   ;;  %v877_v19 = vld [vmem:[#allocation1 + $0x1e0] sm:$0x3]  }
  0xfb   :  { %1963 = vrot.lane.b32.xlu0 %v4733_v42, %s4391_s0  ;;  %1385 = vst.msk [vmem:[#allocation0 + $0x181] ss:$8 sm:$0xf0] %vm579_vm0, %v1380_v2   ;;  %v882_v42 = vld [vmem:[#allocation1 + $0x1e8] sm:$0x3]  }
  0xfc   :  { %1911 = vrot.lane.b32.xlu2 %v4646_v59, %s4391_s0  ;;  %1396 = vst.msk [vmem:[#allocation0 + $0x1c1] ss:$8 sm:$0xf] %vm579_vm0, %v1393_v5   ;;  %v5170_v59 = vpop.permute.xlu1 %1470   ;;  %v1082_v2 = vld [vmem:[#allocation1 + $0x328] sm:$0x3]  }
  0xfd   :  { %1398 = vst.msk [vmem:[#allocation0 + $0x1c1] ss:$8 sm:$0xf0] %vm579_vm0, %v1393_v5   ;;  %v1087_v5 = vld [vmem:[#allocation1 + $0x330] sm:$0x3]  }
  0xfe   :  { %1526 = vst.msk [vmem:[#allocation0 + $0x441] ss:$8 sm:$0xf] %vm579_vm0, %v1523_v6   ;;  %v1107_v8 = vld [vmem:[#allocation1 + $0x350] sm:$0x3]  }
  0xff   :  { %1528 = vst.msk [vmem:[#allocation0 + $0x441] ss:$8 sm:$0xf0] %vm579_vm0, %v1523_v6   ;;  %v1097_v6 = vld [vmem:[#allocation1 + $0x340] sm:$0x3]  }
 0x100   :  { %880 = vst.msk [vmem:[#allocation0 + $0x3c0] ss:$8 sm:$0x3] %vm579_vm0, %v877_v19   ;;  %v1112_v13 = vld [vmem:[#allocation1 + $0x358] sm:$0x3]  }
 0x101   :  { %885 = vst.msk [vmem:[#allocation0 + $0x3d0] ss:$8 sm:$0x3] %vm579_vm0, %v882_v42   ;;  %v1122_v14 = vld [vmem:[#allocation1 + $0x368] sm:$0x3]  }
 0x102   :  { %1976 = vrot.lane.b32.xlu1 %v4747_v50, %s4391_s0  ;;  %v892_v50 = vld [vmem:[#allocation1 + $0x1f8] sm:$0x3]   ;;  %890 = vst.msk [vmem:[#allocation0 + $0x3e0] ss:$8 sm:$0x3] %vm579_vm0, %v887_v18  }
 0x103   :  { %2002 = vrot.lane.b32.xlu0 %v4777_v3, %s4391_s0  ;;  %v5176_v3 = vpop.permute.xlu2 %1600   ;;  %895 = vst.msk [vmem:[#allocation0 + $0x3f0] ss:$8 sm:$0x3] %vm579_vm0, %v892_v50   ;;  %v1132_v47 = vld [vmem:[#allocation1 + $0x378] sm:$0x3]  }
 0x104   :  { %1950 = vrot.lane.b32.xlu2 %v4707_v31, %s4391_s0  ;;  %v902_v31 = vld [vmem:[#allocation1 + $0x208] sm:$0x3]   ;;  %900 = vst.msk [vmem:[#allocation0 + $0x400] ss:$8 sm:$0x3] %vm579_vm0, %v897_v20  }
 0x105   :  { %905 = vst.msk [vmem:[#allocation0 + $0x410] ss:$8 sm:$0x3] %vm579_vm0, %v902_v31   ;;  %v1142_v19 = vld [vmem:[#allocation1 + $0x388] sm:$0x3]  }
 0x106   :  { %910 = vst.msk [vmem:[#allocation0 + $0x420] ss:$8 sm:$0x3] %vm579_vm0, %v907_v26   ;;  %v1152_v18 = vld [vmem:[#allocation1 + $0x398] sm:$0x3]  }
 0x107   :  { %915 = vst.msk [vmem:[#allocation0 + $0x430] ss:$8 sm:$0x3] %vm579_vm0, %v912_v27   ;;  %v1157_v50 = vld [vmem:[#allocation1 + $0x3a0] sm:$0x3]  }
 0x108   :  { %920 = vst.msk [vmem:[#allocation0 + $0x440] ss:$8 sm:$0x3] %vm579_vm0, %v917_v28   ;;  %v1162_v20 = vld [vmem:[#allocation1 + $0x3a8] sm:$0x3]  }
 0x109   :  { %925 = vst.msk [vmem:[#allocation0 + $0x450] ss:$8 sm:$0x3] %vm579_vm0, %v922_v22   ;;  %v1167_v31 = vld [vmem:[#allocation1 + $0x3b0] sm:$0x3]  }
 0x10a   :  { %2015 = vrot.lane.b32.xlu1 %v4803_v15, %s4391_s0  ;;  %1422 = vst.msk [vmem:[#allocation0 + $0x241] ss:$8 sm:$0xf] %vm579_vm0, %v5127_v1   ;;  %v937_v15 = vld [vmem:[#allocation1 + $0x240] sm:$0x3]  }
 0x10b   :  { %2041 = vrot.lane.b32.xlu0 %v4834_v32, %s4391_s0  ;;  %v5192_v32 = vpop.permute.xlu0 %1496   ;;  %1424 = vst.msk [vmem:[#allocation0 + $0x241] ss:$8 sm:$0xf0] %vm579_vm0, %v5127_v1   ;;  %v5213_v45 = vpop.permute.xlu2 %1639   ;;  %v1172_v26 = vld [vmem:[#allocation1 + $0x3b8] sm:$0x3]  }
 0x10c   :  { %1989 = vrot.lane.b32.xlu2 %v4760_v57, %s4391_s0  ;;  %1435 = vst.msk [vmem:[#allocation0 + $0x281] ss:$8 sm:$0xf] %vm579_vm0, %v5131_v16   ;;  %v5207_v57 = vpop.permute.xlu1 %1509   ;;  %v1177_v28 = vld [vmem:[#allocation1 + $0x3c0] sm:$0x3]  }
 0x10d   :  { %1437 = vst.msk [vmem:[#allocation0 + $0x281] ss:$8 sm:$0xf0] %vm579_vm0, %v5131_v16   ;;  %v1182_v22 = vld [vmem:[#allocation1 + $0x3c8] sm:$0x3]  }
 0x10e   :  { %1565 = vst.msk [vmem:[#allocation0 + $0x501] ss:$8 sm:$0xf] %vm579_vm0, %v5135_v36  }
 0x10f   :  { %1567 = vst.msk [vmem:[#allocation0 + $0x501] ss:$8 sm:$0xf0] %vm579_vm0, %v5135_v36   ;;  %v1117_v36 = vld [vmem:[#allocation1 + $0x360] sm:$0x3]  }
 0x110   :  { %940 = vst.msk [vmem:[#allocation0 + $0x480] ss:$8 sm:$0x3] %vm579_vm0, %v937_v15  }
 0x111   :  { %945 = vst.msk [vmem:[#allocation0 + $0x490] ss:$8 sm:$0x3] %vm579_vm0, %v942_v60   ;;  %v1192_v60 = vld [vmem:[#allocation1 + $0x3d8] sm:$0x3]  }
 0x112   :  { %2054 = vrot.lane.b32.xlu1 %v4847_v40, %s4391_s0  ;;  %v952_v40 = vld [vmem:[#allocation1 + $0x258] sm:$0x3]   ;;  %960 = vst.msk [vmem:[#allocation0 + $0x4c0] ss:$8 sm:$0x3] %vm579_vm0, %v957_v29  }
 0x113   :  { %2080 = vrot.lane.b32.xlu0 %v4890_v0, %s4391_s0  ;;  %v947_v0 = vld [vmem:[#allocation1 + $0x250] sm:$0x3]   ;;  %955 = vst.msk [vmem:[#allocation0 + $0x4b0] ss:$8 sm:$0x3] %vm579_vm0, %v952_v40   ;;  %v5230_v43 = vpop.permute.xlu0 %1535   ;;  %v5259_v44 = vpop.permute.xlu2 %1678  }
 0x114   :  { %950 = vst.msk [vmem:[#allocation0 + $0x4a0] ss:$8 sm:$0x3] %vm579_vm0, %v947_v0   ;;  %2028 = vrot.lane.b32.xlu2 %v4820_v25, %s4391_s0  ;;  %v967_v25 = vld [vmem:[#allocation1 + $0x270] sm:$0x3]  }
 0x115   :  { %965 = vst.msk [vmem:[#allocation0 + $0x4d0] ss:$8 sm:$0x3] %vm579_vm0, %v962_v33   ;;  %v1212_v0 = vld [vmem:[#allocation1 + $0x3f8] sm:$0x3]  }
 0x116   :  { %970 = vst.msk [vmem:[#allocation0 + $0x4e0] ss:$8 sm:$0x3] %vm579_vm0, %v967_v25  }
 0x117   :  { %975 = vst.msk [vmem:[#allocation0 + $0x4f0] ss:$8 sm:$0x3] %vm579_vm0, %v972_v35  }
 0x118   :  { %980 = vst.msk [vmem:[#allocation0 + $0x500] ss:$8 sm:$0x3] %vm579_vm0, %v977_v37  }
 0x119   :  { %985 = vst.msk [vmem:[#allocation0 + $0x510] ss:$8 sm:$0x3] %vm579_vm0, %v982_v38  }
 0x11a   :  { %2093 = vrot.lane.b32.xlu1 %v4907_v11, %s4391_s0  ;;  %v992_v11 = vld [vmem:[#allocation1 + $0x298] sm:$0x3]   ;;  %1461 = vst.msk [vmem:[#allocation0 + $0x301] ss:$8 sm:$0xf] %vm579_vm0, %v5154_v23  }
 0x11b   :  { %2119 = vrot.lane.b32.xlu0 %v4941_v30, %s4391_s0  ;;  %v987_v30 = vld [vmem:[#allocation1 + $0x290] sm:$0x3]   ;;  %995 = vst.msk [vmem:[#allocation0 + $0x530] ss:$8 sm:$0x3] %vm579_vm0, %v992_v11   ;;  %v5276_v55 = vpop.permute.xlu0 %1574   ;;  %v5300_v62 = vpop.permute.xlu2 %1717  }
 0x11c   :  { %990 = vst.msk [vmem:[#allocation0 + $0x520] ss:$8 sm:$0x3] %vm579_vm0, %v987_v30   ;;  %2067 = vrot.lane.b32.xlu2 %v4864_v51, %s4391_s0  ;;  %v5249_v51 = vpop.permute.xlu1 %1548  }
 0x11d   :  { %1463 = vst.msk [vmem:[#allocation0 + $0x301] ss:$8 sm:$0xf0] %vm579_vm0, %v5154_v23   ;;  %v1127_v23 = vld [vmem:[#allocation1 + $0x370] sm:$0x3]  }
 0x11e   :  { %1474 = vst.msk [vmem:[#allocation0 + $0x341] ss:$8 sm:$0xf] %vm579_vm0, %v5170_v59  }
 0x11f   :  { %1476 = vst.msk [vmem:[#allocation0 + $0x341] ss:$8 sm:$0xf0] %vm579_vm0, %v5170_v59   ;;  %v1137_v59 = vld [vmem:[#allocation1 + $0x380] sm:$0x3]  }
 0x120   :  { %1604 = vst.msk [vmem:[#allocation0 + $0x5c1] ss:$8 sm:$0xf] %vm579_vm0, %v5176_v3  }
 0x121   :  { %1606 = vst.msk [vmem:[#allocation0 + $0x5c1] ss:$8 sm:$0xf0] %vm579_vm0, %v5176_v3   ;;  %v1147_v3 = vld [vmem:[#allocation1 + $0x390] sm:$0x3]  }
 0x122   :  { %2132 = vrot.lane.b32.xlu1 %v4958_v41, %s4391_s0  ;;  %v1002_v41 = vld [vmem:[#allocation1 + $0x2a8] sm:$0x3]   ;;  %1010 = vst.msk [vmem:[#allocation0 + $0x560] ss:$8 sm:$0x3] %vm579_vm0, %v1007_v46  }
 0x123   :  { %2158 = vrot.lane.b32.xlu0 %v4992_v63, %s4391_s0  ;;  %v997_v63 = vld [vmem:[#allocation1 + $0x2a0] sm:$0x3]   ;;  %1005 = vst.msk [vmem:[#allocation0 + $0x550] ss:$8 sm:$0x3] %vm579_vm0, %v1002_v41   ;;  %v1614_v1 = vpop.permute.xlu0 %1613  }
 0x124   :  { %1000 = vst.msk [vmem:[#allocation0 + $0x540] ss:$8 sm:$0x3] %vm579_vm0, %v997_v63   ;;  %2106 = vrot.lane.b32.xlu2 %v4924_v21, %s4391_s0  ;;  %v1017_v21 = vld [vmem:[#allocation1 + $0x2c0] sm:$0x3]   ;;  %v5295_v56 = vpop.permute.xlu1 %1587  }
 0x125   :  { %1015 = vst.msk [vmem:[#allocation0 + $0x570] ss:$8 sm:$0x3] %vm579_vm0, %v1012_v39  }
 0x126   :  { %1020 = vst.msk [vmem:[#allocation0 + $0x580] ss:$8 sm:$0x3] %vm579_vm0, %v1017_v21  }
 0x127   :  { %1025 = vst.msk [vmem:[#allocation0 + $0x590] ss:$8 sm:$0x3] %vm579_vm0, %v1022_v49  }
 0x128   :  { %1040 = vst.msk [vmem:[#allocation0 + $0x5c0] ss:$8 sm:$0x3] %vm579_vm0, %v1037_v52  }
 0x129   :  { %1045 = vst.msk [vmem:[#allocation0 + $0x5d0] ss:$8 sm:$0x3] %vm579_vm0, %v1042_v54  }
 0x12a   :  { %2171 = vrot.lane.b32.xlu1 %v5002_v9, %s4391_s0  ;;  %v1052_v9 = vld [vmem:[#allocation1 + $0x2f8] sm:$0x3]   ;;  %1500 = vst.msk [vmem:[#allocation0 + $0x3c1] ss:$8 sm:$0xf] %vm579_vm0, %v5192_v32  }
 0x12b   :  { %2197 = vrot.lane.b32.xlu0 %v5042_v48, %s4391_s0  ;;  %v1047_v48 = vld [vmem:[#allocation1 + $0x2f0] sm:$0x3]   ;;  %1055 = vst.msk [vmem:[#allocation0 + $0x5f0] ss:$8 sm:$0x3] %vm579_vm0, %v1052_v9   ;;  %v1653_v17 = vpop.permute.xlu0 %1652  }
 0x12c   :  { %1050 = vst.msk [vmem:[#allocation0 + $0x5e0] ss:$8 sm:$0x3] %vm579_vm0, %v1047_v48   ;;  %2145 = vrot.lane.b32.xlu2 %v4975_v53, %s4391_s0  ;;  %v1057_v53 = vld [vmem:[#allocation1 + $0x300] sm:$0x3]  }
 0x12d   :  { %1502 = vst.msk [vmem:[#allocation0 + $0x3c1] ss:$8 sm:$0xf0] %vm579_vm0, %v5192_v32   ;;  %v1187_v32 = vld [vmem:[#allocation1 + $0x3d0] sm:$0x3]  }
 0x12e   :  { %1513 = vst.msk [vmem:[#allocation0 + $0x401] ss:$8 sm:$0xf] %vm579_vm0, %v5207_v57  }
 0x12f   :  { %1515 = vst.msk [vmem:[#allocation0 + $0x401] ss:$8 sm:$0xf0] %vm579_vm0, %v5207_v57  }
 0x130   :  { %1643 = vst.msk [vmem:[#allocation0 + $0x681] ss:$8 sm:$0xf] %vm579_vm0, %v5213_v45  }
 0x131   :  { %1645 = vst.msk [vmem:[#allocation0 + $0x681] ss:$8 sm:$0xf0] %vm579_vm0, %v5213_v45   ;;  %v1207_v45 = vld [vmem:[#allocation1 + $0x3f0] sm:$0x3]  }
 0x132   :  { %2210 = vrot.lane.b32.xlu1 %v5063_v12, %s4391_s0  ;;  %v1062_v12 = vld [vmem:[#allocation1 + $0x308] sm:$0x3]   ;;  %1060 = vst.msk [vmem:[#allocation0 + $0x600] ss:$8 sm:$0x3] %vm579_vm0, %v1057_v53  }
 0x133   :  { %1065 = vst.msk [vmem:[#allocation0 + $0x610] ss:$8 sm:$0x3] %vm579_vm0, %v1062_v12   ;;  %v1692_v27 = vpop.permute.xlu0 %1691  }
 0x134   :  { %2184 = vrot.lane.b32.xlu2 %v5015_v24, %s4391_s0  ;;  %v1077_v24 = vld [vmem:[#allocation1 + $0x320] sm:$0x3]   ;;  %1070 = vst.msk [vmem:[#allocation0 + $0x620] ss:$8 sm:$0x3] %vm579_vm0, %v1067_v10   ;;  %v1757_v16 = vpop.permute.xlu2 %1756  }
 0x135   :  { %1075 = vst.msk [vmem:[#allocation0 + $0x630] ss:$8 sm:$0x3] %vm579_vm0, %v1072_v58  }
 0x136   :  { %1080 = vst.msk [vmem:[#allocation0 + $0x640] ss:$8 sm:$0x3] %vm579_vm0, %v1077_v24  }
 0x137   :  { %1085 = vst.msk [vmem:[#allocation0 + $0x650] ss:$8 sm:$0x3] %vm579_vm0, %v1082_v2  }
 0x138   :  { %1090 = vst.msk [vmem:[#allocation0 + $0x660] ss:$8 sm:$0x3] %vm579_vm0, %v1087_v5  }
 0x139   :  { %1095 = vst.msk [vmem:[#allocation0 + $0x670] ss:$8 sm:$0x3] %vm579_vm0, %v1092_v61  }
 0x13a   :  { %1100 = vst.msk [vmem:[#allocation0 + $0x680] ss:$8 sm:$0x3] %vm579_vm0, %v1097_v6  }
 0x13b   :  { %1105 = vst.msk [vmem:[#allocation0 + $0x690] ss:$8 sm:$0x3] %vm579_vm0, %v1102_v7  }
 0x13c   :  { %2223 = vrot.lane.b32.xlu2 %v5088_v34, %s4391_s0  ;;  %1110 = vst.msk [vmem:[#allocation0 + $0x6a0] ss:$8 sm:$0x3] %vm579_vm0, %v1107_v8   ;;  %v1627_v34 = vpop.permute.xlu1 %1626  }
 0x13d   :  { %1115 = vst.msk [vmem:[#allocation0 + $0x6b0] ss:$8 sm:$0x3] %vm579_vm0, %v1112_v13   ;;  %v1731_v40 = vpop.permute.xlu0 %1730  }
 0x13e   :  { %1539 = vst.msk [vmem:[#allocation0 + $0x481] ss:$8 sm:$0xf] %vm579_vm0, %v5230_v43   ;;  %v1795_v42 = vpop.permute.xlu2 %1794  }
 0x13f   :  { %1541 = vst.msk [vmem:[#allocation0 + $0x481] ss:$8 sm:$0xf0] %vm579_vm0, %v5230_v43  }
 0x140   :  { %1552 = vst.msk [vmem:[#allocation0 + $0x4c1] ss:$8 sm:$0xf] %vm579_vm0, %v5249_v51  }
 0x141   :  { %1554 = vst.msk [vmem:[#allocation0 + $0x4c1] ss:$8 sm:$0xf0] %vm579_vm0, %v5249_v51  }
 0x142   :  { %1682 = vst.msk [vmem:[#allocation0 + $0x741] ss:$8 sm:$0xf] %vm579_vm0, %v5259_v44  }
 0x143   :  { %1684 = vst.msk [vmem:[#allocation0 + $0x741] ss:$8 sm:$0xf0] %vm579_vm0, %v5259_v44  }
 0x144   :  { %1120 = vst.msk [vmem:[#allocation0 + $0x6c0] ss:$8 sm:$0x3] %vm579_vm0, %v1117_v36   ;;  %v1666_v4 = vpop.permute.xlu1 %1665  }
 0x145   :  { %1125 = vst.msk [vmem:[#allocation0 + $0x6d0] ss:$8 sm:$0x3] %vm579_vm0, %v1122_v14   ;;  %v1769_v38 = vpop.permute.xlu0 %1768  }
 0x146   :  { %1130 = vst.msk [vmem:[#allocation0 + $0x6e0] ss:$8 sm:$0x3] %vm579_vm0, %v1127_v23   ;;  %v1834_v15 = vpop.permute.xlu2 %1833  }
 0x147   :  { %1135 = vst.msk [vmem:[#allocation0 + $0x6f0] ss:$8 sm:$0x3] %vm579_vm0, %v1132_v47  }
 0x148   :  { %1140 = vst.msk [vmem:[#allocation0 + $0x700] ss:$8 sm:$0x3] %vm579_vm0, %v1137_v59  }
 0x149   :  { %1145 = vst.msk [vmem:[#allocation0 + $0x710] ss:$8 sm:$0x3] %vm579_vm0, %v1142_v19  }
 0x14a   :  { %1150 = vst.msk [vmem:[#allocation0 + $0x720] ss:$8 sm:$0x3] %vm579_vm0, %v1147_v3  }
 0x14b   :  { %1155 = vst.msk [vmem:[#allocation0 + $0x730] ss:$8 sm:$0x3] %vm579_vm0, %v1152_v18  }
 0x14c   :  { %1160 = vst.msk [vmem:[#allocation0 + $0x740] ss:$8 sm:$0x3] %vm579_vm0, %v1157_v50   ;;  %v1705_v57 = vpop.permute.xlu1 %1704  }
 0x14d   :  { %1165 = vst.msk [vmem:[#allocation0 + $0x750] ss:$8 sm:$0x3] %vm579_vm0, %v1162_v20  }
 0x14e   :  { %1170 = vst.msk [vmem:[#allocation0 + $0x760] ss:$8 sm:$0x3] %vm579_vm0, %v1167_v31   ;;  %v1873_v33 = vpop.permute.xlu2 %1872  }
 0x14f   :  { %1175 = vst.msk [vmem:[#allocation0 + $0x770] ss:$8 sm:$0x3] %vm579_vm0, %v1172_v26  }
 0x150   :  { %1578 = vst.msk [vmem:[#allocation0 + $0x541] ss:$8 sm:$0xf] %vm579_vm0, %v5276_v55  }
 0x151   :  { %1580 = vst.msk [vmem:[#allocation0 + $0x541] ss:$8 sm:$0xf0] %vm579_vm0, %v5276_v55   ;;  %v1808_v55 = vpop.permute.xlu0 %1807  }
 0x152   :  { %1591 = vst.msk [vmem:[#allocation0 + $0x581] ss:$8 sm:$0xf] %vm579_vm0, %v5295_v56  }
 0x153   :  { %1593 = vst.msk [vmem:[#allocation0 + $0x581] ss:$8 sm:$0xf0] %vm579_vm0, %v5295_v56  }
 0x154   :  { %1721 = vst.msk [vmem:[#allocation0 + $0x801] ss:$8 sm:$0xf] %vm579_vm0, %v5300_v62   ;;  %v1744_v29 = vpop.permute.xlu1 %1743  }
 0x155   :  { %1723 = vst.msk [vmem:[#allocation0 + $0x801] ss:$8 sm:$0xf0] %vm579_vm0, %v5300_v62  }
 0x156   :  { %1180 = vst.msk [vmem:[#allocation0 + $0x780] ss:$8 sm:$0x3] %vm579_vm0, %v1177_v28   ;;  %v5401_v46 = vpop.permute.xlu2 %1911  }
 0x157   :  { %1185 = vst.msk [vmem:[#allocation0 + $0x790] ss:$8 sm:$0x3] %vm579_vm0, %v1182_v22  }
 0x158   :  { %1190 = vst.msk [vmem:[#allocation0 + $0x7a0] ss:$8 sm:$0x3] %vm579_vm0, %v1187_v32  }
 0x159   :  { %1195 = vst.msk [vmem:[#allocation0 + $0x7b0] ss:$8 sm:$0x3] %vm579_vm0, %v1192_v60   ;;  %v1847_v20 = vpop.permute.xlu0 %1846  }
 0x15a   :  { %1210 = vst.msk [vmem:[#allocation0 + $0x7e0] ss:$8 sm:$0x3] %vm579_vm0, %v1207_v45  }
 0x15b   :  { %1215 = vst.msk [vmem:[#allocation0 + $0x7f0] ss:$8 sm:$0x3] %vm579_vm0, %v1212_v0  }
 0x15c   :  { %1617 = vst.msk [vmem:[#allocation0 + $0x601] ss:$8 sm:$0xf] %vm579_vm0, %v1614_v1   ;;  %v1782_v44 = vpop.permute.xlu1 %1781  }
 0x15d   :  { %1619 = vst.msk [vmem:[#allocation0 + $0x601] ss:$8 sm:$0xf0] %vm579_vm0, %v1614_v1  }
 0x15e   :  { %1630 = vst.msk [vmem:[#allocation0 + $0x641] ss:$8 sm:$0xf] %vm579_vm0, %v1627_v34   ;;  %v5465_v8 = vpop.permute.xlu2 %1950  }
 0x15f   :  { %1632 = vst.msk [vmem:[#allocation0 + $0x641] ss:$8 sm:$0xf0] %vm579_vm0, %v1627_v34  }
 0x160   :  { %1760 = vst.msk [vmem:[#allocation0 + $0x8c1] ss:$8 sm:$0xf] %vm579_vm0, %v1757_v16  }
 0x161   :  { %1762 = vst.msk [vmem:[#allocation0 + $0x8c1] ss:$8 sm:$0xf0] %vm579_vm0, %v1757_v16  }
 0x162   :  { %1656 = vst.msk [vmem:[#allocation0 + $0x6c1] ss:$8 sm:$0xf] %vm579_vm0, %v1653_v17  }
 0x163   :  { %1658 = vst.msk [vmem:[#allocation0 + $0x6c1] ss:$8 sm:$0xf0] %vm579_vm0, %v1653_v17  }
 0x164   :  { %1669 = vst.msk [vmem:[#allocation0 + $0x701] ss:$8 sm:$0xf] %vm579_vm0, %v1666_v4   ;;  %v5451_v2 = vpop.permute.xlu1 %1820  }
 0x165   :  { %1671 = vst.msk [vmem:[#allocation0 + $0x701] ss:$8 sm:$0xf0] %vm579_vm0, %v1666_v4  }
 0x166   :  { %1798 = vst.msk [vmem:[#allocation0 + $0x82] ss:$8 sm:$0xf] %vm579_vm0, %v1795_v42  }
 0x167   :  { %1800 = vst.msk [vmem:[#allocation0 + $0x82] ss:$8 sm:$0xf0] %vm579_vm0, %v1795_v42  }
 0x168   :  { %1695 = vst.msk [vmem:[#allocation0 + $0x781] ss:$8 sm:$0xf] %vm579_vm0, %v1692_v27  }
 0x169   :  { %1697 = vst.msk [vmem:[#allocation0 + $0x781] ss:$8 sm:$0xf0] %vm579_vm0, %v1692_v27  }
 0x16a   :  { %1708 = vst.msk [vmem:[#allocation0 + $0x7c1] ss:$8 sm:$0xf] %vm579_vm0, %v1705_v57  }
 0x16b   :  { %1710 = vst.msk [vmem:[#allocation0 + $0x7c1] ss:$8 sm:$0xf0] %vm579_vm0, %v1705_v57  }
 0x16c   :  { %1837 = vst.msk [vmem:[#allocation0 + $0x142] ss:$8 sm:$0xf] %vm579_vm0, %v1834_v15  }
 0x16d   :  { %v2327_v25 = vld [vmem:[#allocation0 + $0x80] sm:$0xf]  ;;  %v2333_v35 = vld [vmem:[#allocation0 + $0x88] sm:$0xf]  ;;  %v2339_v37 = vld [vmem:[#allocation0 + $0x90] sm:$0xf] }
 0x16e   :  { %v2345_v43 = vld [vmem:[#allocation0 + $0x98] sm:$0xf]  ;;  %4116 = vst [vmem:[%s6362_s1 + $0x40] sm:$0xf] %v2327_v25  ;;  %v2351_v30 = vld [vmem:[#allocation0 + $0xa0] sm:$0xf] }
 0x16f   :  { %4117 = vst [vmem:[%s6362_s1 + $0x44] sm:$0xf] %v2333_v35  ;;  %v2357_v11 = vld [vmem:[#allocation0 + $0xa8] sm:$0xf]  ;;  %v2363_v51 = vld [vmem:[#allocation0 + $0xb0] sm:$0xf] }
 0x170   :  { %4118 = vst [vmem:[%s6362_s1 + $0x48] sm:$0xf] %v2339_v37  ;;  %v2369_v63 = vld [vmem:[#allocation0 + $0xb8] sm:$0xf] }
 0x171   :  { %4119 = vst [vmem:[%s6362_s1 + $0x4c] sm:$0xf] %v2345_v43 }
 0x172   :  { %4120 = vst [vmem:[%s6362_s1 + $0x50] sm:$0xf] %v2351_v30 }
 0x173   :  { %4121 = vst [vmem:[%s6362_s1 + $0x54] sm:$0xf] %v2357_v11  ;;  %v2471_v41 = vld [vmem:[#allocation0 + $0x140] sm:$0xf]  ;;  %v2477_v39 = vld [vmem:[#allocation0 + $0x148] sm:$0xf]  ;;  %v1990_v11 = vpop.permute.xlu2 %1989  }
 0x174   :  { %4122 = vst [vmem:[%s6362_s1 + $0x58] sm:$0xf] %v2363_v51  ;;  %v2483_v21 = vld [vmem:[#allocation0 + $0x150] sm:$0xf]  ;;  %v2489_v49 = vld [vmem:[#allocation0 + $0x158] sm:$0xf] }
 0x175   :  { %4123 = vst [vmem:[%s6362_s1 + $0x5c] sm:$0xf] %v2369_v63 }
 0x176   :  { %1839 = vst.msk [vmem:[#allocation0 + $0x142] ss:$8 sm:$0xf0] %vm579_vm0, %v1834_v15  }
 0x177   :  { %1734 = vst.msk [vmem:[#allocation0 + $0x841] ss:$8 sm:$0xf] %vm579_vm0, %v1731_v40  }
 0x178   :  { %1736 = vst.msk [vmem:[#allocation0 + $0x841] ss:$8 sm:$0xf0] %vm579_vm0, %v1731_v40  }
 0x179   :  { %4140 = vst [vmem:[%s6362_s1 + $0xa0] sm:$0xf] %v2471_v41 }
 0x17a   :  { %4141 = vst [vmem:[%s6362_s1 + $0xa4] sm:$0xf] %v2477_v39 }
 0x17b   :  { %4142 = vst [vmem:[%s6362_s1 + $0xa8] sm:$0xf] %v2483_v21 }
 0x17c   :  { %4143 = vst [vmem:[%s6362_s1 + $0xac] sm:$0xf] %v2489_v49  ;;  %v1886_v49 = vpop.permute.xlu0 %1885  }
 0x17d   :  { %v2495_v52 = vld [vmem:[#allocation0 + $0x160] sm:$0xf]  ;;  %v2501_v54 = vld [vmem:[#allocation0 + $0x168] sm:$0xf]  ;;  %v2507_v48 = vld [vmem:[#allocation0 + $0x170] sm:$0xf] }
 0x17e   :  { %v2513_v9 = vld [vmem:[#allocation0 + $0x178] sm:$0xf]  ;;  %4144 = vst [vmem:[%s6362_s1 + $0xb0] sm:$0xf] %v2495_v52 }
 0x17f   :  { %4145 = vst [vmem:[%s6362_s1 + $0xb4] sm:$0xf] %v2501_v54 }
 0x180   :  { %4146 = vst [vmem:[%s6362_s1 + $0xb8] sm:$0xf] %v2507_v48 }
 0x181   :  { %4147 = vst [vmem:[%s6362_s1 + $0xbc] sm:$0xf] %v2513_v9 }
 0x182   :  { %1747 = vst.msk [vmem:[#allocation0 + $0x881] ss:$8 sm:$0xf] %vm579_vm0, %v1744_v29  }
 0x183   :  { %1749 = vst.msk [vmem:[#allocation0 + $0x881] ss:$8 sm:$0xf0] %vm579_vm0, %v1744_v29  }
 0x184   :  { %1876 = vst.msk [vmem:[#allocation0 + $0x202] ss:$8 sm:$0xf] %vm579_vm0, %v1873_v33  }
 0x185   :  { %1878 = vst.msk [vmem:[#allocation0 + $0x202] ss:$8 sm:$0xf0] %vm579_vm0, %v1873_v33   ;;  %v1860_v33 = vpop.permute.xlu1 %1859  }
 0x186   :  { %1772 = vst.msk [vmem:[#allocation0 + $0x2] ss:$8 sm:$0xf] %vm579_vm0, %v1769_v38  }
 0x187   :  { %1774 = vst.msk [vmem:[#allocation0 + $0x2] ss:$8 sm:$0xf0] %vm579_vm0, %v1769_v38  }
 0x188   :  { %1785 = vst.msk [vmem:[#allocation0 + $0x42] ss:$8 sm:$0xf] %vm579_vm0, %v1782_v44  }
 0x189   :  { %1787 = vst.msk [vmem:[#allocation0 + $0x42] ss:$8 sm:$0xf0] %vm579_vm0, %v1782_v44  }
 0x18a   :  { %1915 = vst.msk [vmem:[#allocation0 + $0x2c2] ss:$8 sm:$0xf] %vm579_vm0, %v5401_v46  }
 0x18b   :  { %v2615_v53 = vld [vmem:[#allocation0 + $0x200] sm:$0xf]  ;;  %v2621_v12 = vld [vmem:[#allocation0 + $0x208] sm:$0xf]  ;;  %v2627_v56 = vld [vmem:[#allocation0 + $0x210] sm:$0xf] }
 0x18c   :  { %v2633_v10 = vld [vmem:[#allocation0 + $0x218] sm:$0xf]  ;;  %4164 = vst [vmem:[%s6362_s1 + $0x100] sm:$0xf] %v2615_v53  ;;  %v2639_v58 = vld [vmem:[#allocation0 + $0x220] sm:$0xf] }
 0x18d   :  { %4165 = vst [vmem:[%s6362_s1 + $0x104] sm:$0xf] %v2621_v12  ;;  %v2645_v62 = vld [vmem:[#allocation0 + $0x228] sm:$0xf]  ;;  %v2651_v24 = vld [vmem:[#allocation0 + $0x230] sm:$0xf]  ;;  %v1899_v53 = vpop.permute.xlu1 %1898  }
 0x18e   :  { %4166 = vst [vmem:[%s6362_s1 + $0x108] sm:$0xf] %v2627_v56  ;;  %v2657_v5 = vld [vmem:[#allocation0 + $0x238] sm:$0xf]  ;;  %v2232_v61 = vld [vmem:[#allocation0] sm:$0xf] }
 0x18f   :  { %4167 = vst [vmem:[%s6362_s1 + $0x10c] sm:$0xf] %v2633_v10  ;;  %v2237_v6 = vld [vmem:[#allocation0 + $0x8] sm:$0xf]  ;;  %v2243_v7 = vld [vmem:[#allocation0 + $0x10] sm:$0xf]  ;;  %v5628_v10 = vpop.permute.xlu2 %2028  }
 0x190   :  { %4168 = vst [vmem:[%s6362_s1 + $0x110] sm:$0xf] %v2639_v58  ;;  %v2249_v13 = vld [vmem:[#allocation0 + $0x18] sm:$0xf]  ;;  %v2255_v1 = vld [vmem:[#allocation0 + $0x20] sm:$0xf] }
 0x191   :  { %4169 = vst [vmem:[%s6362_s1 + $0x114] sm:$0xf] %v2645_v62  ;;  %v2261_v34 = vld [vmem:[#allocation0 + $0x28] sm:$0xf]  ;;  %v2267_v16 = vld [vmem:[#allocation0 + $0x30] sm:$0xf] }
 0x192   :  { %4170 = vst [vmem:[%s6362_s1 + $0x118] sm:$0xf] %v2651_v24  ;;  %v2273_v36 = vld [vmem:[#allocation0 + $0x38] sm:$0xf]  ;;  %v2279_v14 = vld [vmem:[#allocation0 + $0x40] sm:$0xf] }
 0x193   :  { %4171 = vst [vmem:[%s6362_s1 + $0x11c] sm:$0xf] %v2657_v5  ;;  %v2285_v17 = vld [vmem:[#allocation0 + $0x48] sm:$0xf]  ;;  %v2291_v23 = vld [vmem:[#allocation0 + $0x50] sm:$0xf] }
 0x194   :  { %2235 = vst [vmem:[%s6362_s1] sm:$0xf] %v2232_v61  ;;  %v2297_v47 = vld [vmem:[#allocation0 + $0x58] sm:$0xf]  ;;  %v2303_v4 = vld [vmem:[#allocation0 + $0x60] sm:$0xf] }
 0x195   :  { %4101 = vst [vmem:[%s6362_s1 + $0x4] sm:$0xf] %v2237_v6  ;;  %v2309_v59 = vld [vmem:[#allocation0 + $0x68] sm:$0xf]  ;;  %v2315_v19 = vld [vmem:[#allocation0 + $0x70] sm:$0xf] }
 0x196   :  { %4102 = vst [vmem:[%s6362_s1 + $0x8] sm:$0xf] %v2243_v7  ;;  %v2321_v42 = vld [vmem:[#allocation0 + $0x78] sm:$0xf]  ;;  %v2759_v3 = vld [vmem:[#allocation0 + $0x2c0] sm:$0xf] }
 0x197   :  { %4103 = vst [vmem:[%s6362_s1 + $0xc] sm:$0xf] %v2249_v13  ;;  %v2765_v18 = vld [vmem:[#allocation0 + $0x2c8] sm:$0xf]  ;;  %v2771_v50 = vld [vmem:[#allocation0 + $0x2d0] sm:$0xf] }
 0x198   :  { %4104 = vst [vmem:[%s6362_s1 + $0x10] sm:$0xf] %v2255_v1  ;;  %v2777_v31 = vld [vmem:[#allocation0 + $0x2d8] sm:$0xf] }
 0x199   :  { %4105 = vst [vmem:[%s6362_s1 + $0x14] sm:$0xf] %v2261_v34  ;;  %v5670_v34 = vpop.permute.xlu0 %1924  }
 0x19a   :  { %4106 = vst [vmem:[%s6362_s1 + $0x18] sm:$0xf] %v2267_v16 }
 0x19b   :  { %4107 = vst [vmem:[%s6362_s1 + $0x1c] sm:$0xf] %v2273_v36 }
 0x19c   :  { %1917 = vst.msk [vmem:[#allocation0 + $0x2c2] ss:$8 sm:$0xf0] %vm579_vm0, %v5401_v46  }
 0x19d   :  { %4108 = vst [vmem:[%s6362_s1 + $0x20] sm:$0xf] %v2279_v14 }
 0x19e   :  { %4109 = vst [vmem:[%s6362_s1 + $0x24] sm:$0xf] %v2285_v17 }
 0x19f   :  { %4110 = vst [vmem:[%s6362_s1 + $0x28] sm:$0xf] %v2291_v23 }
 0x1a0   :  { %4111 = vst [vmem:[%s6362_s1 + $0x2c] sm:$0xf] %v2297_v47 }
 0x1a1   :  { %4112 = vst [vmem:[%s6362_s1 + $0x30] sm:$0xf] %v2303_v4 }
 0x1a2   :  { %4113 = vst [vmem:[%s6362_s1 + $0x34] sm:$0xf] %v2309_v59 }
 0x1a3   :  { %4114 = vst [vmem:[%s6362_s1 + $0x38] sm:$0xf] %v2315_v19  ;;  %v2783_v26 = vld [vmem:[#allocation0 + $0x2e0] sm:$0xf]  ;;  %v2789_v27 = vld [vmem:[#allocation0 + $0x2e8] sm:$0xf] }
 0x1a4   :  { %4115 = vst [vmem:[%s6362_s1 + $0x3c] sm:$0xf] %v2321_v42  ;;  %v2795_v28 = vld [vmem:[#allocation0 + $0x2f0] sm:$0xf]  ;;  %v2801_v22 = vld [vmem:[#allocation0 + $0x2f8] sm:$0xf]  ;;  %v1938_v42 = vpop.permute.xlu1 %1937  }
 0x1a5   :  { %1811 = vst.msk [vmem:[#allocation0 + $0xc2] ss:$8 sm:$0xf] %vm579_vm0, %v1808_v55  }
 0x1a6   :  { %1813 = vst.msk [vmem:[#allocation0 + $0xc2] ss:$8 sm:$0xf0] %vm579_vm0, %v1808_v55  }
 0x1a7   :  { %4188 = vst [vmem:[%s6362_s1 + $0x160] sm:$0xf] %v2759_v3 }
 0x1a8   :  { %4189 = vst [vmem:[%s6362_s1 + $0x164] sm:$0xf] %v2765_v18 }
 0x1a9   :  { %4190 = vst [vmem:[%s6362_s1 + $0x168] sm:$0xf] %v2771_v50 }
 0x1aa   :  { %4191 = vst [vmem:[%s6362_s1 + $0x16c] sm:$0xf] %v2777_v31  ;;  %v5712_v31 = vpop.permute.xlu2 %2067  }
 0x1ab   :  { %4192 = vst [vmem:[%s6362_s1 + $0x170] sm:$0xf] %v2783_v26 }
 0x1ac   :  { %4193 = vst [vmem:[%s6362_s1 + $0x174] sm:$0xf] %v2789_v27  ;;  %v2375_v32 = vld [vmem:[#allocation0 + $0xc0] sm:$0xf]  ;;  %v2381_v57 = vld [vmem:[#allocation0 + $0xc8] sm:$0xf] }
 0x1ad   :  { %4194 = vst [vmem:[%s6362_s1 + $0x178] sm:$0xf] %v2795_v28  ;;  %v2387_v15 = vld [vmem:[#allocation0 + $0xd0] sm:$0xf]  ;;  %v2393_v60 = vld [vmem:[#allocation0 + $0xd8] sm:$0xf] }
 0x1ae   :  { %4195 = vst [vmem:[%s6362_s1 + $0x17c] sm:$0xf] %v2801_v22  ;;  %v2399_v45 = vld [vmem:[#allocation0 + $0xe0] sm:$0xf]  ;;  %v2405_v0 = vld [vmem:[#allocation0 + $0xe8] sm:$0xf] }
 0x1af   :  { %1824 = vst.msk [vmem:[#allocation0 + $0x102] ss:$8 sm:$0xf] %vm579_vm0, %v5451_v2   ;;  %v2411_v40 = vld [vmem:[#allocation0 + $0xf0] sm:$0xf] }
 0x1b0   :  { %1826 = vst.msk [vmem:[#allocation0 + $0x102] ss:$8 sm:$0xf0] %vm579_vm0, %v5451_v2   ;;  %v2417_v29 = vld [vmem:[#allocation0 + $0xf8] sm:$0xf] }
 0x1b1   :  { %4124 = vst [vmem:[%s6362_s1 + $0x60] sm:$0xf] %v2375_v32 }
 0x1b2   :  { %4125 = vst [vmem:[%s6362_s1 + $0x64] sm:$0xf] %v2381_v57 }
 0x1b3   :  { %4126 = vst [vmem:[%s6362_s1 + $0x68] sm:$0xf] %v2387_v15 }
 0x1b4   :  { %4127 = vst [vmem:[%s6362_s1 + $0x6c] sm:$0xf] %v2393_v60 }
 0x1b5   :  { %4128 = vst [vmem:[%s6362_s1 + $0x70] sm:$0xf] %v2399_v45 }
 0x1b6   :  { %4129 = vst [vmem:[%s6362_s1 + $0x74] sm:$0xf] %v2405_v0  ;;  %v2423_v25 = vld [vmem:[#allocation0 + $0x100] sm:$0xf]  ;;  %v2429_v35 = vld [vmem:[#allocation0 + $0x108] sm:$0xf] }
 0x1b7   :  { %4130 = vst [vmem:[%s6362_s1 + $0x78] sm:$0xf] %v2411_v40  ;;  %v2435_v37 = vld [vmem:[#allocation0 + $0x110] sm:$0xf]  ;;  %v2441_v38 = vld [vmem:[#allocation0 + $0x118] sm:$0xf] }
 0x1b8   :  { %4131 = vst [vmem:[%s6362_s1 + $0x7c] sm:$0xf] %v2417_v29  ;;  %v2447_v43 = vld [vmem:[#allocation0 + $0x120] sm:$0xf]  ;;  %v2453_v30 = vld [vmem:[#allocation0 + $0x128] sm:$0xf] }
 0x1b9   :  { %4132 = vst [vmem:[%s6362_s1 + $0x80] sm:$0xf] %v2423_v25  ;;  %v2459_v51 = vld [vmem:[#allocation0 + $0x130] sm:$0xf]  ;;  %v2465_v63 = vld [vmem:[#allocation0 + $0x138] sm:$0xf] }
 0x1ba   :  { %1954 = vst.msk [vmem:[#allocation0 + $0x382] ss:$8 sm:$0xf] %vm579_vm0, %v5465_v8  }
 0x1bb   :  { %1956 = vst.msk [vmem:[#allocation0 + $0x382] ss:$8 sm:$0xf0] %vm579_vm0, %v5465_v8  }
 0x1bc   :  { %4133 = vst [vmem:[%s6362_s1 + $0x84] sm:$0xf] %v2429_v35 }
 0x1bd   :  { %4134 = vst [vmem:[%s6362_s1 + $0x88] sm:$0xf] %v2435_v37  ;;  %v1964_v37 = vpop.permute.xlu0 %1963  }
 0x1be   :  { %4135 = vst [vmem:[%s6362_s1 + $0x8c] sm:$0xf] %v2441_v38 }
 0x1bf   :  { %4136 = vst [vmem:[%s6362_s1 + $0x90] sm:$0xf] %v2447_v43 }
 0x1c0   :  { %4137 = vst [vmem:[%s6362_s1 + $0x94] sm:$0xf] %v2453_v30 }
 0x1c1   :  { %4138 = vst [vmem:[%s6362_s1 + $0x98] sm:$0xf] %v2459_v51  ;;  %v2903_v41 = vld [vmem:[#allocation0 + $0x380] sm:$0xf]  ;;  %v2909_v44 = vld [vmem:[#allocation0 + $0x388] sm:$0xf] }
 0x1c2   :  { %4139 = vst [vmem:[%s6362_s1 + $0x9c] sm:$0xf] %v2465_v63  ;;  %v2915_v46 = vld [vmem:[#allocation0 + $0x390] sm:$0xf]  ;;  %v2921_v39 = vld [vmem:[#allocation0 + $0x398] sm:$0xf] }
 0x1c3   :  { %1850 = vst.msk [vmem:[#allocation0 + $0x182] ss:$8 sm:$0xf] %vm579_vm0, %v1847_v20   ;;  %v2927_v21 = vld [vmem:[#allocation0 + $0x3a0] sm:$0xf] }
 0x1c4   :  { %1852 = vst.msk [vmem:[#allocation0 + $0x182] ss:$8 sm:$0xf0] %vm579_vm0, %v1847_v20   ;;  %v2933_v62 = vld [vmem:[#allocation0 + $0x3a8] sm:$0xf] }
 0x1c5   :  { %4212 = vst [vmem:[%s6362_s1 + $0x1c0] sm:$0xf] %v2903_v41  ;;  %v2939_v24 = vld [vmem:[#allocation0 + $0x3b0] sm:$0xf]  ;;  %v2945_v2 = vld [vmem:[#allocation0 + $0x3b8] sm:$0xf] }
 0x1c6   :  { %4213 = vst [vmem:[%s6362_s1 + $0x1c4] sm:$0xf] %v2909_v44 }
 0x1c7   :  { %4214 = vst [vmem:[%s6362_s1 + $0x1c8] sm:$0xf] %v2915_v46 }
 0x1c8   :  { %4215 = vst [vmem:[%s6362_s1 + $0x1cc] sm:$0xf] %v2921_v39 }
 0x1c9   :  { %4216 = vst [vmem:[%s6362_s1 + $0x1d0] sm:$0xf] %v2927_v21  ;;  %v1977_v21 = vpop.permute.xlu1 %1976  }
 0x1ca   :  { %v2519_v52 = vld [vmem:[#allocation0 + $0x180] sm:$0xf]  ;;  %v2525_v54 = vld [vmem:[#allocation0 + $0x188] sm:$0xf]  ;;  %v2531_v48 = vld [vmem:[#allocation0 + $0x190] sm:$0xf] }
 0x1cb   :  { %4148 = vst [vmem:[%s6362_s1 + $0xc0] sm:$0xf] %v2519_v52  ;;  %v2537_v9 = vld [vmem:[#allocation0 + $0x198] sm:$0xf]  ;;  %v2543_v55 = vld [vmem:[#allocation0 + $0x1a0] sm:$0xf] }
 0x1cc   :  { %4149 = vst [vmem:[%s6362_s1 + $0xc4] sm:$0xf] %v2525_v54  ;;  %v2549_v12 = vld [vmem:[#allocation0 + $0x1a8] sm:$0xf]  ;;  %v2555_v56 = vld [vmem:[#allocation0 + $0x1b0] sm:$0xf] }
 0x1cd   :  { %4150 = vst [vmem:[%s6362_s1 + $0xc8] sm:$0xf] %v2531_v48  ;;  %v2561_v58 = vld [vmem:[#allocation0 + $0x1b8] sm:$0xf] }
 0x1ce   :  { %4151 = vst [vmem:[%s6362_s1 + $0xcc] sm:$0xf] %v2537_v9 }
 0x1cf   :  { %4152 = vst [vmem:[%s6362_s1 + $0xd0] sm:$0xf] %v2543_v55 }
 0x1d0   :  { %4153 = vst [vmem:[%s6362_s1 + $0xd4] sm:$0xf] %v2549_v12 }
 0x1d1   :  { %4154 = vst [vmem:[%s6362_s1 + $0xd8] sm:$0xf] %v2555_v56 }
 0x1d2   :  { %4155 = vst [vmem:[%s6362_s1 + $0xdc] sm:$0xf] %v2561_v58 }
 0x1d3   :  { %4217 = vst [vmem:[%s6362_s1 + $0x1d4] sm:$0xf] %v2933_v62 }
 0x1d4   :  { %4218 = vst [vmem:[%s6362_s1 + $0x1d8] sm:$0xf] %v2939_v24 }
 0x1d5   :  { %4219 = vst [vmem:[%s6362_s1 + $0x1dc] sm:$0xf] %v2945_v2 }
 0x1d6   :  { %1863 = vst.msk [vmem:[#allocation0 + $0x1c2] ss:$8 sm:$0xf] %vm579_vm0, %v1860_v33  }
 0x1d7   :  { %1865 = vst.msk [vmem:[#allocation0 + $0x1c2] ss:$8 sm:$0xf0] %vm579_vm0, %v1860_v33  }
 0x1d8   :  { %1993 = vst.msk [vmem:[#allocation0 + $0x442] ss:$8 sm:$0xf] %vm579_vm0, %v1990_v11  }
 0x1d9   :  { %1995 = vst.msk [vmem:[#allocation0 + $0x442] ss:$8 sm:$0xf0] %vm579_vm0, %v1990_v11  }
 0x1da   :  { %1889 = vst.msk [vmem:[#allocation0 + $0x242] ss:$8 sm:$0xf] %vm579_vm0, %v1886_v49  }
 0x1db   :  { %1891 = vst.msk [vmem:[#allocation0 + $0x242] ss:$8 sm:$0xf0] %vm579_vm0, %v1886_v49  }
 0x1dc   :  { %1902 = vst.msk [vmem:[#allocation0 + $0x282] ss:$8 sm:$0xf] %vm579_vm0, %v1899_v53  }
 0x1dd   :  { %v2567_v5 = vld [vmem:[#allocation0 + $0x1c0] sm:$0xf]  ;;  %v2573_v61 = vld [vmem:[#allocation0 + $0x1c8] sm:$0xf]  ;;  %v2579_v6 = vld [vmem:[#allocation0 + $0x1d0] sm:$0xf] }
 0x1de   :  { %4156 = vst [vmem:[%s6362_s1 + $0xe0] sm:$0xf] %v2567_v5  ;;  %v2585_v7 = vld [vmem:[#allocation0 + $0x1d8] sm:$0xf]  ;;  %v2591_v8 = vld [vmem:[#allocation0 + $0x1e0] sm:$0xf] }
 0x1df   :  { %4157 = vst [vmem:[%s6362_s1 + $0xe4] sm:$0xf] %v2573_v61  ;;  %v2597_v13 = vld [vmem:[#allocation0 + $0x1e8] sm:$0xf]  ;;  %v2603_v1 = vld [vmem:[#allocation0 + $0x1f0] sm:$0xf] }
 0x1e0   :  { %4158 = vst [vmem:[%s6362_s1 + $0xe8] sm:$0xf] %v2579_v6  ;;  %v2609_v16 = vld [vmem:[#allocation0 + $0x1f8] sm:$0xf]  ;;  %v3047_v36 = vld [vmem:[#allocation0 + $0x440] sm:$0xf] }
 0x1e1   :  { %4159 = vst [vmem:[%s6362_s1 + $0xec] sm:$0xf] %v2585_v7  ;;  %v3053_v14 = vld [vmem:[#allocation0 + $0x448] sm:$0xf]  ;;  %v3059_v17 = vld [vmem:[#allocation0 + $0x450] sm:$0xf] }
 0x1e2   :  { %4160 = vst [vmem:[%s6362_s1 + $0xf0] sm:$0xf] %v2591_v8  ;;  %v3065_v23 = vld [vmem:[#allocation0 + $0x458] sm:$0xf]  ;;  %v3071_v47 = vld [vmem:[#allocation0 + $0x460] sm:$0xf] }
 0x1e3   :  { %4161 = vst [vmem:[%s6362_s1 + $0xf4] sm:$0xf] %v2597_v13  ;;  %v3077_v4 = vld [vmem:[#allocation0 + $0x468] sm:$0xf]  ;;  %v3083_v59 = vld [vmem:[#allocation0 + $0x470] sm:$0xf] }
 0x1e4   :  { %4162 = vst [vmem:[%s6362_s1 + $0xf8] sm:$0xf] %v2603_v1  ;;  %v3089_v19 = vld [vmem:[#allocation0 + $0x478] sm:$0xf]  ;;  %v2663_v3 = vld [vmem:[#allocation0 + $0x240] sm:$0xf] }
 0x1e5   :  { %4163 = vst [vmem:[%s6362_s1 + $0xfc] sm:$0xf] %v2609_v16  ;;  %v2669_v18 = vld [vmem:[#allocation0 + $0x248] sm:$0xf]  ;;  %v2675_v50 = vld [vmem:[#allocation0 + $0x250] sm:$0xf]  ;;  %v2003_v16 = vpop.permute.xlu0 %2002  }
 0x1e6   :  { %4236 = vst [vmem:[%s6362_s1 + $0x220] sm:$0xf] %v3047_v36  ;;  %v2681_v20 = vld [vmem:[#allocation0 + $0x258] sm:$0xf]  ;;  %v2687_v26 = vld [vmem:[#allocation0 + $0x260] sm:$0xf] }
 0x1e7   :  { %4237 = vst [vmem:[%s6362_s1 + $0x224] sm:$0xf] %v3053_v14  ;;  %v2693_v27 = vld [vmem:[#allocation0 + $0x268] sm:$0xf]  ;;  %v2699_v28 = vld [vmem:[#allocation0 + $0x270] sm:$0xf]  ;;  %v5873_v14 = vpop.permute.xlu1 %2015  }
 0x1e8   :  { %4238 = vst [vmem:[%s6362_s1 + $0x228] sm:$0xf] %v3059_v17  ;;  %v2705_v22 = vld [vmem:[#allocation0 + $0x278] sm:$0xf]  ;;  %v2711_v32 = vld [vmem:[#allocation0 + $0x280] sm:$0xf] }
 0x1e9   :  { %4239 = vst [vmem:[%s6362_s1 + $0x22c] sm:$0xf] %v3065_v23  ;;  %v2717_v57 = vld [vmem:[#allocation0 + $0x288] sm:$0xf]  ;;  %v2723_v15 = vld [vmem:[#allocation0 + $0x290] sm:$0xf] }
 0x1ea   :  { %4240 = vst [vmem:[%s6362_s1 + $0x230] sm:$0xf] %v3071_v47  ;;  %v2729_v60 = vld [vmem:[#allocation0 + $0x298] sm:$0xf] }
 0x1eb   :  { %4241 = vst [vmem:[%s6362_s1 + $0x234] sm:$0xf] %v3077_v4 }
 0x1ec   :  { %4242 = vst [vmem:[%s6362_s1 + $0x238] sm:$0xf] %v3083_v59 }
 0x1ed   :  { %4243 = vst [vmem:[%s6362_s1 + $0x23c] sm:$0xf] %v3089_v19 }
 0x1ee   :  { %1904 = vst.msk [vmem:[#allocation0 + $0x282] ss:$8 sm:$0xf0] %vm579_vm0, %v1899_v53   ;;  %v5822_v53 = vpop.permute.xlu2 %2106  }
 0x1ef   :  { %4172 = vst [vmem:[%s6362_s1 + $0x120] sm:$0xf] %v2663_v3 }
 0x1f0   :  { %4173 = vst [vmem:[%s6362_s1 + $0x124] sm:$0xf] %v2669_v18 }
 0x1f1   :  { %4174 = vst [vmem:[%s6362_s1 + $0x128] sm:$0xf] %v2675_v50 }
 0x1f2   :  { %4175 = vst [vmem:[%s6362_s1 + $0x12c] sm:$0xf] %v2681_v20 }
 0x1f3   :  { %4176 = vst [vmem:[%s6362_s1 + $0x130] sm:$0xf] %v2687_v26 }
 0x1f4   :  { %4177 = vst [vmem:[%s6362_s1 + $0x134] sm:$0xf] %v2693_v27 }
 0x1f5   :  { %4178 = vst [vmem:[%s6362_s1 + $0x138] sm:$0xf] %v2699_v28  ;;  %v2735_v45 = vld [vmem:[#allocation0 + $0x2a0] sm:$0xf]  ;;  %v2741_v0 = vld [vmem:[#allocation0 + $0x2a8] sm:$0xf] }
 0x1f6   :  { %4179 = vst [vmem:[%s6362_s1 + $0x13c] sm:$0xf] %v2705_v22  ;;  %v2747_v40 = vld [vmem:[#allocation0 + $0x2b0] sm:$0xf]  ;;  %v2753_v29 = vld [vmem:[#allocation0 + $0x2b8] sm:$0xf]  ;;  %v2146_v26 = vpop.permute.xlu2 %2145  }
 0x1f7   :  { %2032 = vst.msk [vmem:[#allocation0 + $0x502] ss:$8 sm:$0xf] %vm579_vm0, %v5628_v10  }
 0x1f8   :  { %2034 = vst.msk [vmem:[#allocation0 + $0x502] ss:$8 sm:$0xf0] %vm579_vm0, %v5628_v10  }
 0x1f9   :  { %4180 = vst [vmem:[%s6362_s1 + $0x140] sm:$0xf] %v2711_v32 }
 0x1fa   :  { %4181 = vst [vmem:[%s6362_s1 + $0x144] sm:$0xf] %v2717_v57 }
 0x1fb   :  { %4182 = vst [vmem:[%s6362_s1 + $0x148] sm:$0xf] %v2723_v15 }
 0x1fc   :  { %4183 = vst [vmem:[%s6362_s1 + $0x14c] sm:$0xf] %v2729_v60 }
 0x1fd   :  { %4184 = vst [vmem:[%s6362_s1 + $0x150] sm:$0xf] %v2735_v45 }
 0x1fe   :  { %4185 = vst [vmem:[%s6362_s1 + $0x154] sm:$0xf] %v2741_v0  ;;  %v3191_v33 = vld [vmem:[#allocation0 + $0x500] sm:$0xf]  ;;  %v3197_v25 = vld [vmem:[#allocation0 + $0x508] sm:$0xf] }
 0x1ff   :  { %4186 = vst [vmem:[%s6362_s1 + $0x158] sm:$0xf] %v2747_v40  ;;  %v3203_v35 = vld [vmem:[#allocation0 + $0x510] sm:$0xf]  ;;  %v3209_v38 = vld [vmem:[#allocation0 + $0x518] sm:$0xf]  ;;  %v2042_v40 = vpop.permute.xlu0 %2041  }
 0x200   :  { %4187 = vst [vmem:[%s6362_s1 + $0x15c] sm:$0xf] %v2753_v29  ;;  %v3215_v43 = vld [vmem:[#allocation0 + $0x520] sm:$0xf]  ;;  %v3221_v30 = vld [vmem:[#allocation0 + $0x528] sm:$0xf]  ;;  %v5955_v29 = vpop.permute.xlu1 %2054  }
 0x201   :  { %4260 = vst [vmem:[%s6362_s1 + $0x280] sm:$0xf] %v3191_v33  ;;  %v3227_v11 = vld [vmem:[#allocation0 + $0x530] sm:$0xf]  ;;  %v3233_v51 = vld [vmem:[#allocation0 + $0x538] sm:$0xf] }
 0x202   :  { %1928 = vst.msk [vmem:[#allocation0 + $0x302] ss:$8 sm:$0xf] %vm579_vm0, %v5670_v34  }
 0x203   :  { %1930 = vst.msk [vmem:[#allocation0 + $0x302] ss:$8 sm:$0xf0] %vm579_vm0, %v5670_v34  }
 0x204   :  { %4261 = vst [vmem:[%s6362_s1 + $0x284] sm:$0xf] %v3197_v25 }
 0x205   :  { %4262 = vst [vmem:[%s6362_s1 + $0x288] sm:$0xf] %v3203_v35 }
 0x206   :  { %4263 = vst [vmem:[%s6362_s1 + $0x28c] sm:$0xf] %v3209_v38 }
 0x207   :  { %4264 = vst [vmem:[%s6362_s1 + $0x290] sm:$0xf] %v3215_v43 }
 0x208   :  { %4265 = vst [vmem:[%s6362_s1 + $0x294] sm:$0xf] %v3221_v30 }
 0x209   :  { %4266 = vst [vmem:[%s6362_s1 + $0x298] sm:$0xf] %v3227_v11  ;;  %v2807_v63 = vld [vmem:[#allocation0 + $0x300] sm:$0xf]  ;;  %v2813_v41 = vld [vmem:[#allocation0 + $0x308] sm:$0xf] }
 0x20a   :  { %4267 = vst [vmem:[%s6362_s1 + $0x29c] sm:$0xf] %v3233_v51  ;;  %v2819_v44 = vld [vmem:[#allocation0 + $0x310] sm:$0xf]  ;;  %v2825_v46 = vld [vmem:[#allocation0 + $0x318] sm:$0xf]  ;;  %v5986_v51 = vpop.permute.xlu2 %2184  }
 0x20b   :  { %1941 = vst.msk [vmem:[#allocation0 + $0x342] ss:$8 sm:$0xf] %vm579_vm0, %v1938_v42   ;;  %v2831_v39 = vld [vmem:[#allocation0 + $0x320] sm:$0xf] }
 0x20c   :  { %1943 = vst.msk [vmem:[#allocation0 + $0x342] ss:$8 sm:$0xf0] %vm579_vm0, %v1938_v42   ;;  %v2837_v49 = vld [vmem:[#allocation0 + $0x328] sm:$0xf] }
 0x20d   :  { %4196 = vst [vmem:[%s6362_s1 + $0x180] sm:$0xf] %v2807_v63  ;;  %v2843_v52 = vld [vmem:[#allocation0 + $0x330] sm:$0xf]  ;;  %v2849_v54 = vld [vmem:[#allocation0 + $0x338] sm:$0xf] }
 0x20e   :  { %4197 = vst [vmem:[%s6362_s1 + $0x184] sm:$0xf] %v2813_v41 }
 0x20f   :  { %4198 = vst [vmem:[%s6362_s1 + $0x188] sm:$0xf] %v2819_v44 }
 0x210   :  { %4199 = vst [vmem:[%s6362_s1 + $0x18c] sm:$0xf] %v2825_v46 }
 0x211   :  { %4200 = vst [vmem:[%s6362_s1 + $0x190] sm:$0xf] %v2831_v39 }
 0x212   :  { %4201 = vst [vmem:[%s6362_s1 + $0x194] sm:$0xf] %v2837_v49  ;;  %v2855_v48 = vld [vmem:[#allocation0 + $0x340] sm:$0xf]  ;;  %v2861_v9 = vld [vmem:[#allocation0 + $0x348] sm:$0xf] }
 0x213   :  { %4202 = vst [vmem:[%s6362_s1 + $0x198] sm:$0xf] %v2843_v52  ;;  %v2867_v55 = vld [vmem:[#allocation0 + $0x350] sm:$0xf]  ;;  %v2873_v12 = vld [vmem:[#allocation0 + $0x358] sm:$0xf] }
 0x214   :  { %4203 = vst [vmem:[%s6362_s1 + $0x19c] sm:$0xf] %v2849_v54  ;;  %v2879_v56 = vld [vmem:[#allocation0 + $0x360] sm:$0xf]  ;;  %v2885_v10 = vld [vmem:[#allocation0 + $0x368] sm:$0xf] }
 0x215   :  { %4204 = vst [vmem:[%s6362_s1 + $0x1a0] sm:$0xf] %v2855_v48  ;;  %v2891_v58 = vld [vmem:[#allocation0 + $0x370] sm:$0xf]  ;;  %v2897_v62 = vld [vmem:[#allocation0 + $0x378] sm:$0xf] }
 0x216   :  { %2071 = vst.msk [vmem:[#allocation0 + $0x5c2] ss:$8 sm:$0xf] %vm579_vm0, %v5712_v31  }
 0x217   :  { %2073 = vst.msk [vmem:[#allocation0 + $0x5c2] ss:$8 sm:$0xf0] %vm579_vm0, %v5712_v31  }
 0x218   :  { %4205 = vst [vmem:[%s6362_s1 + $0x1a4] sm:$0xf] %v2861_v9 }
 0x219   :  { %4206 = vst [vmem:[%s6362_s1 + $0x1a8] sm:$0xf] %v2867_v55 }
 0x21a   :  { %4207 = vst [vmem:[%s6362_s1 + $0x1ac] sm:$0xf] %v2873_v12 }
 0x21b   :  { %4208 = vst [vmem:[%s6362_s1 + $0x1b0] sm:$0xf] %v2879_v56 }
 0x21c   :  { %4209 = vst [vmem:[%s6362_s1 + $0x1b4] sm:$0xf] %v2885_v10  ;;  %v2081_v10 = vpop.permute.xlu0 %2080  }
 0x21d   :  { %4210 = vst [vmem:[%s6362_s1 + $0x1b8] sm:$0xf] %v2891_v58  ;;  %v3335_v24 = vld [vmem:[#allocation0 + $0x5c0] sm:$0xf]  ;;  %v3341_v2 = vld [vmem:[#allocation0 + $0x5c8] sm:$0xf] }
 0x21e   :  { %4211 = vst [vmem:[%s6362_s1 + $0x1bc] sm:$0xf] %v2897_v62  ;;  %v3347_v5 = vld [vmem:[#allocation0 + $0x5d0] sm:$0xf]  ;;  %v3353_v61 = vld [vmem:[#allocation0 + $0x5d8] sm:$0xf] }
 0x21f   :  { %1967 = vst.msk [vmem:[#allocation0 + $0x3c2] ss:$8 sm:$0xf] %vm579_vm0, %v1964_v37   ;;  %v3359_v6 = vld [vmem:[#allocation0 + $0x5e0] sm:$0xf] }
 0x220   :  { %1969 = vst.msk [vmem:[#allocation0 + $0x3c2] ss:$8 sm:$0xf0] %vm579_vm0, %v1964_v37   ;;  %v3365_v34 = vld [vmem:[#allocation0 + $0x5e8] sm:$0xf] }
 0x221   :  { %4284 = vst [vmem:[%s6362_s1 + $0x2e0] sm:$0xf] %v3335_v24  ;;  %v3371_v36 = vld [vmem:[#allocation0 + $0x5f0] sm:$0xf]  ;;  %v3377_v17 = vld [vmem:[#allocation0 + $0x5f8] sm:$0xf] }
 0x222   :  { %4285 = vst [vmem:[%s6362_s1 + $0x2e4] sm:$0xf] %v3341_v2 }
 0x223   :  { %4286 = vst [vmem:[%s6362_s1 + $0x2e8] sm:$0xf] %v3347_v5 }
 0x224   :  { %4287 = vst [vmem:[%s6362_s1 + $0x2ec] sm:$0xf] %v3353_v61 }
 0x225   :  { %4288 = vst [vmem:[%s6362_s1 + $0x2f0] sm:$0xf] %v3359_v6 }
 0x226   :  { %4289 = vst [vmem:[%s6362_s1 + $0x2f4] sm:$0xf] %v3365_v34  ;;  %v2951_v23 = vld [vmem:[#allocation0 + $0x3c0] sm:$0xf]  ;;  %v2957_v47 = vld [vmem:[#allocation0 + $0x3c8] sm:$0xf] }
 0x227   :  { %v2975_v7 = vld [vmem:[#allocation0 + $0x3e0] sm:$0xf]  ;;  %v2981_v8 = vld [vmem:[#allocation0 + $0x3e8] sm:$0xf]  ;;  %v2987_v13 = vld [vmem:[#allocation0 + $0x3f0] sm:$0xf] }
 0x228   :  { %4224 = vst [vmem:[%s6362_s1 + $0x1f0] sm:$0xf] %v2975_v7  ;;  %v2993_v1 = vld [vmem:[#allocation0 + $0x3f8] sm:$0xf]  ;;  %v2963_v4 = vld [vmem:[#allocation0 + $0x3d0] sm:$0xf] }
 0x229   :  { %4225 = vst [vmem:[%s6362_s1 + $0x1f4] sm:$0xf] %v2981_v8  ;;  %v2969_v59 = vld [vmem:[#allocation0 + $0x3d8] sm:$0xf]  ;;  %v2094_v8 = vpop.permute.xlu1 %2093  }
 0x22a   :  { %4226 = vst [vmem:[%s6362_s1 + $0x1f8] sm:$0xf] %v2987_v13 }
 0x22b   :  { %4227 = vst [vmem:[%s6362_s1 + $0x1fc] sm:$0xf] %v2993_v1 }
 0x22c   :  { %4290 = vst [vmem:[%s6362_s1 + $0x2f8] sm:$0xf] %v3371_v36 }
 0x22d   :  { %4291 = vst [vmem:[%s6362_s1 + $0x2fc] sm:$0xf] %v3377_v17 }
 0x22e   :  { %1980 = vst.msk [vmem:[#allocation0 + $0x402] ss:$8 sm:$0xf] %vm579_vm0, %v1977_v21  }
 0x22f   :  { %1982 = vst.msk [vmem:[#allocation0 + $0x402] ss:$8 sm:$0xf0] %vm579_vm0, %v1977_v21  }
 0x230   :  { %4220 = vst [vmem:[%s6362_s1 + $0x1e0] sm:$0xf] %v2951_v23 }
 0x231   :  { %4221 = vst [vmem:[%s6362_s1 + $0x1e4] sm:$0xf] %v2957_v47 }
 0x232   :  { %4222 = vst [vmem:[%s6362_s1 + $0x1e8] sm:$0xf] %v2963_v4 }
 0x233   :  { %4223 = vst [vmem:[%s6362_s1 + $0x1ec] sm:$0xf] %v2969_v59 }
 0x234   :  { %2110 = vst.msk [vmem:[#allocation0 + $0x682] ss:$8 sm:$0xf] %vm579_vm0, %v5822_v53  }
 0x235   :  { %v2999_v19 = vld [vmem:[#allocation0 + $0x400] sm:$0xf]  ;;  %v3005_v42 = vld [vmem:[#allocation0 + $0x408] sm:$0xf]  ;;  %v3011_v3 = vld [vmem:[#allocation0 + $0x410] sm:$0xf] }
 0x236   :  { %4228 = vst [vmem:[%s6362_s1 + $0x200] sm:$0xf] %v2999_v19  ;;  %v3017_v18 = vld [vmem:[#allocation0 + $0x418] sm:$0xf]  ;;  %v3023_v50 = vld [vmem:[#allocation0 + $0x420] sm:$0xf] }
 0x237   :  { %4229 = vst [vmem:[%s6362_s1 + $0x204] sm:$0xf] %v3005_v42  ;;  %v3029_v20 = vld [vmem:[#allocation0 + $0x428] sm:$0xf]  ;;  %v3035_v31 = vld [vmem:[#allocation0 + $0x430] sm:$0xf] }
 0x238   :  { %4230 = vst [vmem:[%s6362_s1 + $0x208] sm:$0xf] %v3011_v3  ;;  %v3041_v27 = vld [vmem:[#allocation0 + $0x438] sm:$0xf] }
 0x239   :  { %4231 = vst [vmem:[%s6362_s1 + $0x20c] sm:$0xf] %v3017_v18 }
 0x23a   :  { %4232 = vst [vmem:[%s6362_s1 + $0x210] sm:$0xf] %v3023_v50 }
 0x23b   :  { %4233 = vst [vmem:[%s6362_s1 + $0x214] sm:$0xf] %v3029_v20  ;;  %v3479_v28 = vld [vmem:[#allocation0 + $0x680] sm:$0xf]  ;;  %v3485_v22 = vld [vmem:[#allocation0 + $0x688] sm:$0xf] }
 0x23c   :  { %4234 = vst [vmem:[%s6362_s1 + $0x218] sm:$0xf] %v3035_v31  ;;  %v3491_v32 = vld [vmem:[#allocation0 + $0x690] sm:$0xf]  ;;  %v3497_v57 = vld [vmem:[#allocation0 + $0x698] sm:$0xf] }
 0x23d   :  { %4235 = vst [vmem:[%s6362_s1 + $0x21c] sm:$0xf] %v3041_v27  ;;  %v6122_v27 = vpop.permute.xlu1 %2132  }
 0x23e   :  { %2112 = vst.msk [vmem:[#allocation0 + $0x682] ss:$8 sm:$0xf0] %vm579_vm0, %v5822_v53  }
 0x23f   :  { %4308 = vst [vmem:[%s6362_s1 + $0x340] sm:$0xf] %v3479_v28 }
 0x240   :  { %4309 = vst [vmem:[%s6362_s1 + $0x344] sm:$0xf] %v3485_v22 }
 0x241   :  { %4310 = vst [vmem:[%s6362_s1 + $0x348] sm:$0xf] %v3491_v32 }
 0x242   :  { %4311 = vst [vmem:[%s6362_s1 + $0x34c] sm:$0xf] %v3497_v57 }
 0x243   :  { %2006 = vst.msk [vmem:[#allocation0 + $0x482] ss:$8 sm:$0xf] %vm579_vm0, %v2003_v16  }
 0x244   :  { %2008 = vst.msk [vmem:[#allocation0 + $0x482] ss:$8 sm:$0xf0] %vm579_vm0, %v2003_v16  }
 0x245   :  { %v3503_v15 = vld [vmem:[#allocation0 + $0x6a0] sm:$0xf]  ;;  %v3509_v60 = vld [vmem:[#allocation0 + $0x6a8] sm:$0xf]  ;;  %v3515_v45 = vld [vmem:[#allocation0 + $0x6b0] sm:$0xf] }
 0x246   :  { %4312 = vst [vmem:[%s6362_s1 + $0x350] sm:$0xf] %v3503_v15  ;;  %v3521_v0 = vld [vmem:[#allocation0 + $0x6b8] sm:$0xf] }
 0x247   :  { %4313 = vst [vmem:[%s6362_s1 + $0x354] sm:$0xf] %v3509_v60 }
 0x248   :  { %4314 = vst [vmem:[%s6362_s1 + $0x358] sm:$0xf] %v3515_v45 }
 0x249   :  { %4315 = vst [vmem:[%s6362_s1 + $0x35c] sm:$0xf] %v3521_v0 }
 0x24a   :  { %v3095_v33 = vld [vmem:[#allocation0 + $0x480] sm:$0xf]  ;;  %v3101_v25 = vld [vmem:[#allocation0 + $0x488] sm:$0xf]  ;;  %v3107_v35 = vld [vmem:[#allocation0 + $0x490] sm:$0xf] }
 0x24b   :  { %4244 = vst [vmem:[%s6362_s1 + $0x240] sm:$0xf] %v3095_v33  ;;  %v3113_v37 = vld [vmem:[#allocation0 + $0x498] sm:$0xf]  ;;  %v3119_v38 = vld [vmem:[#allocation0 + $0x4a0] sm:$0xf] }
 0x24c   :  { %4245 = vst [vmem:[%s6362_s1 + $0x244] sm:$0xf] %v3101_v25  ;;  %v3125_v43 = vld [vmem:[#allocation0 + $0x4a8] sm:$0xf]  ;;  %v3131_v30 = vld [vmem:[#allocation0 + $0x4b0] sm:$0xf] }
 0x24d   :  { %4246 = vst [vmem:[%s6362_s1 + $0x248] sm:$0xf] %v3107_v35  ;;  %v3137_v11 = vld [vmem:[#allocation0 + $0x4b8] sm:$0xf] }
 0x24e   :  { %4247 = vst [vmem:[%s6362_s1 + $0x24c] sm:$0xf] %v3113_v37 }
 0x24f   :  { %4248 = vst [vmem:[%s6362_s1 + $0x250] sm:$0xf] %v3119_v38 }
 0x250   :  { %4249 = vst [vmem:[%s6362_s1 + $0x254] sm:$0xf] %v3125_v43 }
 0x251   :  { %4250 = vst [vmem:[%s6362_s1 + $0x258] sm:$0xf] %v3131_v30 }
 0x252   :  { %4251 = vst [vmem:[%s6362_s1 + $0x25c] sm:$0xf] %v3137_v11 }
 0x253   :  { %2019 = vst.msk [vmem:[#allocation0 + $0x4c2] ss:$8 sm:$0xf] %vm579_vm0, %v5873_v14  }
 0x254   :  { %2021 = vst.msk [vmem:[#allocation0 + $0x4c2] ss:$8 sm:$0xf0] %vm579_vm0, %v5873_v14   ;;  %v2224_v14 = vpop.permute.xlu2 %2223  }
 0x255   :  { %2149 = vst.msk [vmem:[#allocation0 + $0x742] ss:$8 sm:$0xf] %vm579_vm0, %v2146_v26  }
 0x256   :  { %2151 = vst.msk [vmem:[#allocation0 + $0x742] ss:$8 sm:$0xf0] %vm579_vm0, %v2146_v26   ;;  %v2120_v26 = vpop.permute.xlu0 %2119  }
 0x257   :  { %2045 = vst.msk [vmem:[#allocation0 + $0x542] ss:$8 sm:$0xf] %vm579_vm0, %v2042_v40  }
 0x258   :  { %2047 = vst.msk [vmem:[#allocation0 + $0x542] ss:$8 sm:$0xf0] %vm579_vm0, %v2042_v40  }
 0x259   :  { %2058 = vst.msk [vmem:[#allocation0 + $0x582] ss:$8 sm:$0xf] %vm579_vm0, %v5955_v29  }
 0x25a   :  { %v3143_v63 = vld [vmem:[#allocation0 + $0x4c0] sm:$0xf]  ;;  %v3149_v41 = vld [vmem:[#allocation0 + $0x4c8] sm:$0xf]  ;;  %v3155_v44 = vld [vmem:[#allocation0 + $0x4d0] sm:$0xf] }
 0x25b   :  { %4252 = vst [vmem:[%s6362_s1 + $0x260] sm:$0xf] %v3143_v63  ;;  %v3161_v46 = vld [vmem:[#allocation0 + $0x4d8] sm:$0xf]  ;;  %v3167_v39 = vld [vmem:[#allocation0 + $0x4e0] sm:$0xf] }
 0x25c   :  { %4253 = vst [vmem:[%s6362_s1 + $0x264] sm:$0xf] %v3149_v41  ;;  %v3173_v21 = vld [vmem:[#allocation0 + $0x4e8] sm:$0xf]  ;;  %v3179_v49 = vld [vmem:[#allocation0 + $0x4f0] sm:$0xf] }
 0x25d   :  { %4254 = vst [vmem:[%s6362_s1 + $0x268] sm:$0xf] %v3155_v44  ;;  %v3185_v52 = vld [vmem:[#allocation0 + $0x4f8] sm:$0xf]  ;;  %v3623_v54 = vld [vmem:[#allocation0 + $0x740] sm:$0xf] }
 0x25e   :  { %4255 = vst [vmem:[%s6362_s1 + $0x26c] sm:$0xf] %v3161_v46  ;;  %v3629_v48 = vld [vmem:[#allocation0 + $0x748] sm:$0xf]  ;;  %v3635_v9 = vld [vmem:[#allocation0 + $0x750] sm:$0xf]  ;;  %v2159_v43 = vpop.permute.xlu0 %2158  }
 0x25f   :  { %4256 = vst [vmem:[%s6362_s1 + $0x270] sm:$0xf] %v3167_v39  ;;  %v3641_v55 = vld [vmem:[#allocation0 + $0x758] sm:$0xf]  ;;  %v3647_v53 = vld [vmem:[#allocation0 + $0x760] sm:$0xf] }
 0x260   :  { %4257 = vst [vmem:[%s6362_s1 + $0x274] sm:$0xf] %v3173_v21  ;;  %v3653_v12 = vld [vmem:[#allocation0 + $0x768] sm:$0xf]  ;;  %v3659_v56 = vld [vmem:[#allocation0 + $0x770] sm:$0xf]  ;;  %v2172_v21 = vpop.permute.xlu1 %2171  }
 0x261   :  { %4258 = vst [vmem:[%s6362_s1 + $0x278] sm:$0xf] %v3179_v49  ;;  %v3665_v58 = vld [vmem:[#allocation0 + $0x778] sm:$0xf]  ;;  %v3239_v62 = vld [vmem:[#allocation0 + $0x540] sm:$0xf] }
 0x262   :  { %4259 = vst [vmem:[%s6362_s1 + $0x27c] sm:$0xf] %v3185_v52  ;;  %v3245_v24 = vld [vmem:[#allocation0 + $0x548] sm:$0xf]  ;;  %v3251_v2 = vld [vmem:[#allocation0 + $0x550] sm:$0xf] }
 0x263   :  { %4332 = vst [vmem:[%s6362_s1 + $0x3a0] sm:$0xf] %v3623_v54  ;;  %v3257_v5 = vld [vmem:[#allocation0 + $0x558] sm:$0xf]  ;;  %v3263_v61 = vld [vmem:[#allocation0 + $0x560] sm:$0xf] }
 0x264   :  { %4333 = vst [vmem:[%s6362_s1 + $0x3a4] sm:$0xf] %v3629_v48  ;;  %v3269_v6 = vld [vmem:[#allocation0 + $0x568] sm:$0xf]  ;;  %v3275_v7 = vld [vmem:[#allocation0 + $0x570] sm:$0xf] }
 0x265   :  { %4334 = vst [vmem:[%s6362_s1 + $0x3a8] sm:$0xf] %v3635_v9  ;;  %v3281_v13 = vld [vmem:[#allocation0 + $0x578] sm:$0xf]  ;;  %v3287_v1 = vld [vmem:[#allocation0 + $0x580] sm:$0xf] }
 0x266   :  { %4335 = vst [vmem:[%s6362_s1 + $0x3ac] sm:$0xf] %v3641_v55  ;;  %v3293_v34 = vld [vmem:[#allocation0 + $0x588] sm:$0xf]  ;;  %v3299_v16 = vld [vmem:[#allocation0 + $0x590] sm:$0xf] }
 0x267   :  { %4336 = vst [vmem:[%s6362_s1 + $0x3b0] sm:$0xf] %v3647_v53  ;;  %v3305_v36 = vld [vmem:[#allocation0 + $0x598] sm:$0xf] }
 0x268   :  { %4337 = vst [vmem:[%s6362_s1 + $0x3b4] sm:$0xf] %v3653_v12 }
 0x269   :  { %4338 = vst [vmem:[%s6362_s1 + $0x3b8] sm:$0xf] %v3659_v56 }
 0x26a   :  { %4339 = vst [vmem:[%s6362_s1 + $0x3bc] sm:$0xf] %v3665_v58  ;;  %v6229_v58 = vpop.permute.xlu1 %2210  }
 0x26b   :  { %4268 = vst [vmem:[%s6362_s1 + $0x2a0] sm:$0xf] %v3239_v62 }
 0x26c   :  { %4269 = vst [vmem:[%s6362_s1 + $0x2a4] sm:$0xf] %v3245_v24 }
 0x26d   :  { %4270 = vst [vmem:[%s6362_s1 + $0x2a8] sm:$0xf] %v3251_v2 }
 0x26e   :  { %4271 = vst [vmem:[%s6362_s1 + $0x2ac] sm:$0xf] %v3257_v5 }
 0x26f   :  { %4272 = vst [vmem:[%s6362_s1 + $0x2b0] sm:$0xf] %v3263_v61 }
 0x270   :  { %4273 = vst [vmem:[%s6362_s1 + $0x2b4] sm:$0xf] %v3269_v6 }
 0x271   :  { %4274 = vst [vmem:[%s6362_s1 + $0x2b8] sm:$0xf] %v3275_v7 }
 0x272   :  { %4275 = vst [vmem:[%s6362_s1 + $0x2bc] sm:$0xf] %v3281_v13 }
 0x273   :  { %2060 = vst.msk [vmem:[#allocation0 + $0x582] ss:$8 sm:$0xf0] %vm579_vm0, %v5955_v29  }
 0x274   :  { %4276 = vst [vmem:[%s6362_s1 + $0x2c0] sm:$0xf] %v3287_v1 }
 0x275   :  { %4277 = vst [vmem:[%s6362_s1 + $0x2c4] sm:$0xf] %v3293_v34 }
 0x276   :  { %4278 = vst [vmem:[%s6362_s1 + $0x2c8] sm:$0xf] %v3299_v16 }
 0x277   :  { %4279 = vst [vmem:[%s6362_s1 + $0x2cc] sm:$0xf] %v3305_v36 }
 0x278   :  { %2188 = vst.msk [vmem:[#allocation0 + $0x802] ss:$8 sm:$0xf] %vm579_vm0, %v5986_v51  }
 0x279   :  { %2190 = vst.msk [vmem:[#allocation0 + $0x802] ss:$8 sm:$0xf0] %vm579_vm0, %v5986_v51  }
 0x27a   :  { %v3311_v17 = vld [vmem:[#allocation0 + $0x5a0] sm:$0xf]  ;;  %v3317_v23 = vld [vmem:[#allocation0 + $0x5a8] sm:$0xf]  ;;  %v3323_v47 = vld [vmem:[#allocation0 + $0x5b0] sm:$0xf] }
 0x27b   :  { %4280 = vst [vmem:[%s6362_s1 + $0x2d0] sm:$0xf] %v3311_v17  ;;  %v3329_v4 = vld [vmem:[#allocation0 + $0x5b8] sm:$0xf] }
 0x27c   :  { %4281 = vst [vmem:[%s6362_s1 + $0x2d4] sm:$0xf] %v3317_v23 }
 0x27d   :  { %4282 = vst [vmem:[%s6362_s1 + $0x2d8] sm:$0xf] %v3323_v47 }
 0x27e   :  { %4283 = vst [vmem:[%s6362_s1 + $0x2dc] sm:$0xf] %v3329_v4 }
 0x27f   :  { %v3767_v59 = vld [vmem:[#allocation0 + $0x800] sm:$0xf]  ;;  %v3773_v19 = vld [vmem:[#allocation0 + $0x808] sm:$0xf]  ;;  %v3779_v42 = vld [vmem:[#allocation0 + $0x810] sm:$0xf] }
 0x280   :  { %4356 = vst [vmem:[%s6362_s1 + $0x400] sm:$0xf] %v3767_v59  ;;  %v3785_v3 = vld [vmem:[#allocation0 + $0x818] sm:$0xf]  ;;  %v3791_v18 = vld [vmem:[#allocation0 + $0x820] sm:$0xf] }
 0x281   :  { %4357 = vst [vmem:[%s6362_s1 + $0x404] sm:$0xf] %v3773_v19  ;;  %v3797_v50 = vld [vmem:[#allocation0 + $0x828] sm:$0xf]  ;;  %v3803_v20 = vld [vmem:[#allocation0 + $0x830] sm:$0xf] }
 0x282   :  { %4358 = vst [vmem:[%s6362_s1 + $0x408] sm:$0xf] %v3779_v42  ;;  %v3809_v31 = vld [vmem:[#allocation0 + $0x838] sm:$0xf] }
 0x283   :  { %4359 = vst [vmem:[%s6362_s1 + $0x40c] sm:$0xf] %v3785_v3 }
 0x284   :  { %4360 = vst [vmem:[%s6362_s1 + $0x410] sm:$0xf] %v3791_v18 }
 0x285   :  { %4361 = vst [vmem:[%s6362_s1 + $0x414] sm:$0xf] %v3797_v50 }
 0x286   :  { %4362 = vst [vmem:[%s6362_s1 + $0x418] sm:$0xf] %v3803_v20 }
 0x287   :  { %4363 = vst [vmem:[%s6362_s1 + $0x41c] sm:$0xf] %v3809_v31 }
 0x288   :  { %2084 = vst.msk [vmem:[#allocation0 + $0x602] ss:$8 sm:$0xf] %vm579_vm0, %v2081_v10  }
 0x289   :  { %2086 = vst.msk [vmem:[#allocation0 + $0x602] ss:$8 sm:$0xf0] %vm579_vm0, %v2081_v10   ;;  %v2198_v10 = vpop.permute.xlu0 %2197  }
 0x28a   :  { %2097 = vst.msk [vmem:[#allocation0 + $0x642] ss:$8 sm:$0xf] %vm579_vm0, %v2094_v8  }
 0x28b   :  { %2099 = vst.msk [vmem:[#allocation0 + $0x642] ss:$8 sm:$0xf0] %vm579_vm0, %v2094_v8  }
 0x28c   :  { %2227 = vst.msk [vmem:[#allocation0 + $0x8c2] ss:$8 sm:$0xf] %vm579_vm0, %v2224_v14  }
 0x28d   :  { %2229 = vst.msk [vmem:[#allocation0 + $0x8c2] ss:$8 sm:$0xf0] %vm579_vm0, %v2224_v14  }
 0x28e   :  { %2123 = vst.msk [vmem:[#allocation0 + $0x6c2] ss:$8 sm:$0xf] %vm579_vm0, %v2120_v26  }
 0x28f   :  { %v3383_v28 = vld [vmem:[#allocation0 + $0x600] sm:$0xf]  ;;  %v3389_v22 = vld [vmem:[#allocation0 + $0x608] sm:$0xf]  ;;  %v3395_v32 = vld [vmem:[#allocation0 + $0x610] sm:$0xf] }
 0x290   :  { %4292 = vst [vmem:[%s6362_s1 + $0x300] sm:$0xf] %v3383_v28  ;;  %v3401_v57 = vld [vmem:[#allocation0 + $0x618] sm:$0xf]  ;;  %v3407_v15 = vld [vmem:[#allocation0 + $0x620] sm:$0xf] }
 0x291   :  { %4293 = vst [vmem:[%s6362_s1 + $0x304] sm:$0xf] %v3389_v22  ;;  %v3413_v60 = vld [vmem:[#allocation0 + $0x628] sm:$0xf]  ;;  %v3419_v45 = vld [vmem:[#allocation0 + $0x630] sm:$0xf] }
 0x292   :  { %4294 = vst [vmem:[%s6362_s1 + $0x308] sm:$0xf] %v3395_v32  ;;  %v3425_v0 = vld [vmem:[#allocation0 + $0x638] sm:$0xf]  ;;  %v3431_v40 = vld [vmem:[#allocation0 + $0x640] sm:$0xf] }
 0x293   :  { %4295 = vst [vmem:[%s6362_s1 + $0x30c] sm:$0xf] %v3401_v57  ;;  %v3437_v29 = vld [vmem:[#allocation0 + $0x648] sm:$0xf]  ;;  %v3443_v33 = vld [vmem:[#allocation0 + $0x650] sm:$0xf] }
 0x294   :  { %4296 = vst [vmem:[%s6362_s1 + $0x310] sm:$0xf] %v3407_v15  ;;  %v3449_v25 = vld [vmem:[#allocation0 + $0x658] sm:$0xf]  ;;  %v3455_v35 = vld [vmem:[#allocation0 + $0x660] sm:$0xf] }
 0x295   :  { %4297 = vst [vmem:[%s6362_s1 + $0x314] sm:$0xf] %v3413_v60  ;;  %v3461_v37 = vld [vmem:[#allocation0 + $0x668] sm:$0xf]  ;;  %v3467_v38 = vld [vmem:[#allocation0 + $0x670] sm:$0xf] }
 0x296   :  { %4298 = vst [vmem:[%s6362_s1 + $0x318] sm:$0xf] %v3419_v45  ;;  %v3473_v30 = vld [vmem:[#allocation0 + $0x678] sm:$0xf]  ;;  %v3911_v11 = vld [vmem:[#allocation0 + $0x8c0] sm:$0xf] }
 0x297   :  { %4299 = vst [vmem:[%s6362_s1 + $0x31c] sm:$0xf] %v3425_v0  ;;  %v3917_v51 = vld [vmem:[#allocation0 + $0x8c8] sm:$0xf]  ;;  %v3923_v63 = vld [vmem:[#allocation0 + $0x8d0] sm:$0xf] }
 0x298   :  { %4300 = vst [vmem:[%s6362_s1 + $0x320] sm:$0xf] %v3431_v40  ;;  %v3929_v41 = vld [vmem:[#allocation0 + $0x8d8] sm:$0xf]  ;;  %v3935_v44 = vld [vmem:[#allocation0 + $0x8e0] sm:$0xf] }
 0x299   :  { %4301 = vst [vmem:[%s6362_s1 + $0x324] sm:$0xf] %v3437_v29  ;;  %v3941_v46 = vld [vmem:[#allocation0 + $0x8e8] sm:$0xf]  ;;  %v3947_v39 = vld [vmem:[#allocation0 + $0x8f0] sm:$0xf] }
 0x29a   :  { %4302 = vst [vmem:[%s6362_s1 + $0x328] sm:$0xf] %v3443_v33  ;;  %v3953_v49 = vld [vmem:[#allocation0 + $0x8f8] sm:$0xf]  ;;  %v3527_v52 = vld [vmem:[#allocation0 + $0x6c0] sm:$0xf] }
 0x29b   :  { %4303 = vst [vmem:[%s6362_s1 + $0x32c] sm:$0xf] %v3449_v25  ;;  %v3533_v54 = vld [vmem:[#allocation0 + $0x6c8] sm:$0xf]  ;;  %v3539_v48 = vld [vmem:[#allocation0 + $0x6d0] sm:$0xf] }
 0x29c   :  { %4304 = vst [vmem:[%s6362_s1 + $0x330] sm:$0xf] %v3455_v35  ;;  %v3545_v9 = vld [vmem:[#allocation0 + $0x6d8] sm:$0xf] }
 0x29d   :  { %4305 = vst [vmem:[%s6362_s1 + $0x334] sm:$0xf] %v3461_v37 }
 0x29e   :  { %4306 = vst [vmem:[%s6362_s1 + $0x338] sm:$0xf] %v3467_v38 }
 0x29f   :  { %4307 = vst [vmem:[%s6362_s1 + $0x33c] sm:$0xf] %v3473_v30 }
 0x2a0   :  { %4380 = vst [vmem:[%s6362_s1 + $0x460] sm:$0xf] %v3911_v11 }
 0x2a1   :  { %4381 = vst [vmem:[%s6362_s1 + $0x464] sm:$0xf] %v3917_v51 }
 0x2a2   :  { %4382 = vst [vmem:[%s6362_s1 + $0x468] sm:$0xf] %v3923_v63 }
 0x2a3   :  { %4383 = vst [vmem:[%s6362_s1 + $0x46c] sm:$0xf] %v3929_v41 }
 0x2a4   :  { %4384 = vst [vmem:[%s6362_s1 + $0x470] sm:$0xf] %v3935_v44 }
 0x2a5   :  { %4385 = vst [vmem:[%s6362_s1 + $0x474] sm:$0xf] %v3941_v46 }
 0x2a6   :  { %4386 = vst [vmem:[%s6362_s1 + $0x478] sm:$0xf] %v3947_v39 }
 0x2a7   :  { %4387 = vst [vmem:[%s6362_s1 + $0x47c] sm:$0xf] %v3953_v49 }
 0x2a8   :  { %2125 = vst.msk [vmem:[#allocation0 + $0x6c2] ss:$8 sm:$0xf0] %vm579_vm0, %v2120_v26  }
 0x2a9   :  { %4316 = vst [vmem:[%s6362_s1 + $0x360] sm:$0xf] %v3527_v52 }
 0x2aa   :  { %4317 = vst [vmem:[%s6362_s1 + $0x364] sm:$0xf] %v3533_v54 }
 0x2ab   :  { %4318 = vst [vmem:[%s6362_s1 + $0x368] sm:$0xf] %v3539_v48 }
 0x2ac   :  { %4319 = vst [vmem:[%s6362_s1 + $0x36c] sm:$0xf] %v3545_v9 }
 0x2ad   :  { %2136 = vst.msk [vmem:[#allocation0 + $0x702] ss:$8 sm:$0xf] %vm579_vm0, %v6122_v27  }
 0x2ae   :  { %2138 = vst.msk [vmem:[#allocation0 + $0x702] ss:$8 sm:$0xf0] %vm579_vm0, %v6122_v27  }
 0x2af   :  { %v3551_v55 = vld [vmem:[#allocation0 + $0x6e0] sm:$0xf]  ;;  %v3557_v53 = vld [vmem:[#allocation0 + $0x6e8] sm:$0xf]  ;;  %v3563_v12 = vld [vmem:[#allocation0 + $0x6f0] sm:$0xf] }
 0x2b0   :  { %4320 = vst [vmem:[%s6362_s1 + $0x370] sm:$0xf] %v3551_v55  ;;  %v3569_v56 = vld [vmem:[#allocation0 + $0x6f8] sm:$0xf] }
 0x2b1   :  { %4321 = vst [vmem:[%s6362_s1 + $0x374] sm:$0xf] %v3557_v53 }
 0x2b2   :  { %4322 = vst [vmem:[%s6362_s1 + $0x378] sm:$0xf] %v3563_v12 }
 0x2b3   :  { %4323 = vst [vmem:[%s6362_s1 + $0x37c] sm:$0xf] %v3569_v56 }
 0x2b4   :  { %v3575_v62 = vld [vmem:[#allocation0 + $0x700] sm:$0xf]  ;;  %v3581_v24 = vld [vmem:[#allocation0 + $0x708] sm:$0xf]  ;;  %v3587_v2 = vld [vmem:[#allocation0 + $0x710] sm:$0xf] }
 0x2b5   :  { %4324 = vst [vmem:[%s6362_s1 + $0x380] sm:$0xf] %v3575_v62  ;;  %v3593_v5 = vld [vmem:[#allocation0 + $0x718] sm:$0xf]  ;;  %v3599_v61 = vld [vmem:[#allocation0 + $0x720] sm:$0xf] }
 0x2b6   :  { %4325 = vst [vmem:[%s6362_s1 + $0x384] sm:$0xf] %v3581_v24  ;;  %v3605_v6 = vld [vmem:[#allocation0 + $0x728] sm:$0xf]  ;;  %v3611_v7 = vld [vmem:[#allocation0 + $0x730] sm:$0xf] }
 0x2b7   :  { %4326 = vst [vmem:[%s6362_s1 + $0x388] sm:$0xf] %v3587_v2  ;;  %v3617_v8 = vld [vmem:[#allocation0 + $0x738] sm:$0xf] }
 0x2b8   :  { %4327 = vst [vmem:[%s6362_s1 + $0x38c] sm:$0xf] %v3593_v5 }
 0x2b9   :  { %4328 = vst [vmem:[%s6362_s1 + $0x390] sm:$0xf] %v3599_v61 }
 0x2ba   :  { %4329 = vst [vmem:[%s6362_s1 + $0x394] sm:$0xf] %v3605_v6 }
 0x2bb   :  { %4330 = vst [vmem:[%s6362_s1 + $0x398] sm:$0xf] %v3611_v7 }
 0x2bc   :  { %4331 = vst [vmem:[%s6362_s1 + $0x39c] sm:$0xf] %v3617_v8 }
 0x2bd   :  { %2162 = vst.msk [vmem:[#allocation0 + $0x782] ss:$8 sm:$0xf] %vm579_vm0, %v2159_v43  }
 0x2be   :  { %2164 = vst.msk [vmem:[#allocation0 + $0x782] ss:$8 sm:$0xf0] %vm579_vm0, %v2159_v43  }
 0x2bf   :  { %2175 = vst.msk [vmem:[#allocation0 + $0x7c2] ss:$8 sm:$0xf] %vm579_vm0, %v2172_v21  }
 0x2c0   :  { %2177 = vst.msk [vmem:[#allocation0 + $0x7c2] ss:$8 sm:$0xf0] %vm579_vm0, %v2172_v21  }
 0x2c1   :  { %2201 = vst.msk [vmem:[#allocation0 + $0x842] ss:$8 sm:$0xf] %vm579_vm0, %v2198_v10  }
 0x2c2   :  { %2203 = vst.msk [vmem:[#allocation0 + $0x842] ss:$8 sm:$0xf0] %vm579_vm0, %v2198_v10  }
 0x2c3   :  { %2214 = vst.msk [vmem:[#allocation0 + $0x882] ss:$8 sm:$0xf] %vm579_vm0, %v6229_v58  }
 0x2c4   :  { %v3671_v13 = vld [vmem:[#allocation0 + $0x780] sm:$0xf]  ;;  %v3677_v1 = vld [vmem:[#allocation0 + $0x788] sm:$0xf]  ;;  %v3683_v34 = vld [vmem:[#allocation0 + $0x790] sm:$0xf] }
 0x2c5   :  { %4340 = vst [vmem:[%s6362_s1 + $0x3c0] sm:$0xf] %v3671_v13  ;;  %v3689_v16 = vld [vmem:[#allocation0 + $0x798] sm:$0xf]  ;;  %v3695_v36 = vld [vmem:[#allocation0 + $0x7a0] sm:$0xf] }
 0x2c6   :  { %4341 = vst [vmem:[%s6362_s1 + $0x3c4] sm:$0xf] %v3677_v1  ;;  %v3701_v14 = vld [vmem:[#allocation0 + $0x7a8] sm:$0xf]  ;;  %v3707_v17 = vld [vmem:[#allocation0 + $0x7b0] sm:$0xf] }
 0x2c7   :  { %4342 = vst [vmem:[%s6362_s1 + $0x3c8] sm:$0xf] %v3683_v34  ;;  %v3713_v23 = vld [vmem:[#allocation0 + $0x7b8] sm:$0xf]  ;;  %v3719_v47 = vld [vmem:[#allocation0 + $0x7c0] sm:$0xf] }
 0x2c8   :  { %4343 = vst [vmem:[%s6362_s1 + $0x3cc] sm:$0xf] %v3689_v16  ;;  %v3725_v4 = vld [vmem:[#allocation0 + $0x7c8] sm:$0xf]  ;;  %v3731_v59 = vld [vmem:[#allocation0 + $0x7d0] sm:$0xf] }
 0x2c9   :  { %4344 = vst [vmem:[%s6362_s1 + $0x3d0] sm:$0xf] %v3695_v36  ;;  %v3737_v19 = vld [vmem:[#allocation0 + $0x7d8] sm:$0xf]  ;;  %v3743_v42 = vld [vmem:[#allocation0 + $0x7e0] sm:$0xf] }
 0x2ca   :  { %4345 = vst [vmem:[%s6362_s1 + $0x3d4] sm:$0xf] %v3701_v14  ;;  %v3749_v3 = vld [vmem:[#allocation0 + $0x7e8] sm:$0xf]  ;;  %v3755_v18 = vld [vmem:[#allocation0 + $0x7f0] sm:$0xf] }
 0x2cb   :  { %4346 = vst [vmem:[%s6362_s1 + $0x3d8] sm:$0xf] %v3707_v17  ;;  %v3761_v50 = vld [vmem:[#allocation0 + $0x7f8] sm:$0xf]  ;;  %v3815_v20 = vld [vmem:[#allocation0 + $0x840] sm:$0xf] }
 0x2cc   :  { %4347 = vst [vmem:[%s6362_s1 + $0x3dc] sm:$0xf] %v3713_v23  ;;  %v3821_v31 = vld [vmem:[#allocation0 + $0x848] sm:$0xf]  ;;  %v3827_v26 = vld [vmem:[#allocation0 + $0x850] sm:$0xf] }
 0x2cd   :  { %4348 = vst [vmem:[%s6362_s1 + $0x3e0] sm:$0xf] %v3719_v47  ;;  %v3833_v27 = vld [vmem:[#allocation0 + $0x858] sm:$0xf]  ;;  %v3839_v28 = vld [vmem:[#allocation0 + $0x860] sm:$0xf] }
 0x2ce   :  { %4349 = vst [vmem:[%s6362_s1 + $0x3e4] sm:$0xf] %v3725_v4  ;;  %v3845_v22 = vld [vmem:[#allocation0 + $0x868] sm:$0xf]  ;;  %v3851_v32 = vld [vmem:[#allocation0 + $0x870] sm:$0xf] }
 0x2cf   :  { %4350 = vst [vmem:[%s6362_s1 + $0x3e8] sm:$0xf] %v3731_v59  ;;  %v3857_v57 = vld [vmem:[#allocation0 + $0x878] sm:$0xf]  ;;  %v3863_v15 = vld [vmem:[#allocation0 + $0x880] sm:$0xf] }
 0x2d0   :  { %4351 = vst [vmem:[%s6362_s1 + $0x3ec] sm:$0xf] %v3737_v19  ;;  %v3869_v60 = vld [vmem:[#allocation0 + $0x888] sm:$0xf]  ;;  %v3875_v45 = vld [vmem:[#allocation0 + $0x890] sm:$0xf] }
 0x2d1   :  { %4352 = vst [vmem:[%s6362_s1 + $0x3f0] sm:$0xf] %v3743_v42  ;;  %v3881_v0 = vld [vmem:[#allocation0 + $0x898] sm:$0xf] }
 0x2d2   :  { %4353 = vst [vmem:[%s6362_s1 + $0x3f4] sm:$0xf] %v3749_v3 }
 0x2d3   :  { %4354 = vst [vmem:[%s6362_s1 + $0x3f8] sm:$0xf] %v3755_v18 }
 0x2d4   :  { %4355 = vst [vmem:[%s6362_s1 + $0x3fc] sm:$0xf] %v3761_v50 }
 0x2d5   :  { %4364 = vst [vmem:[%s6362_s1 + $0x420] sm:$0xf] %v3815_v20 }
 0x2d6   :  { %4365 = vst [vmem:[%s6362_s1 + $0x424] sm:$0xf] %v3821_v31 }
 0x2d7   :  { %4366 = vst [vmem:[%s6362_s1 + $0x428] sm:$0xf] %v3827_v26 }
 0x2d8   :  { %4367 = vst [vmem:[%s6362_s1 + $0x42c] sm:$0xf] %v3833_v27 }
 0x2d9   :  { %4368 = vst [vmem:[%s6362_s1 + $0x430] sm:$0xf] %v3839_v28 }
 0x2da   :  { %4369 = vst [vmem:[%s6362_s1 + $0x434] sm:$0xf] %v3845_v22 }
 0x2db   :  { %4370 = vst [vmem:[%s6362_s1 + $0x438] sm:$0xf] %v3851_v32 }
 0x2dc   :  { %4371 = vst [vmem:[%s6362_s1 + $0x43c] sm:$0xf] %v3857_v57 }
 0x2dd   :  { %2216 = vst.msk [vmem:[#allocation0 + $0x882] ss:$8 sm:$0xf0] %vm579_vm0, %v6229_v58  }
 0x2de   :  { %4372 = vst [vmem:[%s6362_s1 + $0x440] sm:$0xf] %v3863_v15 }
 0x2df   :  { %4373 = vst [vmem:[%s6362_s1 + $0x444] sm:$0xf] %v3869_v60 }
 0x2e0   :  { %4374 = vst [vmem:[%s6362_s1 + $0x448] sm:$0xf] %v3875_v45 }
 0x2e1   :  { %4375 = vst [vmem:[%s6362_s1 + $0x44c] sm:$0xf] %v3881_v0 }
 0x2e4   :  { %v3887_v40 = vld [vmem:[#allocation0 + $0x8a0] sm:$0xf]  ;;  %v3893_v29 = vld [vmem:[#allocation0 + $0x8a8] sm:$0xf]  ;;  %v3899_v33 = vld [vmem:[#allocation0 + $0x8b0] sm:$0xf] }
 0x2e5   :  { %4376 = vst [vmem:[%s6362_s1 + $0x450] sm:$0xf] %v3887_v40  ;;  %v3905_v25 = vld [vmem:[#allocation0 + $0x8b8] sm:$0xf] }
 0x2e6   :  { %4377 = vst [vmem:[%s6362_s1 + $0x454] sm:$0xf] %v3893_v29 }
 0x2e7   :  { %4378 = vst [vmem:[%s6362_s1 + $0x458] sm:$0xf] %v3899_v33 }
 0x2e8   :  { %4379 = vst [vmem:[%s6362_s1 + $0x45c] sm:$0xf] %v3905_v25 }

// kernel: conv3d_softmax_pool.1
= control target key start
LH: loop header
LB: loop body
LE: loop exit
PB: predicated region body
PF: predicated region fallthrough
CT: control target
= control target key end

     0   :  { %s1534_s9 = smov 0   ;;  %s2113_s0 = inlined_call_operand.vmem [shape: f32[2,82,1728], index: 0, kind: input, shape index: {}]   ;;  %s2114_s1 = inlined_call_operand.vmem [shape: f32[16,82], index: 1, kind: input, shape index: {}]   ;;  %s2115_s2 = inlined_call_operand.vmem [shape: f32[2,16,128], index: 2, kind: output, shape index: {}]  }
   0x1 LB: > { %s1331_s10 = sadd.s32 4294967295, %s1511_s9   ;;  %p1335_p0 = scmp.ge.s32.totalorder %s1511_s9, 1  ;;  %s1511_s9 = sphi %s1534_s9, %s12_s9  }
   0x2   : > { %p112_p1 = scmp.lt.s32.totalorder %s1511_s9, 3 }
   0x4   : > { %p113_p2 = pnand %p1335_p0, %p112_p1 }
   0x5   : > { %p134_p3 = scmp.lt.s32.totalorder (!%p113_p2), %s1331_s10, 1  ;;  %s1513_s19 = smov (!%p113_p2), 80  }
   0x6   : > { %116 = sbr.rel (%p113_p2) target bundleno = 995 (0x3e3), region = 28  ;;  %s1514_s20 = smov (!%p113_p2), 32  }
   0x7   : > { %s1515_s21 = smov (!%p113_p2), 20   ;;  %s1516_s22 = smov (!%p113_p2), 40  }
   0x8   : > { %s1517_s23 = smov (!%p113_p2), 101   ;;  %s1518_s24 = smov (!%p113_p2), 74  }
   0xb   : > { %s2117_s10 = smov (!%p134_p3, %s1331_s10), 1  ;;  %vm307_vm0 = vcmask 1041408   ;;  %v1601_v44 = vld [vmem:[%s2114_s1] sm:$0xff]  ;;  %vm300_vm1 = vcmask 670720   ;;  %v1634_v61 = vld [vmem:[%s2114_s1 + $0x8] sm:$0xff]  ;;  %vm763_vm2 = vcmask 523264  }
   0xc   : > { %s1406_s11 = smul.u32 1232, %s2117_s10  ;;  %vm1065_vm3 = vcmask 654336   ;;  %vm1168_vm4 = vcmask 261120   ;;  %vm1205_vm5 = vcmask 162816   ;;  %vm1246_vm6 = vcmask 326656   ;;  %s1383_s25 = sshll.u32 %s2117_s10, 4 }
   0xd   : > { %s143_s28 = scalar_lea.vmem %s2115_s2, %s1383_s25  ;;  %vm1273_vm7 = vcmask 220160  }
   0xe   : > { %s1548_s14 = scalar_lea.vmem %s2113_s0, %s1406_s11 }
   0xf   : > { %v286_v0 = vld [vmem:[%s1548_s14 + $0x460] sm:$0x3]  ;;  %v287_v1 = vld [vmem:[%s1548_s14 + $0x468] sm:$0x3]  ;;  %v288_v2 = vld [vmem:[%s1548_s14 + $0x470] sm:$0x3] }
  0x10   : > { %1339 = vmatpush.msk.msra.mxu0 %vm307_vm0, %v286_v0  ;;  %1342 = vmatpush.msk.msra.mxu1 %vm307_vm0, %v287_v1  ;;  %v289_v3 = vld [vmem:[%s1548_s14 + $0x478] sm:$0x3]  ;;  %v272_v4 = vld [vmem:[%s1548_s14 + $0x3f0] sm:$0xff]  ;;  %v274_v6 = vld [vmem:[%s1548_s14 + $0x400] sm:$0xff] }
  0x11   : > { %v273_v5 = vld [vmem:[%s1548_s14 + $0x3f8] sm:$0xff]  ;;  %1345 = vmatpush.msk.msra.mxu2 %vm307_vm0, %v288_v2  ;;  %1348 = vmatpush.msk.msra.mxu3 %vm307_vm0, %v289_v3  ;;  %v275_v7 = vld [vmem:[%s1548_s14 + $0x408] sm:$0xff]  ;;  %v258_v8 = vld [vmem:[%s1548_s14 + $0x380] sm:$0xff] }
  0x12   : > { %356 = vmatpush.msra.mxu0 %v272_v4  ;;  %379 = vmatpush.msra.mxu1 %v273_v5  ;;  %v259_v9 = vld [vmem:[%s1548_s14 + $0x388] sm:$0xff]  ;;  %v260_v10 = vld [vmem:[%s1548_s14 + $0x390] sm:$0xff]  ;;  %v261_v11 = vld [vmem:[%s1548_s14 + $0x398] sm:$0xff] }
  0x13   : > { %402 = vmatpush.msra.mxu2 %v274_v6  ;;  %425 = vmatpush.msra.mxu3 %v275_v7  ;;  %v244_v12 = vld [vmem:[%s1548_s14 + $0x310] sm:$0xff]  ;;  %v245_v13 = vld [vmem:[%s1548_s14 + $0x318] sm:$0xff]  ;;  %v246_v14 = vld [vmem:[%s1548_s14 + $0x320] sm:$0xff] }
  0x14   : > { %357 = vmatpush.msra.mxu0 %v258_v8  ;;  %380 = vmatpush.msra.mxu1 %v259_v9  ;;  %v247_v15 = vld [vmem:[%s1548_s14 + $0x328] sm:$0xff]  ;;  %v230_v16 = vld [vmem:[%s1548_s14 + $0x2a0] sm:$0xff]  ;;  %v232_v18 = vld [vmem:[%s1548_s14 + $0x2b0] sm:$0xff] }
  0x15   : > { %403 = vmatpush.msra.mxu2 %v260_v10  ;;  %426 = vmatpush.msra.mxu3 %v261_v11  ;;  %v231_v17 = vld [vmem:[%s1548_s14 + $0x2a8] sm:$0xff]  ;;  %v233_v19 = vld [vmem:[%s1548_s14 + $0x2b8] sm:$0xff]  ;;  %v216_v20 = vld [vmem:[%s1548_s14 + $0x230] sm:$0xff] }
  0x16   : > { %358 = vmatpush.msra.mxu0 %v244_v12  ;;  %381 = vmatpush.msra.mxu1 %v245_v13  ;;  %v217_v21 = vld [vmem:[%s1548_s14 + $0x238] sm:$0xff]  ;;  %v218_v22 = vld [vmem:[%s1548_s14 + $0x240] sm:$0xff]  ;;  %v219_v23 = vld [vmem:[%s1548_s14 + $0x248] sm:$0xff] }
  0x17   : > { %404 = vmatpush.msra.mxu2 %v246_v14  ;;  %427 = vmatpush.msra.mxu3 %v247_v15  ;;  %v202_v24 = vld [vmem:[%s1548_s14 + $0x1c0] sm:$0xff]  ;;  %v203_v25 = vld [vmem:[%s1548_s14 + $0x1c8] sm:$0xff]  ;;  %v204_v26 = vld [vmem:[%s1548_s14 + $0x1d0] sm:$0xff] }
  0x18   : > { %359 = vmatpush.msra.mxu0 %v230_v16  ;;  %382 = vmatpush.msra.mxu1 %v231_v17  ;;  %v205_v27 = vld [vmem:[%s1548_s14 + $0x1d8] sm:$0xff]  ;;  %v188_v28 = vld [vmem:[%s1548_s14 + $0x150] sm:$0xff]  ;;  %v190_v30 = vld [vmem:[%s1548_s14 + $0x160] sm:$0xff] }
  0x19   : > { %405 = vmatpush.msra.mxu2 %v232_v18  ;;  %428 = vmatpush.msra.mxu3 %v233_v19  ;;  %v189_v29 = vld [vmem:[%s1548_s14 + $0x158] sm:$0xff]  ;;  %v191_v31 = vld [vmem:[%s1548_s14 + $0x168] sm:$0xff]  ;;  %v174_v32 = vld [vmem:[%s1548_s14 + $0xe0] sm:$0xff] }
  0x1a   : > { %360 = vmatpush.msra.mxu0 %v216_v20  ;;  %383 = vmatpush.msra.mxu1 %v217_v21  ;;  %v175_v33 = vld [vmem:[%s1548_s14 + $0xe8] sm:$0xff]  ;;  %v176_v34 = vld [vmem:[%s1548_s14 + $0xf0] sm:$0xff]  ;;  %v177_v35 = vld [vmem:[%s1548_s14 + $0xf8] sm:$0xff] }
  0x1b   : > { %406 = vmatpush.msra.mxu2 %v218_v22  ;;  %429 = vmatpush.msra.mxu3 %v219_v23  ;;  %v160_v36 = vld [vmem:[%s1548_s14 + $0x70] sm:$0xff]  ;;  %v161_v37 = vld [vmem:[%s1548_s14 + $0x78] sm:$0xff]  ;;  %v162_v38 = vld [vmem:[%s1548_s14 + $0x80] sm:$0xff] }
  0x1c   : > { %361 = vmatpush.msra.mxu0 %v202_v24  ;;  %384 = vmatpush.msra.mxu1 %v203_v25  ;;  %v163_v39 = vld [vmem:[%s1548_s14 + $0x88] sm:$0xff]  ;;  %v146_v40 = vld [vmem:[%s1548_s14] sm:$0xff]  ;;  %v148_v42 = vld [vmem:[%s1548_s14 + $0x10] sm:$0xff] }
  0x1d   : > { %407 = vmatpush.msra.mxu2 %v204_v26  ;;  %430 = vmatpush.msra.mxu3 %v205_v27  ;;  %v147_v41 = vld [vmem:[%s1548_s14 + $0x8] sm:$0xff]  ;;  %v149_v43 = vld [vmem:[%s1548_s14 + $0x18] sm:$0xff]  ;;  %v290_v45 = vld [vmem:[%s1548_s14 + $0x480] sm:$0x3] }
  0x1e   : > { %362 = vmatpush.msra.mxu0 %v188_v28  ;;  %385 = vmatpush.msra.mxu1 %v189_v29  ;;  %v291_v46 = vld [vmem:[%s1548_s14 + $0x488] sm:$0x3]  ;;  %v292_v47 = vld [vmem:[%s1548_s14 + $0x490] sm:$0x3]  ;;  %v293_v48 = vld [vmem:[%s1548_s14 + $0x498] sm:$0x3] }
  0x1f   : > { %408 = vmatpush.msra.mxu2 %v190_v30  ;;  %431 = vmatpush.msra.mxu3 %v191_v31  ;;  %v276_v49 = vld [vmem:[%s1548_s14 + $0x410] sm:$0xff]  ;;  %v277_v50 = vld [vmem:[%s1548_s14 + $0x418] sm:$0xff]  ;;  %v278_v51 = vld [vmem:[%s1548_s14 + $0x420] sm:$0xff] }
  0x20   : > { %363 = vmatpush.msra.mxu0 %v174_v32  ;;  %386 = vmatpush.msra.mxu1 %v175_v33  ;;  %v279_v52 = vld [vmem:[%s1548_s14 + $0x428] sm:$0xff]  ;;  %v262_v53 = vld [vmem:[%s1548_s14 + $0x3a0] sm:$0xff]  ;;  %v264_v55 = vld [vmem:[%s1548_s14 + $0x3b0] sm:$0xff] }
  0x21   : > { %409 = vmatpush.msra.mxu2 %v176_v34  ;;  %432 = vmatpush.msra.mxu3 %v177_v35  ;;  %v263_v54 = vld [vmem:[%s1548_s14 + $0x3a8] sm:$0xff]  ;;  %v265_v56 = vld [vmem:[%s1548_s14 + $0x3b8] sm:$0xff]  ;;  %v248_v57 = vld [vmem:[%s1548_s14 + $0x330] sm:$0xff] }
  0x22   : > { %364 = vmatpush.msra.mxu0 %v160_v36  ;;  %387 = vmatpush.msra.mxu1 %v161_v37  ;;  %v249_v58 = vld [vmem:[%s1548_s14 + $0x338] sm:$0xff]  ;;  %v250_v59 = vld [vmem:[%s1548_s14 + $0x340] sm:$0xff]  ;;  %v251_v60 = vld [vmem:[%s1548_s14 + $0x348] sm:$0xff] }
  0x23   : > { %410 = vmatpush.msra.mxu2 %v162_v38  ;;  %433 = vmatpush.msra.mxu3 %v163_v39  ;;  %v234_v62 = vld [vmem:[%s1548_s14 + $0x2c0] sm:$0xff]  ;;  %v235_v63 = vld [vmem:[%s1548_s14 + $0x2c8] sm:$0xff]  ;;  %v236_v0 = vld [vmem:[%s1548_s14 + $0x2d0] sm:$0xff] }
  0x24   : > { %365 = vmatpush.msra.mxu0 %v146_v40  ;;  %388 = vmatpush.msra.mxu1 %v147_v41  ;;  %v237_v1 = vld [vmem:[%s1548_s14 + $0x2d8] sm:$0xff]  ;;  %v220_v2 = vld [vmem:[%s1548_s14 + $0x250] sm:$0xff]  ;;  %v222_v4 = vld [vmem:[%s1548_s14 + $0x260] sm:$0xff] }
  0x25   : > { %411 = vmatpush.msra.mxu2 %v148_v42  ;;  %434 = vmatpush.msra.mxu3 %v149_v43  ;;  %v221_v3 = vld [vmem:[%s1548_s14 + $0x258] sm:$0xff]  ;;  %v223_v5 = vld [vmem:[%s1548_s14 + $0x268] sm:$0xff]  ;;  %v206_v6 = vld [vmem:[%s1548_s14 + $0x1e0] sm:$0xff] }
  0x26   : > { %1340 = vmatmul.msk.f32.vlgmr.msra.gmra.mxu0 %vm300_vm1, %v1601_v44  ;;  %1343 = vmatmul.msk.f32.vlgmr.msra.gmra.mxu1 %vm300_vm1, %v1601_v44  ;;  %v207_v7 = vld [vmem:[%s1548_s14 + $0x1e8] sm:$0xff]  ;;  %v208_v8 = vld [vmem:[%s1548_s14 + $0x1f0] sm:$0xff]  ;;  %v209_v9 = vld [vmem:[%s1548_s14 + $0x1f8] sm:$0xff] }
  0x27   : > { %1346 = vmatmul.msk.f32.vlgmr.msra.gmra.mxu2 %vm300_vm1, %v1601_v44  ;;  %1349 = vmatmul.msk.f32.vlgmr.msra.gmra.mxu3 %vm300_vm1, %v1601_v44  ;;  %v192_v10 = vld [vmem:[%s1548_s14 + $0x170] sm:$0xff]  ;;  %v193_v11 = vld [vmem:[%s1548_s14 + $0x178] sm:$0xff]  ;;  %v194_v12 = vld [vmem:[%s1548_s14 + $0x180] sm:$0xff] }
  0x28   : > { %1351 = vmatpush.msk.msrb.mxu0 %vm307_vm0, %v290_v45  ;;  %1354 = vmatpush.msk.msrb.mxu1 %vm307_vm0, %v291_v46  ;;  %v195_v13 = vld [vmem:[%s1548_s14 + $0x188] sm:$0xff]  ;;  %v178_v14 = vld [vmem:[%s1548_s14 + $0x100] sm:$0xff]  ;;  %v180_v16 = vld [vmem:[%s1548_s14 + $0x110] sm:$0xff] }
  0x29   : > { %1357 = vmatpush.msk.msrb.mxu2 %vm307_vm0, %v292_v47  ;;  %1360 = vmatpush.msk.msrb.mxu3 %vm307_vm0, %v293_v48  ;;  %v179_v15 = vld [vmem:[%s1548_s14 + $0x108] sm:$0xff]  ;;  %v181_v17 = vld [vmem:[%s1548_s14 + $0x118] sm:$0xff]  ;;  %v164_v18 = vld [vmem:[%s1548_s14 + $0x90] sm:$0xff] }
  0x2a   : > { %448 = vmatpush.msrb.mxu0 %v276_v49  ;;  %471 = vmatpush.msrb.mxu1 %v277_v50  ;;  %v165_v19 = vld [vmem:[%s1548_s14 + $0x98] sm:$0xff]  ;;  %v166_v20 = vld [vmem:[%s1548_s14 + $0xa0] sm:$0xff]  ;;  %v167_v21 = vld [vmem:[%s1548_s14 + $0xa8] sm:$0xff] }
  0x2b   : > { %494 = vmatpush.msrb.mxu2 %v278_v51  ;;  %517 = vmatpush.msrb.mxu3 %v279_v52  ;;  %v150_v22 = vld [vmem:[%s1548_s14 + $0x20] sm:$0xff]  ;;  %v151_v23 = vld [vmem:[%s1548_s14 + $0x28] sm:$0xff]  ;;  %v152_v24 = vld [vmem:[%s1548_s14 + $0x30] sm:$0xff] }
  0x2c   : > { %449 = vmatpush.msrb.mxu0 %v262_v53  ;;  %472 = vmatpush.msrb.mxu1 %v263_v54  ;;  %v153_v25 = vld [vmem:[%s1548_s14 + $0x38] sm:$0xff]  ;;  %v294_v26 = vld [vmem:[%s1548_s14 + $0x4a0] sm:$0x3]  ;;  %v295_v27 = vld [vmem:[%s1548_s14 + $0x4a8] sm:$0x3] }
  0x2d   : > { %495 = vmatpush.msrb.mxu2 %v264_v55  ;;  %518 = vmatpush.msrb.mxu3 %v265_v56  ;;  %v296_v28 = vld [vmem:[%s1548_s14 + $0x4b0] sm:$0x3]  ;;  %v297_v29 = vld [vmem:[%s1548_s14 + $0x4b8] sm:$0x3]  ;;  %v282_v32 = vld [vmem:[%s1548_s14 + $0x440] sm:$0xff] }
  0x2e   : > { %450 = vmatpush.msrb.mxu0 %v248_v57  ;;  %473 = vmatpush.msrb.mxu1 %v249_v58  ;;  %v280_v30 = vld [vmem:[%s1548_s14 + $0x430] sm:$0xff]  ;;  %v281_v31 = vld [vmem:[%s1548_s14 + $0x438] sm:$0xff]  ;;  %v283_v33 = vld [vmem:[%s1548_s14 + $0x448] sm:$0xff] }
  0x2f   : > { %496 = vmatpush.msrb.mxu2 %v250_v59  ;;  %519 = vmatpush.msrb.mxu3 %v251_v60  ;;  %v266_v34 = vld [vmem:[%s1548_s14 + $0x3c0] sm:$0xff]  ;;  %v267_v35 = vld [vmem:[%s1548_s14 + $0x3c8] sm:$0xff]  ;;  %v268_v36 = vld [vmem:[%s1548_s14 + $0x3d0] sm:$0xff] }
  0x30   : > { %1341 = vmatmul.msk.f32.gmra.mxu0 %vm300_vm1, %v1634_v61  ;;  %1344 = vmatmul.msk.f32.gmra.mxu1 %vm300_vm1, %v1634_v61  ;;  %v269_v37 = vld [vmem:[%s1548_s14 + $0x3d8] sm:$0xff]  ;;  %v252_v38 = vld [vmem:[%s1548_s14 + $0x350] sm:$0xff]  ;;  %v254_v40 = vld [vmem:[%s1548_s14 + $0x360] sm:$0xff] }
  0x31   : > { %1347 = vmatmul.msk.f32.gmra.mxu2 %vm300_vm1, %v1634_v61  ;;  %1350 = vmatmul.msk.f32.gmra.mxu3 %vm300_vm1, %v1634_v61  ;;  %v253_v39 = vld [vmem:[%s1548_s14 + $0x358] sm:$0xff]  ;;  %v255_v41 = vld [vmem:[%s1548_s14 + $0x368] sm:$0xff]  ;;  %v238_v42 = vld [vmem:[%s1548_s14 + $0x2e0] sm:$0xff] }
  0x32   : > { %451 = vmatpush.msrb.mxu0 %v234_v62  ;;  %474 = vmatpush.msrb.mxu1 %v235_v63  ;;  %v239_v43 = vld [vmem:[%s1548_s14 + $0x2e8] sm:$0xff]  ;;  %v240_v45 = vld [vmem:[%s1548_s14 + $0x2f0] sm:$0xff]  ;;  %v241_v46 = vld [vmem:[%s1548_s14 + $0x2f8] sm:$0xff] }
  0x33   : > { %497 = vmatpush.msrb.mxu2 %v236_v0  ;;  %520 = vmatpush.msrb.mxu3 %v237_v1  ;;  %v224_v47 = vld [vmem:[%s1548_s14 + $0x270] sm:$0xff]  ;;  %v225_v48 = vld [vmem:[%s1548_s14 + $0x278] sm:$0xff]  ;;  %v226_v49 = vld [vmem:[%s1548_s14 + $0x280] sm:$0xff] }
  0x34   : > { %452 = vmatpush.msrb.mxu0 %v220_v2  ;;  %475 = vmatpush.msrb.mxu1 %v221_v3  ;;  %v227_v50 = vld [vmem:[%s1548_s14 + $0x288] sm:$0xff]  ;;  %v210_v51 = vld [vmem:[%s1548_s14 + $0x200] sm:$0xff]  ;;  %v212_v53 = vld [vmem:[%s1548_s14 + $0x210] sm:$0xff] }
  0x35   : > { %498 = vmatpush.msrb.mxu2 %v222_v4  ;;  %521 = vmatpush.msrb.mxu3 %v223_v5  ;;  %v211_v52 = vld [vmem:[%s1548_s14 + $0x208] sm:$0xff]  ;;  %v213_v54 = vld [vmem:[%s1548_s14 + $0x218] sm:$0xff]  ;;  %v196_v55 = vld [vmem:[%s1548_s14 + $0x190] sm:$0xff] }
  0x36   : > { %453 = vmatpush.msrb.mxu0 %v206_v6  ;;  %476 = vmatpush.msrb.mxu1 %v207_v7  ;;  %v197_v56 = vld [vmem:[%s1548_s14 + $0x198] sm:$0xff]  ;;  %v198_v57 = vld [vmem:[%s1548_s14 + $0x1a0] sm:$0xff]  ;;  %v199_v58 = vld [vmem:[%s1548_s14 + $0x1a8] sm:$0xff] }
  0x37   : > { %499 = vmatpush.msrb.mxu2 %v208_v8  ;;  %522 = vmatpush.msrb.mxu3 %v209_v9  ;;  %v182_v59 = vld [vmem:[%s1548_s14 + $0x120] sm:$0xff]  ;;  %v183_v60 = vld [vmem:[%s1548_s14 + $0x128] sm:$0xff]  ;;  %v184_v62 = vld [vmem:[%s1548_s14 + $0x130] sm:$0xff] }
  0x38   : > { %454 = vmatpush.msrb.mxu0 %v192_v10  ;;  %477 = vmatpush.msrb.mxu1 %v193_v11  ;;  %v185_v63 = vld [vmem:[%s1548_s14 + $0x138] sm:$0xff]  ;;  %v168_v0 = vld [vmem:[%s1548_s14 + $0xb0] sm:$0xff]  ;;  %v170_v2 = vld [vmem:[%s1548_s14 + $0xc0] sm:$0xff] }
  0x39   : > { %500 = vmatpush.msrb.mxu2 %v194_v12  ;;  %523 = vmatpush.msrb.mxu3 %v195_v13  ;;  %v169_v1 = vld [vmem:[%s1548_s14 + $0xb8] sm:$0xff]  ;;  %v171_v3 = vld [vmem:[%s1548_s14 + $0xc8] sm:$0xff]  ;;  %v154_v4 = vld [vmem:[%s1548_s14 + $0x40] sm:$0xff] }
  0x3a   : > { %455 = vmatpush.msrb.mxu0 %v178_v14  ;;  %478 = vmatpush.msrb.mxu1 %v179_v15  ;;  %v155_v5 = vld [vmem:[%s1548_s14 + $0x48] sm:$0xff]  ;;  %v156_v6 = vld [vmem:[%s1548_s14 + $0x50] sm:$0xff]  ;;  %v157_v7 = vld [vmem:[%s1548_s14 + $0x58] sm:$0xff] }
  0x3b   : > { %501 = vmatpush.msrb.mxu2 %v180_v16  ;;  %524 = vmatpush.msrb.mxu3 %v181_v17  ;;  %v298_v8 = vld [vmem:[%s1548_s14 + $0x4c0] sm:$0x3]  ;;  %v299_v9 = vld [vmem:[%s1548_s14 + $0x4c8] sm:$0x3]  ;;  %v284_v10 = vld [vmem:[%s1548_s14 + $0x450] sm:$0xff] }
  0x3c   : > { %456 = vmatpush.msrb.mxu0 %v164_v18  ;;  %479 = vmatpush.msrb.mxu1 %v165_v19  ;;  %v285_v11 = vld [vmem:[%s1548_s14 + $0x458] sm:$0xff]  ;;  %v270_v12 = vld [vmem:[%s1548_s14 + $0x3e0] sm:$0xff]  ;;  %v271_v13 = vld [vmem:[%s1548_s14 + $0x3e8] sm:$0xff] }
  0x3d   : > { %502 = vmatpush.msrb.mxu2 %v166_v20  ;;  %525 = vmatpush.msrb.mxu3 %v167_v21  ;;  %v256_v14 = vld [vmem:[%s1548_s14 + $0x370] sm:$0xff]  ;;  %v257_v15 = vld [vmem:[%s1548_s14 + $0x378] sm:$0xff]  ;;  %v242_v16 = vld [vmem:[%s1548_s14 + $0x300] sm:$0xff] }
  0x3e   : > { %457 = vmatpush.msrb.mxu0 %v150_v22  ;;  %480 = vmatpush.msrb.mxu1 %v151_v23  ;;  %v243_v17 = vld [vmem:[%s1548_s14 + $0x308] sm:$0xff]  ;;  %v228_v18 = vld [vmem:[%s1548_s14 + $0x290] sm:$0xff]  ;;  %v229_v19 = vld [vmem:[%s1548_s14 + $0x298] sm:$0xff] }
  0x3f   : > { %503 = vmatpush.msrb.mxu2 %v152_v24  ;;  %526 = vmatpush.msrb.mxu3 %v153_v25  ;;  %v214_v20 = vld [vmem:[%s1548_s14 + $0x220] sm:$0xff]  ;;  %v215_v21 = vld [vmem:[%s1548_s14 + $0x228] sm:$0xff]  ;;  %v200_v22 = vld [vmem:[%s1548_s14 + $0x1b0] sm:$0xff] }
  0x40   : > { %1352 = vmatmul.msk.f32.vlgmr.msrb.gmra.mxu0 %vm300_vm1, %v1601_v44  ;;  %1355 = vmatmul.msk.f32.vlgmr.msrb.gmra.mxu1 %vm300_vm1, %v1601_v44  ;;  %v201_v23 = vld [vmem:[%s1548_s14 + $0x1b8] sm:$0xff]  ;;  %v186_v24 = vld [vmem:[%s1548_s14 + $0x140] sm:$0xff]  ;;  %v187_v25 = vld [vmem:[%s1548_s14 + $0x148] sm:$0xff] }
  0x41   : > { %1358 = vmatmul.msk.f32.vlgmr.msrb.gmra.mxu2 %vm300_vm1, %v1601_v44  ;;  %1361 = vmatmul.msk.f32.vlgmr.msrb.gmra.mxu3 %vm300_vm1, %v1601_v44 }
  0x42   : > { %1363 = vmatpush.msk.msra.mxu0 %vm307_vm0, %v294_v26  ;;  %1366 = vmatpush.msk.msra.mxu1 %vm307_vm0, %v295_v27  ;;  %v172_v26 = vld [vmem:[%s1548_s14 + $0xd0] sm:$0xff]  ;;  %v173_v27 = vld [vmem:[%s1548_s14 + $0xd8] sm:$0xff] }
  0x43   : > { %1369 = vmatpush.msk.msra.mxu2 %vm307_vm0, %v296_v28  ;;  %1372 = vmatpush.msk.msra.mxu3 %vm307_vm0, %v297_v29  ;;  %v158_v28 = vld [vmem:[%s1548_s14 + $0x60] sm:$0xff]  ;;  %v159_v29 = vld [vmem:[%s1548_s14 + $0x68] sm:$0xff] }
  0x44   : > { %540 = vmatpush.msra.mxu0 %v280_v30  ;;  %563 = vmatpush.msra.mxu1 %v281_v31 }
  0x45   : > { %586 = vmatpush.msra.mxu2 %v282_v32  ;;  %609 = vmatpush.msra.mxu3 %v283_v33 }
  0x46   : > { %541 = vmatpush.msra.mxu0 %v266_v34  ;;  %564 = vmatpush.msra.mxu1 %v267_v35 }
  0x47   : > { %587 = vmatpush.msra.mxu2 %v268_v36  ;;  %610 = vmatpush.msra.mxu3 %v269_v37 }
  0x48   : > { %542 = vmatpush.msra.mxu0 %v252_v38  ;;  %565 = vmatpush.msra.mxu1 %v253_v39 }
  0x49   : > { %588 = vmatpush.msra.mxu2 %v254_v40  ;;  %611 = vmatpush.msra.mxu3 %v255_v41 }
  0x4a   : > { %1353 = vmatmul.msk.f32.gmra.mxu0 %vm300_vm1, %v1634_v61  ;;  %1356 = vmatmul.msk.f32.gmra.mxu1 %vm300_vm1, %v1634_v61 }
  0x4b   : > { %1359 = vmatmul.msk.f32.gmra.mxu2 %vm300_vm1, %v1634_v61  ;;  %1362 = vmatmul.msk.f32.gmra.mxu3 %vm300_vm1, %v1634_v61 }
  0x4c   : > { %543 = vmatpush.msra.mxu0 %v238_v42  ;;  %566 = vmatpush.msra.mxu1 %v239_v43 }
  0x4d   : > { %589 = vmatpush.msra.mxu2 %v240_v45  ;;  %612 = vmatpush.msra.mxu3 %v241_v46 }
  0x4e   : > { %544 = vmatpush.msra.mxu0 %v224_v47  ;;  %567 = vmatpush.msra.mxu1 %v225_v48 }
  0x4f   : > { %590 = vmatpush.msra.mxu2 %v226_v49  ;;  %613 = vmatpush.msra.mxu3 %v227_v50 }
  0x50   : > { %545 = vmatpush.msra.mxu0 %v210_v51  ;;  %568 = vmatpush.msra.mxu1 %v211_v52 }
  0x51   : > { %591 = vmatpush.msra.mxu2 %v212_v53  ;;  %614 = vmatpush.msra.mxu3 %v213_v54 }
  0x52   : > { %546 = vmatpush.msra.mxu0 %v196_v55  ;;  %569 = vmatpush.msra.mxu1 %v197_v56 }
  0x53   : > { %592 = vmatpush.msra.mxu2 %v198_v57  ;;  %615 = vmatpush.msra.mxu3 %v199_v58 }
  0x54   : > { %547 = vmatpush.msra.mxu0 %v182_v59  ;;  %570 = vmatpush.msra.mxu1 %v183_v60 }
  0x55   : > { %593 = vmatpush.msra.mxu2 %v184_v62  ;;  %616 = vmatpush.msra.mxu3 %v185_v63 }
  0x56   : > { %548 = vmatpush.msra.mxu0 %v168_v0  ;;  %571 = vmatpush.msra.mxu1 %v169_v1 }
  0x57   : > { %594 = vmatpush.msra.mxu2 %v170_v2  ;;  %617 = vmatpush.msra.mxu3 %v171_v3 }
  0x58   : > { %549 = vmatpush.msra.mxu0 %v154_v4  ;;  %572 = vmatpush.msra.mxu1 %v155_v5 }
  0x59   : > { %595 = vmatpush.msra.mxu2 %v156_v6  ;;  %618 = vmatpush.msra.mxu3 %v157_v7 }
  0x5a   : > { %1364 = vmatmul.msk.f32.vlgmr.msra.gmra.mxu0 %vm300_vm1, %v1601_v44  ;;  %1367 = vmatmul.msk.f32.vlgmr.msra.gmra.mxu1 %vm300_vm1, %v1601_v44 }
  0x5b   : > { %1370 = vmatmul.msk.f32.vlgmr.msra.gmra.mxu2 %vm300_vm1, %v1601_v44  ;;  %1373 = vmatmul.msk.f32.vlgmr.msra.gmra.mxu3 %vm300_vm1, %v1601_v44 }
  0x5c   : > { %1384 = vmatpush.msk.msrb.mxu2 %vm307_vm0, %v298_v8  ;;  %1395 = vmatpush.msk.msrb.mxu3 %vm307_vm0, %v299_v9 }
  0x5d   : > { %1375 = vmatpush.msk.msrb.mxu0 %vm307_vm0, %v298_v8  ;;  %1378 = vmatpush.msk.msrb.mxu1 %vm307_vm0, %v299_v9 }
  0x5e   : > { %1385 = vmatpush.msrb.mxu2 %v284_v10  ;;  %1396 = vmatpush.msrb.mxu3 %v285_v11 }
  0x5f   : > { %632 = vmatpush.msrb.mxu0 %v284_v10  ;;  %655 = vmatpush.msrb.mxu1 %v285_v11 }
  0x60   : > { %1386 = vmatpush.msrb.mxu2 %v270_v12  ;;  %1397 = vmatpush.msrb.mxu3 %v271_v13 }
  0x61   : > { %633 = vmatpush.msrb.mxu0 %v270_v12  ;;  %656 = vmatpush.msrb.mxu1 %v271_v13 }
  0x62   : > { %1387 = vmatpush.msrb.mxu2 %v256_v14  ;;  %1398 = vmatpush.msrb.mxu3 %v257_v15 }
  0x63   : > { %1365 = vmatmul.msk.f32.gmra.mxu0 %vm300_vm1, %v1634_v61  ;;  %1368 = vmatmul.msk.f32.gmra.mxu1 %vm300_vm1, %v1634_v61 }
  0x64   : > { %1371 = vmatmul.msk.f32.gmra.mxu2 %vm300_vm1, %v1634_v61  ;;  %1374 = vmatmul.msk.f32.gmra.mxu3 %vm300_vm1, %v1634_v61 }
  0x65   : > { %1388 = vmatpush.msrb.mxu2 %v242_v16  ;;  %1399 = vmatpush.msrb.mxu3 %v243_v17 }
  0x66   : > { %634 = vmatpush.msrb.mxu0 %v256_v14  ;;  %657 = vmatpush.msrb.mxu1 %v257_v15 }
  0x67   : > { %1389 = vmatpush.msrb.mxu2 %v228_v18  ;;  %1400 = vmatpush.msrb.mxu3 %v229_v19 }
  0x68   : > { %635 = vmatpush.msrb.mxu0 %v242_v16  ;;  %658 = vmatpush.msrb.mxu1 %v243_v17 }
  0x69   : > { %1390 = vmatpush.msrb.mxu2 %v214_v20  ;;  %1401 = vmatpush.msrb.mxu3 %v215_v21 }
  0x6a   : > { %636 = vmatpush.msrb.mxu0 %v228_v18  ;;  %659 = vmatpush.msrb.mxu1 %v229_v19 }
  0x6b   : > { %1391 = vmatpush.msrb.mxu2 %v200_v22  ;;  %1402 = vmatpush.msrb.mxu3 %v201_v23 }
  0x6c   : > { %637 = vmatpush.msrb.mxu0 %v214_v20  ;;  %660 = vmatpush.msrb.mxu1 %v215_v21 }
  0x6d   : > { %1392 = vmatpush.msrb.mxu2 %v186_v24  ;;  %1403 = vmatpush.msrb.mxu3 %v187_v25 }
  0x6e   : > { %638 = vmatpush.msrb.mxu0 %v200_v22  ;;  %661 = vmatpush.msrb.mxu1 %v201_v23 }
  0x6f   : > { %1393 = vmatpush.msrb.mxu2 %v172_v26  ;;  %1404 = vmatpush.msrb.mxu3 %v173_v27 }
  0x70   : > { %639 = vmatpush.msrb.mxu0 %v186_v24  ;;  %662 = vmatpush.msrb.mxu1 %v187_v25 }
  0x71   : > { %1394 = vmatpush.msrb.mxu2 %v158_v28  ;;  %1405 = vmatpush.msrb.mxu3 %v159_v29 }
  0x72   : > { %1377 = vmatmul.msk.f32.vlgmr.msrb.gmra.mxu2 %vm300_vm1, %v1634_v61  ;;  %1380 = vmatmul.msk.f32.vlgmr.msrb.gmra.mxu3 %vm300_vm1, %v1634_v61 }
  0x73   : > { %640 = vmatpush.msrb.mxu0 %v172_v26  ;;  %663 = vmatpush.msrb.mxu1 %v173_v27 }
  0x75   : > { %641 = vmatpush.msrb.mxu0 %v158_v28  ;;  %664 = vmatpush.msrb.mxu1 %v159_v29 }
  0x76   : > { %1376 = vmatmul.msk.f32.vlgmr.msrb.gmra.mxu0 %vm300_vm1, %v1601_v44  ;;  %1379 = vmatmul.msk.f32.vlgmr.msrb.gmra.mxu1 %vm300_vm1, %v1601_v44 }
  0xa3   : > { %v367_v30 = vpop.f32.mrf.mxu0  ;;  %v390_v31 = vpop.f32.mrf.mxu1 }
  0xaa   : > { %v413_v32 = vpop.f32.mrf.mxu2  ;;  %v436_v33 = vpop.f32.mrf.mxu3 }
  0xad   : > { %v370_v34 = vpop.f32.mrf.mxu0  ;;  %v393_v35 = vpop.f32.mrf.mxu1 }
  0xae   : > { %v672_v36 = vmax.f32 %v367_v30, %v370_v34  ;;  %v679_v37 = vmax.f32 %v390_v31, %v393_v35 }
  0xb0   : > { %v673_v38 = vrot.slane %v672_v36, 4  ;;  %v680_v61 = vrot.slane %v679_v37, 4 }
  0xb2   : > { %v674_v39 = vmax.f32 %v672_v36, %v673_v38  ;;  %v681_v40 = vmax.f32 %v679_v37, %v680_v61 }
  0xb4   : > { %v675_v41 = vrot.slane %v674_v39, 2  ;;  %v682_v42 = vrot.slane %v681_v40, 2  ;;  %v416_v43 = vpop.f32.mrf.mxu2  ;;  %v439_v45 = vpop.f32.mrf.mxu3 }
  0xb5   : > { %v686_v46 = vmax.f32 %v413_v32, %v416_v43  ;;  %v693_v47 = vmax.f32 %v436_v33, %v439_v45 }
  0xb6   : > { %v676_v48 = vmax.f32 %v674_v39, %v675_v41  ;;  %v683_v44 = vmax.f32 %v681_v40, %v682_v42 }
  0xb7   : > { %v687_v49 = vrot.slane %v686_v46, 4  ;;  %v694_v50 = vrot.slane %v693_v47, 4 }
  0xb8   : > { %v677_v51 = vrot.slane %v676_v48, 1  ;;  %v684_v52 = vrot.slane %v683_v44, 1 }
  0xb9   : > { %v688_v53 = vmax.f32 %v686_v46, %v687_v49  ;;  %v695_v54 = vmax.f32 %v693_v47, %v694_v50 }
  0xba   : > { %v678_v55 = vmax.f32 %v676_v48, %v677_v51  ;;  %v685_v56 = vmax.f32 %v683_v44, %v684_v52 }
  0xbb   : > { %v689_v57 = vrot.slane %v688_v53, 2  ;;  %v696_v58 = vrot.slane %v695_v54, 2 }
  0xbc   : > { %v773_v59 = vsub.f32 %v367_v30, %v678_v55  ;;  %v787_v60 = vsub.f32 %v370_v34, %v678_v55  ;;  %v774_v62 = vsub.f32 %v390_v31, %v685_v56  ;;  %v788_v63 = vsub.f32 %v393_v35, %v685_v56 }
  0xbd   : > { %v690_v0 = vmax.f32 %v688_v53, %v689_v57  ;;  %v697_v1 = vmax.f32 %v695_v54, %v696_v58  ;;  %v1786_v2 = vpop.f32.mrf.mxu0  ;;  %v1788_v3 = vpop.f32.mrf.mxu1 }
  0xbe   : > { %v801_v4 = vmul.f32 1.442695, %v773_v59  ;;  %v829_v5 = vmul.f32 1.442695, %v787_v60  ;;  %v803_v6 = vmul.f32 1.442695, %v774_v62 }
  0xbf   : > { %v831_v7 = vmul.f32 1.442695, %v788_v63  ;;  %v691_v8 = vrot.slane %v690_v0, 1  ;;  %v698_v9 = vrot.slane %v697_v1, 1 }
  0xc0   : > { %1421 = vpow2.f32 %v801_v4 }
  0xc1   : > { %1423 = vpow2.f32 %v829_v5  ;;  %v692_v10 = vmax.f32 %v690_v0, %v691_v8  ;;  %v699_v11 = vmax.f32 %v697_v1, %v698_v9 }
  0xc2   : > { %1425 = vpow2.f32 %v803_v6 }
  0xc3   : > { %1427 = vpow2.f32 %v831_v7  ;;  %v775_v12 = vsub.f32 %v413_v32, %v692_v10  ;;  %v789_v13 = vsub.f32 %v416_v43, %v692_v10  ;;  %v776_v14 = vsub.f32 %v436_v33, %v699_v11 }
  0xc4   : > { %v790_v15 = vsub.f32 %v439_v45, %v699_v11  ;;  %v1790_v16 = vpop.f32.mrf.mxu2  ;;  %v1792_v17 = vpop.f32.mrf.mxu3 }
  0xc5   : > { %v805_v18 = vmul.f32 1.442695, %v775_v12  ;;  %v833_v19 = vmul.f32 1.442695, %v789_v13  ;;  %v807_v20 = vmul.f32 1.442695, %v776_v14 }
  0xc6   : > { %v1794_v21 = vpop.eup %1421  ;;  %v835_v22 = vmul.f32 1.442695, %v790_v15 }
  0xc7   : > { %v1796_v23 = vpop.eup %1423  ;;  %1429 = vpow2.f32 %v805_v18  ;;  %v462_v24 = vpop.f32.mrf.mxu0 }
  0xc8   : > { %v1798_v25 = vpop.f32.mrf.mxu1  ;;  %v1800_v26 = vpop.eup %1425  ;;  %v857_v27 = vadd.f32 %v1796_v23, %v1794_v21  ;;  %1431 = vpow2.f32 %v833_v19  ;;  %v700_v28 = vmax.f32 %v1786_v2, %v462_v24 }
  0xc9   : > { %v707_v29 = vmax.f32 %v1788_v3, %v1798_v25  ;;  %v1807_v30 = vpop.eup %1427  ;;  %1433 = vpow2.f32 %v807_v20 }
  0xca   : > { %v864_v31 = vadd.f32 %v1807_v30, %v1800_v26  ;;  %1435 = vpow2.f32 %v835_v22  ;;  %v701_v32 = vrot.slane %v700_v28, 4  ;;  %v858_v52 = vrot.slane %v857_v27, 4 }
  0xcb   : > { %v708_v33 = vrot.slane %v707_v29, 4 }
  0xcc   : > { %v702_v34 = vmax.f32 %v700_v28, %v701_v32  ;;  %v865_v49 = vrot.slane %v864_v31, 4  ;;  %v859_v4 = vadd.f32 %v858_v52, %v857_v27 }
  0xcd   : > { %v1811_v35 = vpop.eup %1429  ;;  %v709_v36 = vmax.f32 %v707_v29, %v708_v33 }
  0xce   : > { %v1813_v37 = vpop.eup %1431  ;;  %v703_v38 = vrot.slane %v702_v34, 2  ;;  %v1815_v61 = vpop.f32.mrf.mxu2  ;;  %v866_v62 = vadd.f32 %v865_v49, %v864_v31  ;;  %v860_v19 = vrot.slane %v859_v4, 2 }
  0xcf   : > { %v531_v39 = vpop.f32.mrf.mxu3  ;;  %v1817_v40 = vpop.eup %1433  ;;  %v871_v41 = vadd.f32 %v1813_v37, %v1811_v35  ;;  %v714_v46 = vmax.f32 %v1790_v16, %v1815_v61  ;;  %v710_v44 = vrot.slane %v709_v36, 2 }
  0xd0   : > { %v721_v42 = vmax.f32 %v1792_v17, %v531_v39  ;;  %v1822_v43 = vpop.eup %1435  ;;  %v704_v45 = vmax.f32 %v702_v34, %v703_v38  ;;  %v867_v14 = vrot.slane %v866_v62, 2  ;;  %v861_v38 = vadd.f32 %v860_v19, %v859_v4 }
  0xd1   : > { %v872_v47 = vrot.slane %v871_v41, 4  ;;  %v878_v48 = vadd.f32 %v1822_v43, %v1817_v40  ;;  %v715_v56 = vrot.slane %v714_v46, 4  ;;  %v711_v60 = vmax.f32 %v709_v36, %v710_v44 }
  0xd2   : > { %v705_v50 = vrot.slane %v704_v45, 1  ;;  %v722_v51 = vrot.slane %v721_v42, 4  ;;  %v868_v36 = vadd.f32 %v867_v14, %v866_v62 }
  0xd3   : > { %v873_v53 = vadd.f32 %v872_v47, %v871_v41  ;;  %v879_v54 = vrot.slane %v878_v48, 4  ;;  %v716_v10 = vmax.f32 %v714_v46, %v715_v56  ;;  %v712_v12 = vrot.slane %v711_v60, 1 }
  0xd4   : > { %v706_v55 = vmax.f32 %v704_v45, %v705_v50  ;;  %v723_v57 = vmax.f32 %v721_v42, %v722_v51  ;;  %v869_v51 = vrot.slane %v868_v36, 1 }
  0xd5   : > { %v874_v58 = vrot.slane %v873_v53, 2  ;;  %v880_v59 = vadd.f32 %v879_v54, %v878_v48  ;;  %v717_v20 = vrot.slane %v716_v10, 2  ;;  %v713_v27 = vmax.f32 %v711_v60, %v712_v12 }
  0xd6   : > { %v777_v63 = vsub.f32 %v1786_v2, %v706_v55  ;;  %v791_v0 = vsub.f32 %v462_v24, %v706_v55  ;;  %v724_v1 = vrot.slane %v723_v57, 2  ;;  %v862_v54 = vrot.slane %v861_v38, 1 }
  0xd7   : > { %v881_v5 = vrot.slane %v880_v59, 2  ;;  %v1829_v6 = vpop.f32.mrf.mxu0  ;;  %v1831_v7 = vpop.f32.mrf.mxu1  ;;  %v875_v13 = vadd.f32 %v874_v58, %v873_v53  ;;  %v718_v42 = vmax.f32 %v716_v10, %v717_v20  ;;  %v792_v55 = vsub.f32 %v1798_v25, %v713_v27 }
  0xd8   : > { %v809_v8 = vmul.f32 1.442695, %v777_v63  ;;  %v837_v9 = vmul.f32 1.442695, %v791_v0  ;;  %v725_v11 = vmax.f32 %v723_v57, %v724_v1  ;;  %v1856_v62 = vadd.f32 %v869_v51, %v868_v36 }
  0xd9   : > { %v882_v18 = vadd.f32 %v881_v5, %v880_v59  ;;  %v876_v2 = vrot.slane %v875_v13, 1  ;;  %v719_v56 = vrot.slane %v718_v42, 1 }
  0xda   : > { %1437 = vpow2.f32 %v809_v8  ;;  %v726_v15 = vrot.slane %v725_v11, 1  ;;  %v1862_v8 = vadd.f32 %v862_v54, %v861_v38 }
  0xdb   : > { %1439 = vpow2.f32 %v837_v9  ;;  %v883_v24 = vrot.slane %v882_v18, 1  ;;  %v877_v28 = vadd.f32 %v876_v2, %v875_v13  ;;  %v839_v9 = vmul.f32 1.442695, %v792_v55 }
  0xdc   : > { %v727_v22 = vmax.f32 %v725_v11, %v726_v15  ;;  %v1864_v25 = vmax.f32 %v718_v42, %v719_v56 }
  0xdd   : > { %v884_v34 = vadd.f32 %v883_v24, %v882_v18  ;;  %1441 = vrcp.f32 %v877_v28 }
  0xde   : > { %v780_v29 = vsub.f32 %v1792_v17, %v727_v22  ;;  %v794_v31 = vsub.f32 %v531_v39, %v727_v22  ;;  %v1834_v32 = vpop.f32.mrf.mxu2  ;;  %v1836_v33 = vpop.f32.mrf.mxu3  ;;  %v778_v39 = vsub.f32 %v1788_v3, %v713_v27 }
  0xdf   : > { %1443 = vrcp.f32 %v884_v34 }
  0xe0   : > { %v1838_v41 = vpop.eup %1437  ;;  %v815_v45 = vmul.f32 1.442695, %v780_v29  ;;  %v843_v46 = vmul.f32 1.442695, %v794_v31  ;;  %v1840_v47 = vpop.f32.mrf.mxu0  ;;  %v811_v57 = vmul.f32 1.442695, %v778_v39 }
  0xe1   : > { %v1842_v48 = vpop.f32.mrf.mxu1  ;;  %v1844_v17 = vpop.eup %1439  ;;  %v728_v44 = vmax.f32 %v1829_v6, %v1840_v47 }
  0xe2   : > { %v735_v49 = vmax.f32 %v1831_v7, %v1842_v48  ;;  %v1853_v50 = vadd.f32 %v1844_v17, %v1838_v41  ;;  %1445 = vpow2.f32 %v815_v45 }
  0xe3   : > { %v729_v52 = vrot.slane %v728_v44, 4  ;;  %1447 = vpow2.f32 %v843_v46  ;;  %v1442_v3 = vpop.eup %1441  ;;  %v793_v46 = vsub.f32 %v1815_v61, %v1864_v25 }
  0xe4   : > { %v736_v53 = vrot.slane %v735_v49, 4  ;;  %v973_v5 = vmul.f32 %v1442_v3, %v877_v28  ;;  %1449 = vpow2.f32 %v811_v57  ;;  %v779_v28 = vsub.f32 %v1790_v16, %v1864_v25 }
  0xe5   : > { %v730_v58 = vmax.f32 %v728_v44, %v729_v52  ;;  %v1444_v60 = vpop.eup %1443  ;;  %1451 = vrcp.f32 %v1856_v62  ;;  %v886_v45 = vrot.slane %v1853_v50, 4 }
  0xe6   : > { %v737_v59 = vmax.f32 %v735_v49, %v736_v53  ;;  %v974_v15 = vmul.f32 %v1444_v60, %v884_v34  ;;  %v987_v27 = vsub.f32 2.0, %v973_v5  ;;  %1453 = vpow2.f32 %v839_v9 }
  0xe7   : > { %v731_v63 = vrot.slane %v730_v58, 2  ;;  %v1858_v1 = vpop.f32.mrf.mxu2  ;;  %v1860_v4 = vpop.f32.mrf.mxu3  ;;  %1455 = vrcp.f32 %v1862_v8 }
  0xe8   : > { %v738_v0 = vrot.slane %v737_v59, 2  ;;  %v742_v10 = vmax.f32 %v1834_v32, %v1858_v1  ;;  %v749_v11 = vmax.f32 %v1836_v33, %v1860_v4  ;;  %v1870_v12 = vpop.eup %1445  ;;  %v988_v42 = vsub.f32 2.0, %v974_v15 }
  0xe9   : > { %v732_v13 = vmax.f32 %v730_v58, %v731_v63  ;;  %v1872_v18 = vpop.eup %1447  ;;  %v1001_v53 = vmul.f32 %v1442_v3, %v987_v27 }
  0xea   : > { %v739_v14 = vmax.f32 %v737_v59, %v738_v0  ;;  %v743_v19 = vrot.slane %v742_v10, 4  ;;  %v750_v2 = vrot.slane %v749_v11, 4  ;;  %v906_v20 = vadd.f32 %v1872_v18, %v1870_v12  ;;  %v1882_v49 = vpop.eup %1449 }
  0xeb   : > { %v733_v22 = vrot.slane %v732_v13, 1  ;;  %v1452_v54 = vpop.eup %1451  ;;  %v1002_v63 = vmul.f32 %v1444_v60, %v988_v42 }
  0xec   : > { %v740_v24 = vrot.slane %v739_v14, 1  ;;  %v744_v29 = vmax.f32 %v742_v10, %v743_v19  ;;  %v751_v31 = vmax.f32 %v749_v11, %v750_v2  ;;  %v907_v34 = vrot.slane %v906_v20, 4  ;;  %v1889_v0 = vpop.eup %1453 }
  0xed   : > { %v734_v36 = vmax.f32 %v732_v13, %v733_v22  ;;  %v972_v60 = vmul.f32 %v1452_v54, %v1856_v62  ;;  %v813_v13 = vmul.f32 1.442695, %v779_v28  ;;  %v1907_v19 = vmul.f32 %v1822_v43, %v1002_v63 }
  0xee   : > { %v741_v38 = vmax.f32 %v739_v14, %v740_v24  ;;  %v745_v39 = vrot.slane %v744_v29, 2  ;;  %v752_v44 = vrot.slane %v751_v31, 2  ;;  %v908_v51 = vadd.f32 %v907_v34, %v906_v20 }
  0xef   : > { %v781_v52 = vsub.f32 %v1829_v6, %v734_v36  ;;  %v795_v16 = vsub.f32 %v1840_v47, %v734_v36  ;;  %v887_v47 = vadd.f32 %v886_v45, %v1853_v50  ;;  %v841_v2 = vmul.f32 1.442695, %v793_v46 }
  0xf0   : > { %v782_v55 = vsub.f32 %v1831_v7, %v741_v38  ;;  %v796_v56 = vsub.f32 %v1842_v48, %v741_v38  ;;  %v753_v57 = vmax.f32 %v751_v31, %v752_v44  ;;  %v909_v58 = vrot.slane %v908_v51, 2 }
  0xf1   : > { %v817_v61 = vmul.f32 1.442695, %v781_v52  ;;  %v845_v59 = vmul.f32 1.442695, %v795_v16  ;;  %v746_v6 = vmax.f32 %v744_v29, %v745_v39  ;;  %v1895_v7 = vmul.f32 %v1813_v37, %v1001_v53  ;;  %v1909_v37 = vpop.eup %1455 }
  0xf2   : > { %v819_v5 = vmul.f32 1.442695, %v782_v55  ;;  %v847_v9 = vmul.f32 1.442695, %v796_v56  ;;  %v754_v25 = vrot.slane %v753_v57, 1  ;;  %v910_v11 = vadd.f32 %v909_v58, %v908_v51 }
  0xf3   : > { %1457 = vpow2.f32 %v817_v61  ;;  %v1892_v3 = vpop.f32.mrf.mxu1  ;;  %v1897_v10 = vpop.f32.mrf.mxu0  ;;  %v747_v20 = vrot.slane %v746_v6, 1  ;;  %v888_v62 = vrot.slane %v887_v47, 2  ;;  %v986_v34 = vsub.f32 2.0, %v972_v60 }
  0xf4   : > { %1459 = vpow2.f32 %v845_v59  ;;  %v755_v48 = vmax.f32 %v753_v57, %v754_v25  ;;  %v764_v50 = vsel %vm763_vm2, %v1892_v3, -inf  ;;  %v911_v43 = vrot.slane %v910_v11, 1 }
  0xf5   : > { %1461 = vpow2.f32 %v819_v5  ;;  %v1900_v14 = vpop.f32.mrf.mxu2  ;;  %v1904_v15 = vpop.f32.mrf.mxu3  ;;  %v1925_v39 = vmul.f32 %v1817_v40, %v1002_v63  ;;  %v889_v16 = vadd.f32 %v888_v62, %v887_v47  ;;  %v1933_v58 = vmul.f32 %v1452_v54, %v986_v34 }
  0xf6   : > { %1463 = vpow2.f32 %v847_v9  ;;  %v784_v22 = vsub.f32 %v1836_v33, %v755_v48  ;;  %v798_v24 = vsub.f32 %v1860_v4, %v755_v48  ;;  %v756_v27 = vmax.f32 %v1897_v10, %v1900_v14 }
  0xf7   : > { %v765_v28 = vsel %vm763_vm2, %v1904_v15, -inf  ;;  %1465 = vpow2.f32 %v813_v13  ;;  %v748_v33 = vmax.f32 %v746_v6, %v747_v20  ;;  %v1922_v4 = vmul.f32 %v1811_v35, %v1001_v53 }
  0xf8   : > { %v823_v29 = vmul.f32 1.442695, %v784_v22  ;;  %v766_v31 = vmax.f32 %v764_v50, %v765_v28  ;;  %v851_v38 = vmul.f32 1.442695, %v798_v24  ;;  %v757_v42 = vrot.slane %v756_v27, 4 }
  0xf9   : > { %v1917_v36 = vpop.eup %1457  ;;  %1467 = vpow2.f32 %v841_v2  ;;  %v912_v57 = vadd.f32 %v911_v43, %v910_v11  ;;  %v892_v61 = vadd.f32 %v1889_v0, %v1882_v49  ;;  %v783_v59 = vsub.f32 %v1834_v32, %v748_v33 }
  0xfa   : > { %v1919_v45 = vpop.eup %1459  ;;  %v767_v46 = vrot.slane %v766_v31, 4  ;;  %v758_v52 = vmax.f32 %v756_v27, %v757_v42  ;;  %1469 = vpow2.f32 %v823_v29  ;;  %v890_v5 = vrot.slane %v889_v16, 1 }
  0xfb   : > { %v1927_v44 = vpop.eup %1461  ;;  %v913_v51 = vadd.f32 %v1919_v45, %v1917_v36  ;;  %1471 = vpow2.f32 %v851_v38  ;;  %v797_v54 = vsub.f32 %v1858_v1, %v748_v33  ;;  %v1945_v60 = vmul.f32 %v1800_v26, %v1933_v58 }
  0xfc   : > { %v1931_v55 = vpop.eup %1463  ;;  %v768_v56 = vmax.f32 %v766_v31, %v767_v46  ;;  %v759_v53 = vrot.slane %v758_v52, 2  ;;  %v891_v11 = vadd.f32 %v890_v5, %v889_v16  ;;  %v971_v13 = vmul.f32 %v1909_v37, %v1862_v8 }
  0xfd   : > { %v914_v35 = vrot.slane %v913_v51, 4  ;;  %v920_v40 = vadd.f32 %v1931_v55, %v1927_v44  ;;  %v1940_v9 = vpop.eup %1465  ;;  %1473 = vrcp.f32 %v912_v57  ;;  %v893_v62 = vrot.slane %v892_v61, 4 }
  0xfe   : > { %v769_v63 = vrot.slane %v768_v56, 2  ;;  %v760_v47 = vmax.f32 %v758_v52, %v759_v53  ;;  %v821_v28 = vmul.f32 1.442695, %v783_v59  ;;  %v849_v26 = vmul.f32 1.442695, %v797_v54 }
  0xff   : > { %v915_v6 = vadd.f32 %v914_v35, %v913_v51  ;;  %v921_v25 = vrot.slane %v920_v40, 4  ;;  %v1949_v50 = vpop.eup %1467  ;;  %1475 = vrcp.f32 %v891_v11  ;;  %v985_v42 = vsub.f32 2.0, %v971_v13 }
 0x100   : > { %v770_v48 = vmax.f32 %v768_v56, %v769_v63  ;;  %v761_v20 = vrot.slane %v760_v47, 1  ;;  %v1951_v22 = vpop.eup %1469  ;;  %v894_v33 = vadd.f32 %v893_v62, %v892_v61  ;;  %1477 = vpow2.f32 %v821_v28 }
 0x101   : > { %v916_v32 = vrot.slane %v915_v6, 2  ;;  %v922_v2 = vadd.f32 %v921_v25, %v920_v40  ;;  %v1953_v24 = vpop.eup %1471  ;;  %1479 = vpow2.f32 %v849_v26  ;;  %v999_v5 = vmul.f32 %v1909_v37, %v985_v42 }
 0x102   : > { %v771_v1 = vrot.slane %v770_v48, 1  ;;  %v762_v29 = vmax.f32 %v760_v47, %v761_v20  ;;  %v934_v31 = vadd.f32 %v1953_v24, %v1951_v22  ;;  %v895_v54 = vrot.slane %v894_v33, 2 }
 0x103   : > { %v923_v27 = vrot.slane %v922_v2, 2  ;;  %v917_v38 = vadd.f32 %v916_v32, %v915_v6  ;;  %v1474_v16 = vpop.eup %1473  ;;  %v1967_v37 = vmul.f32 %v1794_v21, %v999_v5  ;;  %v1978_v26 = vmul.f32 %v1807_v30, %v1933_v58 }
 0x104   : > { %v772_v8 = vmax.f32 %v770_v48, %v771_v1  ;;  %v785_v43 = vsub.f32 %v1897_v10, %v762_v29  ;;  %v799_v34 = vsub.f32 %v1900_v14, %v762_v29  ;;  %v935_v46 = vrot.slane %v934_v31, 4 }
 0x105   : > { %v924_v40 = vadd.f32 %v923_v27, %v922_v2  ;;  %v918_v14 = vrot.slane %v917_v38, 1  ;;  %v1476_v61 = vpop.eup %1475  ;;  %v978_v6 = vmul.f32 %v1474_v16, %v912_v57  ;;  %v1972_v57 = vmul.f32 %v1796_v23, %v999_v5 }
 0x106   : > { %v786_v51 = vsub.f32 %v1892_v3, %v772_v8  ;;  %v800_v52 = vsub.f32 %v1904_v15, %v772_v8  ;;  %v825_v56 = vmul.f32 1.442695, %v785_v43  ;;  %v853_v35 = vmul.f32 1.442695, %v799_v34  ;;  %v1964_v13 = vpop.eup %1477 }
 0x107   : > { %v936_v53 = vadd.f32 %v935_v46, %v934_v31  ;;  %v925_v10 = vrot.slane %v924_v40, 1  ;;  %v899_v3 = vadd.f32 %v1949_v50, %v1940_v9  ;;  %v919_v48 = vadd.f32 %v918_v14, %v917_v38  ;;  %v1969_v20 = vpop.eup %1479 }
 0x108   : > { %v827_v59 = vmul.f32 1.442695, %v786_v51  ;;  %v855_v63 = vmul.f32 1.442695, %v800_v52  ;;  %1481 = vpow2.f32 %v825_v56  ;;  %v992_v32 = vsub.f32 2.0, %v978_v6 }
 0x109   : > { %1483 = vpow2.f32 %v853_v35  ;;  %v937_v15 = vrot.slane %v936_v53, 2  ;;  %v926_v25 = vadd.f32 %v925_v10, %v924_v40  ;;  %v975_v2 = vmul.f32 %v1476_v61, %v891_v11 }
 0x10a   : > { %1485 = vpow2.f32 %v827_v59  ;;  %v900_v62 = vrot.slane %v899_v3, 4  ;;  %v1006_v28 = vmul.f32 %v1474_v16, %v992_v32  ;;  %v896_v31 = vadd.f32 %v895_v54, %v894_v33 }
 0x10b   : > { %1487 = vpow2.f32 %v855_v63  ;;  %v938_v47 = vadd.f32 %v937_v15, %v936_v53  ;;  %v989_v29 = vsub.f32 2.0, %v975_v2  ;;  %v927_v58 = vadd.f32 %v1969_v20, %v1964_v13 }
 0x10c   : > { %1489 = vrcp.f32 %v926_v25  ;;  %v1987_v23 = vmul.f32 %v1872_v18, %v1006_v28  ;;  %v1990_v38 = vmul.f32 %v1870_v12, %v1006_v28  ;;  %v901_v30 = vadd.f32 %v900_v62, %v899_v3 }
 0x10d   : > { %v939_v1 = vrot.slane %v938_v47, 1  ;;  %1491 = vrcp.f32 %v919_v48  ;;  %v1003_v34 = vmul.f32 %v1476_v61, %v989_v29  ;;  %v897_v53 = vrot.slane %v896_v31, 1 }
 0x10e   : > { %v1974_v27 = vpop.eup %1481  ;;  %v902_v63 = vrot.slane %v901_v30, 2  ;;  %v928_v5 = vrot.slane %v927_v58, 4 }
 0x10f   : > { %v1980_v11 = vpop.eup %1483  ;;  %v940_v21 = vadd.f32 %v939_v1, %v938_v47  ;;  %v2001_v52 = vmul.f32 %v1838_v41, %v1003_v34  ;;  %v2004_v12 = vmul.f32 %v1844_v17, %v1003_v34  ;;  %v898_v32 = vadd.f32 %v897_v53, %v896_v31 }
 0x110   : > { %v1982_v8 = vpop.eup %1485  ;;  %v941_v43 = vadd.f32 %v1980_v11, %v1974_v27  ;;  %v903_v62 = vadd.f32 %v902_v63, %v901_v30  ;;  %v929_v1 = vadd.f32 %v928_v5, %v927_v58 }
 0x111   : > { %v1992_v42 = vpop.eup %1487  ;;  %v948_v33 = vsel %vm763_vm2, %v1982_v8, 0.0  ;;  %1493 = vrcp.f32 %v940_v21 }
 0x112   : > { %v1490_v46 = vpop.eup %1489  ;;  %v942_v51 = vrot.slane %v941_v43, 4  ;;  %v949_v18 = vsel %vm763_vm2, %v1992_v42, 0.0  ;;  %1495 = vrcp.f32 %v898_v32  ;;  %v930_v30 = vrot.slane %v929_v1, 2 }
 0x113   : > { %v1492_v16 = vpop.eup %1491  ;;  %v950_v56 = vadd.f32 %v949_v18, %v948_v33  ;;  %v980_v35 = vmul.f32 %v1490_v46, %v926_v25 }
 0x114   : > { %v943_v40 = vadd.f32 %v942_v51, %v941_v43  ;;  %v979_v59 = vmul.f32 %v1492_v16, %v919_v48  ;;  %v931_v58 = vadd.f32 %v930_v30, %v929_v1 }
 0x115   : > { %v951_v10 = vrot.slane %v950_v56, 4  ;;  %v994_v14 = vsub.f32 2.0, %v980_v35 }
 0x116   : > { %v944_v61 = vrot.slane %v943_v40, 2  ;;  %v993_v3 = vsub.f32 2.0, %v979_v59 }
 0x117   : > { %v1494_v15 = vpop.eup %1493  ;;  %v952_v6 = vadd.f32 %v951_v10, %v950_v56  ;;  %v1008_v54 = vmul.f32 %v1490_v46, %v994_v14  ;;  %v932_v56 = vrot.slane %v931_v58, 1 }
 0x118   : > { %v982_v41 = vmul.f32 %v1494_v15, %v940_v21  ;;  %v945_v47 = vadd.f32 %v944_v61, %v943_v40  ;;  %v1007_v17 = vmul.f32 %v1492_v16, %v993_v3  ;;  %v1496_v18 = vpop.eup %1495 }
 0x119   : > { %v953_v2 = vrot.slane %v952_v6, 2  ;;  %v2007_v25 = vmul.f32 %v1931_v55, %v1008_v54  ;;  %v2010_v48 = vmul.f32 %v1927_v44, %v1008_v54  ;;  %v904_v44 = vrot.slane %v903_v62, 1 }
 0x11a   : > { %v996_v28 = vsub.f32 2.0, %v982_v41  ;;  %v946_v29 = vrot.slane %v945_v47, 1  ;;  %v2013_v43 = vmul.f32 %v1917_v36, %v1007_v17  ;;  %v2016_v21 = vmul.f32 %v1919_v45, %v1007_v17 }
 0x11b   : > { %v954_v34 = vadd.f32 %v953_v2, %v952_v6  ;;  %v905_v36 = vadd.f32 %v904_v44, %v903_v62  ;;  %v976_v53 = vmul.f32 %v1496_v18, %v898_v32  ;;  %v933_v10 = vadd.f32 %v932_v56, %v931_v58 }
 0x11c   : > { %v1010_v31 = vmul.f32 %v1494_v15, %v996_v28  ;;  %v947_v33 = vadd.f32 %v946_v29, %v945_v47 }
 0x11d   : > { %v955_v46 = vrot.slane %v954_v34, 1  ;;  %v990_v61 = vsub.f32 2.0, %v976_v53 }
 0x11e   : > { %v1024_v55 = vmul.f32 %v1951_v22, %v1010_v31  ;;  %1497 = vrcp.f32 %v947_v33  ;;  %v1038_v17 = vmul.f32 %v1953_v24, %v1010_v31 }
 0x11f   : > { %v956_v51 = vadd.f32 %v955_v46, %v954_v34  ;;  %v1004_v54 = vmul.f32 %v1496_v18, %v990_v61 }
 0x120   : > { %1098 = vrot.lane.b32.xlu0 %v1024_v55, %s1513_s19 }
 0x121   : > { %1499 = vrcp.f32 %v956_v51 }
 0x122   : > { %1501 = vrcp.f32 %v905_v36 }
 0x123   : > { %1503 = vrcp.f32 %v933_v10 }
 0x124   : > { %v1498_v16 = vpop.eup %1497 }
 0x125   : > { %v983_v45 = vmul.f32 %v1498_v16, %v947_v33 }
 0x127   : > { %v1500_v35 = vpop.eup %1499  ;;  %v997_v40 = vsub.f32 2.0, %v983_v45 }
 0x128   : > { %v984_v59 = vmul.f32 %v1500_v35, %v956_v51  ;;  %v1502_v3 = vpop.eup %1501 }
 0x129   : > { %v1011_v63 = vmul.f32 %v1498_v16, %v997_v40  ;;  %v977_v41 = vmul.f32 %v1502_v3, %v905_v36 }
 0x12a   : > { %v998_v22 = vsub.f32 2.0, %v984_v59 }
 0x12b   : > { %v1039_v14 = vmul.f32 %v1980_v11, %v1011_v63  ;;  %v1025_v5 = vmul.f32 %v1974_v27, %v1011_v63  ;;  %v1018_v11 = vmul.f32 %v1882_v49, %v1004_v54  ;;  %v991_v32 = vsub.f32 2.0, %v977_v41  ;;  %v1504_v27 = vpop.eup %1503 }
 0x12c   : > { %v1012_v15 = vmul.f32 %v1500_v35, %v998_v22  ;;  %v981_v62 = vmul.f32 %v1504_v27, %v933_v10 }
 0x12d   : > { %1108 = vrot.lane.b32.xlu2 %v1039_v14, %s1513_s19  ;;  %1100 = vrot.lane.b32.xlu0 %v1025_v5, %s1513_s19  ;;  %v1005_v2 = vmul.f32 %v1502_v3, %v991_v32 }
 0x12e   : > { %v1026_v6 = vmul.f32 %v1982_v8, %v1012_v15  ;;  %v1040_v47 = vmul.f32 %v1992_v42, %v1012_v15  ;;  %v1032_v8 = vmul.f32 %v1889_v0, %v1004_v54  ;;  %v995_v28 = vsub.f32 2.0, %v981_v62 }
 0x12f   : > { %v1033_v1 = vmul.f32 %v1949_v50, %v1005_v2  ;;  %v1019_v49 = vmul.f32 %v1940_v9, %v1005_v2 }
 0x130   : > { %1102 = vrot.lane.b32.xlu1 %v1026_v6, %s1513_s19  ;;  %v1009_v42 = vmul.f32 %v1504_v27, %v995_v28 }
 0x132   : > { %v1037_v24 = vmul.f32 %v1969_v20, %v1009_v42  ;;  %v1023_v29 = vmul.f32 %v1964_v13, %v1009_v42 }
 0x135   : > { %1110 = vrot.lane.b32.xlu2 %v1040_v47, %s1513_s19  ;;  %1053 = vrot.lane.b32.xlu0 %v1018_v11, %s1513_s19 }
 0x138   : > { %1106 = vrot.lane.b32.xlu1 %v1038_v17, %s1513_s19 }
 0x13d   : > { %1061 = vrot.lane.b32.xlu2 %v1032_v8, %s1513_s19  ;;  %1063 = vrot.lane.b32.xlu0 %v1033_v1, %s1513_s19 }
 0x140   : > { %1055 = vrot.lane.b32.xlu1 %v1019_v49, %s1513_s19 }
 0x145   : > { %1104 = vrot.lane.b32.xlu2 %v1037_v24, %s1513_s19 }
 0x148   : > { %1096 = vrot.lane.b32.xlu1 %v1023_v29, %s1513_s19 }
 0x187   : > { %v1109_v50 = vpop.permute.xlu2 %1108 }
 0x18f   : > { %v1111_v13 = vpop.permute.xlu2 %1110 }
 0x190   : > { %v1117_v55 = vsel %vm1065_vm3, %v1109_v50, %v1111_v13  ;;  %v1137_v51 = vmax.f32 %v1037_v24, %v1111_v13 }
 0x191   : > { %v1136_v36 = vmax.f32 %v2007_v25, %v1117_v55 }
 0x192   : > { %v1099_v0 = vpop.permute.xlu0 %1098 }
 0x197   : > { %v1062_v25 = vpop.permute.xlu2 %1061 }
 0x19f   : > { %v1101_v34 = vpop.permute.xlu0 %1100 }
 0x1a0   : > { %v1113_v31 = vsel %vm1065_vm3, %v1099_v0, %v1101_v34 }
 0x1a1   : > { %v1130_v33 = vmax.f32 %v2013_v43, %v1113_v31 }
 0x1a2   : > { %v1103_v9 = vpop.permute.xlu1 %1102 }
 0x1a3   : > { %v1114_v46 = vsel %vm1065_vm3, %v1101_v34, %v1103_v9  ;;  %v1132_v30 = vmax.f32 %v1023_v29, %v1103_v9  ;;  %1152 = vrot.lane.b32.xlu0 %v1130_v33, %s1514_s20 }
 0x1a4   : > { %v1131_v20 = vmax.f32 %v2010_v48, %v1114_v46 }
 0x1a5   : > { %1156 = vrot.lane.b32.xlu2 %v1132_v30, %s1514_s20 }
 0x1a6   : > { %1154 = vrot.lane.b32.xlu1 %v1131_v20, %s1514_s20 }
 0x1a7   : > { %v1054_v48 = vpop.permute.xlu0 %1053 }
 0x1aa   : > { %v1107_v44 = vpop.permute.xlu1 %1106 }
 0x1ab   : > { %v1116_v43 = vsel %vm1065_vm3, %v1107_v44, %v1109_v50 }
 0x1ac   : > { %v1135_v58 = vmax.f32 %v2016_v21, %v1116_v43 }
 0x1ad   : > { %1166 = vrot.lane.b32.xlu2 %v1137_v51, %s1514_s20 }
 0x1ae   : > { %1164 = vrot.lane.b32.xlu1 %v1136_v36, %s1514_s20  ;;  %1162 = vrot.lane.b32.xlu0 %v1135_v58, %s1514_s20 }
 0x1af   : > { %v1064_v22 = vpop.permute.xlu0 %1063 }
 0x1b0   : > { %v1087_v54 = vmax.f32 %v1907_v19, %v1064_v22 }
 0x1b2   : > { %v1056_v18 = vpop.permute.xlu1 %1055 }
 0x1b3   : > { %v1068_v16 = vsel %vm1065_vm3, %v1054_v48, %v1056_v18  ;;  %v1083_v45 = vmax.f32 %v1925_v39, %v1056_v18 }
 0x1b4   : > { %v1082_v56 = vmax.f32 %v1922_v4, %v1068_v16  ;;  %v1105_v4 = vpop.permute.xlu2 %1104 }
 0x1b5   : > { %1057 = vrot.lane.b32.xlu2 %v1907_v19, %s1513_s19  ;;  %v1115_v59 = vsel %vm1065_vm3, %v1105_v4, %v1107_v44  ;;  %v1133_v63 = vmax.f32 %v1033_v1, %v1105_v4 }
 0x1b6   : > { %1051 = vrot.lane.b32.xlu1 %v2001_v52, %s1513_s19  ;;  %1049 = vrot.lane.b32.xlu0 %v1925_v39, %s1513_s19  ;;  %v1134_v52 = vmax.f32 %v1987_v23, %v1115_v59  ;;  %v1071_v23 = vsel %vm1065_vm3, %v1062_v25, %v1064_v22 }
 0x1b7   : > { %v1086_v6 = vmax.f32 %v1895_v7, %v1071_v23 }
 0x1ba   : > { %v1097_v21 = vpop.permute.xlu1 %1096 }
 0x1bb   : > { %v1112_v35 = vsel %vm1065_vm3, %v1097_v21, %v1099_v0  ;;  %v1128_v40 = vmax.f32 %v1019_v49, %v1097_v21 }
 0x1bc   : > { %v1129_v53 = vmax.f32 %v1990_v38, %v1112_v35 }
 0x1be   : > { %1150 = vrot.lane.b32.xlu2 %v1129_v53, %s1514_s20  ;;  %1148 = vrot.lane.b32.xlu1 %v1128_v40, %s1514_s20 }
 0x1bf   : > { %1059 = vrot.lane.b32.xlu0 %v2004_v12, %s1513_s19 }
 0x1c6   : > { %1160 = vrot.lane.b32.xlu1 %v1134_v52, %s1514_s20 }
 0x1c7   : > { %1158 = vrot.lane.b32.xlu0 %v1133_v63, %s1514_s20 }
 0x1ff   : > { %v1157_v39 = vpop.permute.xlu2 %1156 }
 0x207   : > { %v1167_v38 = vpop.permute.xlu2 %1166 }
 0x20f   : > { %v1058_v15 = vpop.permute.xlu2 %1057 }
 0x215   : > { %v1153_v10 = vpop.permute.xlu0 %1152 }
 0x218   : > { %v1155_v14 = vpop.permute.xlu1 %1154  ;;  %v1151_v2 = vpop.permute.xlu2 %1150 }
 0x219   : > { %v1171_v5 = vsel %vm1168_vm4, %v1153_v10, %v1155_v14  ;;  %v1172_v12 = vsel %vm1168_vm4, %v1155_v14, %v1157_v39  ;;  %v1170_v19 = vsel %vm1168_vm4, %v1151_v2, %v1153_v10 }
 0x21a   : > { %v1187_v61 = vmax.f32 %v1082_v56, %v1171_v5  ;;  %v1188_v3 = vmax.f32 %v1083_v45, %v1172_v12 }
 0x21c   : > { %1218 = vrot.lane.b32.xlu0 %v1188_v3, %s1515_s21  ;;  %1216 = vrot.lane.b32.xlu2 %v1187_v61, %s1515_s21 }
 0x220   : > { %v1165_v41 = vpop.permute.xlu1 %1164  ;;  %v1163_v47 = vpop.permute.xlu0 %1162 }
 0x221   : > { %v1176_v11 = vsel %vm1168_vm4, %v1165_v41, %v1167_v38  ;;  %v1175_v32 = vsel %vm1168_vm4, %v1163_v47, %v1165_v41 }
 0x222   : > { %v1192_v27 = vmax.f32 %v1087_v54, %v1176_v11  ;;  %v1191_v17 = vmax.f32 %v1086_v6, %v1175_v32 }
 0x224   : > { %1222 = vrot.lane.b32.xlu2 %v1192_v27, %s1515_s21  ;;  %1220 = vrot.lane.b32.xlu1 %v1191_v17, %s1515_s21 }
 0x228   : > { %v1052_v62 = vpop.permute.xlu1 %1051  ;;  %v1050_v8 = vpop.permute.xlu0 %1049 }
 0x229   : > { %v1067_v1 = vsel %vm1065_vm3, %v1052_v62, %v1054_v48  ;;  %v1066_v49 = vsel %vm1065_vm3, %v1050_v8, %v1052_v62 }
 0x22a   : > { %v1081_v7 = vmax.f32 %v1945_v60, %v1067_v1  ;;  %v1080_v42 = vmax.f32 %v1967_v37, %v1066_v49 }
 0x22c   : > { %v1186_v28 = vmax.f32 %v1081_v7, %v1170_v19 }
 0x22e   : > { %1199 = vrot.lane.b32.xlu1 %v1186_v28, %s1515_s21 }
 0x230   : > { %v1149_v24 = vpop.permute.xlu1 %1148 }
 0x231   : > { %v1169_v29 = vsel %vm1168_vm4, %v1149_v24, %v1151_v2  ;;  %v1060_v0 = vpop.permute.xlu0 %1059 }
 0x232   : > { %v1185_v50 = vmax.f32 %v1080_v42, %v1169_v29  ;;  %v1070_v34 = vsel %vm1065_vm3, %v1060_v0, %v1062_v25  ;;  %v1069_v60 = vsel %vm1065_vm3, %v1058_v15, %v1060_v0 }
 0x233   : > { %v1085_v31 = vmax.f32 %v1978_v26, %v1070_v34  ;;  %v1084_v9 = vmax.f32 %v1972_v57, %v1069_v60 }
 0x234   : > { %1197 = vrot.lane.b32.xlu0 %v1185_v50, %s1515_s21 }
 0x238   : > { %v1161_v33 = vpop.permute.xlu1 %1160 }
 0x239   : > { %v1174_v46 = vsel %vm1168_vm4, %v1161_v33, %v1163_v47  ;;  %v1159_v30 = vpop.permute.xlu0 %1158 }
 0x23a   : > { %v1190_v37 = vmax.f32 %v1085_v31, %v1174_v46  ;;  %v1173_v20 = vsel %vm1168_vm4, %v1159_v30, %v1161_v33 }
 0x23b   : > { %v1189_v13 = vmax.f32 %v1084_v9, %v1173_v20 }
 0x23c   : > { %1203 = vrot.lane.b32.xlu0 %v1190_v37, %s1515_s21 }
 0x23d   : > { %1201 = vrot.lane.b32.xlu2 %v1189_v13, %s1515_s21 }
 0x276   : > { %v1217_v55 = vpop.permute.xlu2 %1216 }
 0x277   : > { %v1230_v44 = vmax.f32 %v1186_v28, %v1217_v55 }
 0x279   : > { %1238 = vrot.lane.b32.xlu1 %v1230_v44, %s1516_s22 }
 0x27e   : > { %v1223_v43 = vpop.permute.xlu2 %1222 }
 0x28e   : > { %v1219_v26 = vpop.permute.xlu0 %1218 }
 0x28f   : > { %v1224_v51 = vsel %vm1205_vm5, %v1217_v55, %v1219_v26 }
 0x290   : > { %v1231_v57 = vmax.f32 %v1187_v61, %v1224_v51 }
 0x292   : > { %1240 = vrot.lane.b32.xlu2 %v1231_v57, %s1516_s22 }
 0x296   : > { %v1221_v36 = vpop.permute.xlu1 %1220 }
 0x297   : > { %v1225_v58 = vsel %vm1205_vm5, %v1221_v36, %v1223_v43  ;;  %v1232_v48 = vmax.f32 %v1190_v37, %v1221_v36  ;;  %v1202_v45 = vpop.permute.xlu2 %1201 }
 0x298   : > { %v1233_v18 = vmax.f32 %v1191_v17, %v1225_v58 }
 0x299   : > { %1242 = vrot.lane.b32.xlu0 %v1232_v48, %s1516_s22 }
 0x29a   : > { %1244 = vrot.lane.b32.xlu1 %v1233_v18, %s1516_s22 }
 0x2a0   : > { %v1200_v16 = vpop.permute.xlu1 %1199 }
 0x2a6   : > { %v1198_v56 = vpop.permute.xlu0 %1197 }
 0x2a7   : > { %v1206_v25 = vsel %vm1205_vm5, %v1198_v56, %v1200_v16 }
 0x2a8   : > { %v1210_v35 = vmax.f32 %v1185_v50, %v1206_v25 }
 0x2ae   : > { %v1204_v59 = vpop.permute.xlu0 %1203 }
 0x2af   : > { %v1207_v52 = vsel %vm1205_vm5, %v1202_v45, %v1204_v59 }
 0x2b0   : > { %v1211_v39 = vmax.f32 %v1189_v13, %v1207_v52 }
 0x2eb   : > { %v1239_v21 = vpop.permute.xlu1 %1238 }
 0x2ec   : > { %v1241_v40 = vpop.permute.xlu2 %1240 }
 0x2ed   : > { %v1247_v53 = vsel %vm1246_vm6, %v1239_v21, %v1241_v40 }
 0x2ee   : > { %v1251_v4 = vmax.f32 %v1210_v35, %v1247_v53 }
 0x2f0   : > { %1255 = vrot.lane.b32.xlu2 %v1251_v4, %s1517_s23 }
 0x30b   : > { %v1243_v63 = vpop.permute.xlu0 %1242 }
 0x30c   : > { %v1245_v22 = vpop.permute.xlu1 %1244 }
 0x30d   : > { %v1248_v38 = vsel %vm1246_vm6, %v1243_v63, %v1245_v22 }
 0x30e   : > { %v1252_v10 = vmax.f32 %v1211_v39, %v1248_v38 }
 0x310   : > { %1257 = vrot.lane.b32.xlu0 %v1252_v10, %s1517_s23 }
 0x34a   : > { %v1256_v14 = vpop.permute.xlu2 %1255 }
 0x34b   : > { %v1261_v5 = vmax.f32 %v1251_v4, %v1256_v14 }
 0x34d   : > { %1265 = vrot.lane.b32.xlu1 %v1261_v5, %s1518_s24 }
 0x382   : > { %v1258_v12 = vpop.permute.xlu0 %1257 }
 0x383   : > { %v1262_v61 = vmax.f32 %v1252_v10, %v1258_v12 }
 0x385   : > { %1267 = vrot.lane.b32.xlu2 %v1262_v61, %s1518_s24 }
 0x3bf   : > { %v1266_v3 = vpop.permute.xlu1 %1265 }
 0x3c0   : > { %v1271_v23 = vmax.f32 %v1261_v5, %v1266_v3 }
 0x3c2   : > { %1274 = vst.msk [vmem:[%s143_s28] sm:$0xff] %vm1273_vm7, %v1271_v23 }
 0x3df   : > { %v1268_v15 = vpop.permute.xlu2 %1267 }
 0x3e0   : > { %v1272_v6 = vmax.f32 %v1262_v61, %v1268_v15 }
 0x3e2   : > { %1275 = vst.msk [vmem:[%s143_s28 + $0x8] sm:$0xff] %vm1273_vm7, %v1272_v6 }
 0x3e3 PF: > { %s12_s9 = sadd.s32 1, %s1511_s9  }
 0x3e4   : > { %p9_p4 = scmp.ge.s32.totalorder %s12_s9, 4  }
 0x3e6   :  { %11 = sbr.rel (!%p9_p4) target bundleno = 1 (0x1), region = 58 }

</bundles_post_ra>
